<compile_context>
chip_gen: v6e
topology: v6e:2x2x1
jax: 0.10.0
libtpu: 0.0.40
codegen_flags: <defaults>
</compile_context>

<pallas_src>
import functools

import jax
import jax.numpy as jnp
from jax.experimental import pallas as pl
from jax.experimental.pallas import tpu as pltpu


# ---------------------------------------------------------------------------
# small helpers
# ---------------------------------------------------------------------------
def _round_up(x, m):
    return (x + m - 1) // m * m


def _pad_last(a, to, fill=0.0):
    pad = to - a.shape[-1]
    if pad == 0:
        return a
    cfg = [(0, 0)] * (a.ndim - 1) + [(0, pad)]
    return jnp.pad(a, cfg, constant_values=fill)


def _pad_weight(w_hwio, cin_p, cout_p):
    """(3,3,Cin,Cout) HWIO -> (9, Cin_p, Cout_p) bf16, zero-padded channels."""
    kh, kw, cin, cout = w_hwio.shape
    w9 = w_hwio.reshape(kh * kw, cin, cout)
    w9 = jnp.pad(w9, ((0, 0), (0, cin_p - cin), (0, cout_p - cout)))
    return w9.astype(jnp.bfloat16)


def _build_row_slabs(x_nhwc, tile_rows):
    """(N,H,W,C) -> (N*H//TH, TH+2, W+2, C): zero-pad spatially, then stack
    overlapping row slabs (1-row halo top/bottom) so each grid step reads one
    plain Blocked tile that Pallas auto-pipelines."""
    n, h, w, c = x_nhwc.shape
    nt = h // tile_rows
    xp = jnp.pad(x_nhwc, ((0, 0), (1, 1), (1, 1), (0, 0)))
    slabs = jnp.stack(
        [xp[:, t * tile_rows:t * tile_rows + tile_rows + 2] for t in range(nt)],
        axis=1)
    return slabs.reshape(n * nt, tile_rows + 2, w + 2, c)


def _pick_tile_rows(h, w, cmax_p, vmem_budget_bytes=24 * 1024 * 1024):
    """Largest row tile whose working set (double-buffered slab + output + acc)
    fits a conservative budget sized for v7x (64 MiB physical / 32 MiB scoped);
    anything that fits v7x automatically fits v5e/v6e."""
    best = 1
    for th in range(1, h + 1):
        if h % th or (th * w) % 8:
            continue
        slab = (th + 2) * (w + 2) * cmax_p * 4          # f32 worst case (pass 2)
        zblk = th * w * cmax_p * 4
        if 2 * slab + 3 * zblk <= vmem_budget_bytes:
            best = th
    return best


# ---------------------------------------------------------------------------
# Pallas kernel: one conv row-tile (in-kernel im2col) + per-tile BN partials.
# Optionally fuses the *previous* block's folded BN (scale/shift) + ReLU onto
# the loaded raw conv output before the matmuls (used for conv2).
# ---------------------------------------------------------------------------
def _conv_tile_kernel(x_ref, w_ref, s_ref, t_ref, z_ref, stats_ref, *,
                      tile_rows, out_w, n_row_tiles, apply_prev_bn):
    th, w = tile_rows, out_w
    cin_p = x_ref.shape[-1]
    cout_p = w_ref.shape[-1]

    a = x_ref[0]                                        # (th+2, w+2, cin_p)
    if apply_prev_bn:
        # Fused BN(prev conv, folded scale/shift) + ReLU, then zero the
        # spatial-padding ring so the border is zero in *activation* space.
        a = jnp.maximum(a.astype(jnp.float32) * s_ref[...] + t_ref[...], 0.0)
        rows = jax.lax.broadcasted_iota(jnp.int32, (th + 2, w + 2, 1), 0)
        cols = jax.lax.broadcasted_iota(jnp.int32, (th + 2, w + 2, 1), 1)
        t_idx = pl.program_id(1)
        border = (cols == 0) | (cols == w + 1)
        border = border | ((rows == 0) & (t_idx == 0))
        border = border | ((rows == th + 1) & (t_idx == n_row_tiles - 1))
        a = jnp.where(border, 0.0, a)
    a = a.astype(jnp.bfloat16)                          # bf16 MXU operands

    acc = jnp.zeros((th * w, cout_p), jnp.float32)
    for dh in range(3):                                 # in-kernel im2col:
        for dw in range(3):                             # 9 shifted matmuls
            lhs = a[dh:dh + th, dw:dw + w, :].reshape(th * w, cin_p)
            acc = acc + jnp.dot(lhs, w_ref[dh * 3 + dw],
                                preferred_element_type=jnp.float32)

    z_ref[...] = acc                                    # pre-BN conv output (f32)
    ssum = jnp.sum(acc, axis=0, keepdims=True)          # per-tile BN partials
    ssq = jnp.sum(acc * acc, axis=0, keepdims=True)
    stats_ref[...] = jnp.concatenate([ssum, ssq], axis=0)[None]


def _conv_pass(slabs, w9, s_prev, t_prev, *, n, h, w, tile_rows, apply_prev_bn):
    nt = h // tile_rows
    cin_p = slabs.shape[-1]
    cout_p = w9.shape[-1]
    m = n * h * w
    tm = tile_rows * w

    kern = functools.partial(_conv_tile_kernel, tile_rows=tile_rows, out_w=w,
                             n_row_tiles=nt, apply_prev_bn=apply_prev_bn)

    flops = 2 * m * 9 * cin_p * cout_p
    bytes_accessed = (slabs.size * slabs.dtype.itemsize
                      + w9.size * w9.dtype.itemsize
                      + m * cout_p * 4)

    z, stats = pl.pallas_call(
        kern,
        out_shape=(jax.ShapeDtypeStruct((m, cout_p), jnp.float32),
                   jax.ShapeDtypeStruct((n * nt, 2, cout_p), jnp.float32)),
        grid=(n, nt),
        in_specs=[
            pl.BlockSpec((1, tile_rows + 2, w + 2, cin_p),
                         lambda i, j: (i * nt + j, 0, 0, 0)),
            pl.BlockSpec((9, cin_p, cout_p), lambda i, j: (0, 0, 0)),
            pl.BlockSpec((1, cin_p), lambda i, j: (0, 0)),
            pl.BlockSpec((1, cin_p), lambda i, j: (0, 0)),
        ],
        out_specs=(
            pl.BlockSpec((tm, cout_p), lambda i, j: (i * nt + j, 0)),
            pl.BlockSpec((1, 2, cout_p), lambda i, j: (i * nt + j, 0, 0)),
        ),
        compiler_params=pltpu.CompilerParams(
            dimension_semantics=("parallel", "parallel"),
            vmem_limit_bytes=32 * 1024 * 1024),
        cost_estimate=pl.CostEstimate(flops=flops, transcendentals=0,
                                      bytes_accessed=bytes_accessed),
    )(slabs, w9, s_prev, t_prev)
    return z, stats


def _fold_bn(stats, gamma_p, beta_p, count, eps):
    """Per-tile (sum, sum_sq) partials -> folded per-channel scale/shift (f32)."""
    ssum = jnp.sum(stats[:, 0, :], axis=0)
    ssq = jnp.sum(stats[:, 1, :], axis=0)
    mean = ssum / count
    var = jnp.maximum(ssq / count - mean * mean, 0.0)   # biased var (PyTorch train)
    s = gamma_p * jax.lax.rsqrt(var + eps)
    t = beta_p - mean * s
    return (s.reshape(1, -1).astype(jnp.float32),
            t.reshape(1, -1).astype(jnp.float32))


# ---------------------------------------------------------------------------
# Pallas kernel: final BN + ReLU epilogue (lane-dense, tiled over rows).
# ---------------------------------------------------------------------------
def _bn_relu_kernel(z_ref, s_ref, t_ref, o_ref):
    o_ref[...] = jnp.maximum(z_ref[...] * s_ref[...] + t_ref[...], 0.0)


def _bn_relu(z, s, t, tm):
    m, c = z.shape
    return pl.pallas_call(
        _bn_relu_kernel,
        out_shape=jax.ShapeDtypeStruct((m, c), jnp.float32),
        grid=(m // tm,),
        in_specs=[pl.BlockSpec((tm, c), lambda i: (i, 0)),
                  pl.BlockSpec((1, c), lambda i: (0, 0)),
                  pl.BlockSpec((1, c), lambda i: (0, 0))],
        out_specs=pl.BlockSpec((tm, c), lambda i: (i, 0)),
        compiler_params=pltpu.CompilerParams(
            dimension_semantics=("parallel",),
            vmem_limit_bytes=32 * 1024 * 1024),
        cost_estimate=pl.CostEstimate(flops=2 * m * c, transcendentals=0,
                                      bytes_accessed=2 * m * c * 4),
    )(z, s, t)


# ---------------------------------------------------------------------------
# DoubleConv.forward (training-mode BatchNorm).  Input/output NCHW f32.
# ---------------------------------------------------------------------------
def double_conv(x_nchw, params, eps=1e-5, tile_rows=None):
    n, cin, h, w = x_nchw.shape
    cmid = params["w1"].shape[-1]
    cout = params["w2"].shape[-1]

    cin_p = _round_up(cin, 8)        # K-side padding (>= 8)
    cmid_p = _round_up(cmid, 128)    # lane-dense conv1 output / conv2 input
    cout_p = _round_up(cout, 128)    # lane-dense conv2 output

    if tile_rows is None:
        tile_rows = _pick_tile_rows(h, w, max(cin_p, cmid_p, cout_p))
    assert h % tile_rows == 0 and (tile_rows * w) % 8 == 0, (h, w, tile_rows)

    x = jnp.transpose(x_nchw, (0, 2, 3, 1)).astype(jnp.float32)   # NCHW -> NHWC
    x = _pad_last(x, cin_p)

    # ---- pass 1: conv1.  (conv biases b1/b2 are dropped: exactly cancelled by
    # the training-mode BN mean subtraction.) --------------------------------
    slabs1 = _build_row_slabs(x, tile_rows).astype(jnp.bfloat16)
    w1 = _pad_weight(params["w1"], cin_p, cmid_p)
    one = jnp.ones((1, cin_p), jnp.float32)      # dummy scale/shift (unused)
    zero = jnp.zeros((1, cin_p), jnp.float32)
    z1, stats1 = _conv_pass(slabs1, w1, one, zero, n=n, h=h, w=w,
                            tile_rows=tile_rows, apply_prev_bn=False)
    s1, t1 = _fold_bn(stats1, _pad_last(params["g1"], cmid_p, fill=1.0),
                      _pad_last(params["beta1"], cmid_p), n * h * w, eps)

    # ---- pass 2: fused BN1 + ReLU (applied to the loaded z1 slab) -> conv2 --
    slabs2 = _build_row_slabs(z1.reshape(n, h, w, cmid_p), tile_rows)  # f32 BN math
    w2 = _pad_weight(params["w2"], cmid_p, cout_p)
    z2, stats2 = _conv_pass(slabs2, w2, s1, t1, n=n, h=h, w=w,
                            tile_rows=tile_rows, apply_prev_bn=True)
    s2, t2 = _fold_bn(stats2, _pad_last(params["g2"], cout_p, fill=1.0),
                      _pad_last(params["beta2"], cout_p), n * h * w, eps)

    # ---- pass 3: BN2 + ReLU epilogue ----------------------------------------
    y = _bn_relu(z2, s2, t2, tile_rows * w)
    y = y.reshape(n, h, w, cout_p)[:, :, :, :cout]                 # strip padding
    return jnp.transpose(y, (0, 3, 1, 2))                          # NHWC -> NCHW


# ---------------------------------------------------------------------------
# Pure-JAX reference (lax conv, f32, with conv bias) for correctness check.
# ---------------------------------------------------------------------------
def ref_double_conv(x_nchw, params, eps=1e-5):
    def block(x, w, b, g, bt):
        y = jax.lax.conv_general_dilated(
            x, w, window_strides=(1, 1), padding=((1, 1), (1, 1)),
            dimension_numbers=("NHWC", "HWIO", "NHWC"))
        y = y + b
        mean = jnp.mean(y, axis=(0, 1, 2), keepdims=True)
        var = jnp.mean((y - mean) ** 2, axis=(0, 1, 2), keepdims=True)
        y = (y - mean) * jax.lax.rsqrt(var + eps) * g + bt
        return jnp.maximum(y, 0.0)

    x = jnp.transpose(x_nchw, (0, 2, 3, 1))
    y = block(x, params["w1"], params["b1"], params["g1"], params["beta1"])
    y = block(y, params["w2"], params["b2"], params["g2"], params["beta2"])
    return jnp.transpose(y, (0, 3, 1, 2))


# ---------------------------------------------------------------------------
# Deterministic parameter init (shapes from DoubleConv.__init__).
# ---------------------------------------------------------------------------
def init_params(key, in_channels, out_channels, mid_channels=None):
    if not mid_channels:
        mid_channels = out_channels
    k1, k2, k3, k4 = jax.random.split(key, 4)
    return {
        # conv weights stored HWIO (3, 3, Cin, Cout)
        "w1": 0.1 * jax.random.normal(k1, (3, 3, in_channels, mid_channels), jnp.float32),
        "b1": 0.05 * jax.random.normal(k2, (mid_channels,), jnp.float32),
        "g1": jnp.ones((mid_channels,), jnp.float32),
        "beta1": jnp.zeros((mid_channels,), jnp.float32),
        "w2": 0.1 * jax.random.normal(k3, (3, 3, mid_channels, out_channels), jnp.float32),
        "b2": 0.05 * jax.random.normal(k4, (out_channels,), jnp.float32),
        "g2": jnp.ones((out_channels,), jnp.float32),
        "beta2": jnp.zeros((out_channels,), jnp.float32),
    }


if __name__ == "__main__":
    key = jax.random.PRNGKey(0)
    kx, kp = jax.random.split(key)

    N, Cin, H, W = 2, 4, 16, 16
    Cout = 8
    x = jax.random.normal(kx, (N, Cin, H, W), jnp.float32)   # NCHW, like PyTorch
    params = init_params(kp, Cin, Cout)

    fwd = jax.jit(functools.partial(double_conv, tile_rows=8))   # 2x2 grid per conv
    out = jax.block_until_ready(fwd(x, params))
    ref = jax.block_until_ready(ref_double_conv(x, params))

    assert out.shape == (N, Cout, H, W), out.shape
    max_err = float(jnp.max(jnp.abs(out - ref)))
    # bf16 MXU operands vs. f32 reference -> few-percent tolerance.
    assert jnp.allclose(out, ref, rtol=5e-2, atol=5e-2), max_err
    print("KERNEL_OK")
</pallas_src>

<mosaic_0001>
module attributes {stable_mosaic.version = 11 : i64} {
  func.func @_conv_tile_kernel(%arg0: i32, %arg1: i32, %arg2: memref<1x10x18x8xbf16, #tpu.memory_space<vmem>>, %arg3: memref<9x8x128xbf16, #tpu.memory_space<vmem>>, %arg4: memref<1x8xf32, #tpu.memory_space<vmem>>, %arg5: memref<1x8xf32, #tpu.memory_space<vmem>>, %arg6: memref<128x128xf32, #tpu.memory_space<vmem>>, %arg7: memref<1x2x128xf32, #tpu.memory_space<vmem>>) attributes {dimension_semantics = [#tpu.dimension_semantics<parallel>, #tpu.dimension_semantics<parallel>], iteration_bounds = array<i64: 2, 2>, scalar_prefetch = 0 : i64, scratch_operands = 0 : i64, tpu.core_type = #tpu.core_type<tc>, window_params = [{transform_indices = @transform_0, window_bounds = array<i64: 1, 10, 18, 8>}, {pipeline_mode = #tpu.pipeline_mode<synchronous>, transform_indices = @transform_1, window_bounds = array<i64: 9, 8, 128>}, {pipeline_mode = #tpu.pipeline_mode<synchronous>, transform_indices = @transform_2, window_bounds = array<i64: 1, 8>}, {pipeline_mode = #tpu.pipeline_mode<synchronous>, transform_indices = @transform_3, window_bounds = array<i64: 1, 8>}, {transform_indices = @transform_4, window_bounds = array<i64: 128, 128>}, {transform_indices = @transform_5, window_bounds = array<i64: 1, 2, 128>}]} {
    %c0 = arith.constant 0 : index
    %c0_0 = arith.constant 0 : index
    %c0_1 = arith.constant 0 : index
    %c0_2 = arith.constant 0 : index
    %0 = vector.load %arg2[%c0, %c0_0, %c0_1, %c0_2] : memref<1x10x18x8xbf16, #tpu.memory_space<vmem>>, vector<1x10x18x8xbf16>
    %1 = vector.shape_cast %0 : vector<1x10x18x8xbf16> to vector<10x18x8xbf16>
    %cst = arith.constant 0.000000e+00 : f32
    %2 = vector.broadcast %cst : f32 to vector<128x128xf32>
    %3 = vector.extract_strided_slice %1 {offsets = [0, 0, 0], sizes = [8, 16, 8], strides = [1, 1, 1]} : vector<10x18x8xbf16> to vector<8x16x8xbf16>
    %4 = vector.shape_cast %3 : vector<8x16x8xbf16> to vector<128x8xbf16>
    %c0_3 = arith.constant 0 : index
    %c0_4 = arith.constant 0 : index
    %c0_5 = arith.constant 0 : index
    %5 = vector.load %arg3[%c0_3, %c0_4, %c0_5] : memref<9x8x128xbf16, #tpu.memory_space<vmem>>, vector<1x8x128xbf16>
    %6 = vector.shape_cast %5 : vector<1x8x128xbf16> to vector<8x128xbf16>
    %cst_6 = arith.constant dense<0.000000e+00> : vector<128x128xf32>
    %7 = tpu.matmul %4, %6, %cst_6 {dimension_numbers = #tpu.dot_dimension_numbers<[1], [0], [0], [1], [0, 0, 1, 1], [], []>} : vector<128x8xbf16>, vector<8x128xbf16>, vector<128x128xf32> -> vector<128x128xf32>
    %8 = arith.addf %2, %7 : vector<128x128xf32>
    %9 = vector.extract_strided_slice %1 {offsets = [0, 1, 0], sizes = [8, 16, 8], strides = [1, 1, 1]} : vector<10x18x8xbf16> to vector<8x16x8xbf16>
    %10 = vector.shape_cast %9 : vector<8x16x8xbf16> to vector<128x8xbf16>
    %c1 = arith.constant 1 : index
    %c0_7 = arith.constant 0 : index
    %c0_8 = arith.constant 0 : index
    %11 = vector.load %arg3[%c1, %c0_7, %c0_8] : memref<9x8x128xbf16, #tpu.memory_space<vmem>>, vector<1x8x128xbf16>
    %12 = vector.shape_cast %11 : vector<1x8x128xbf16> to vector<8x128xbf16>
    %cst_9 = arith.constant dense<0.000000e+00> : vector<128x128xf32>
    %13 = tpu.matmul %10, %12, %cst_9 {dimension_numbers = #tpu.dot_dimension_numbers<[1], [0], [0], [1], [0, 0, 1, 1], [], []>} : vector<128x8xbf16>, vector<8x128xbf16>, vector<128x128xf32> -> vector<128x128xf32>
    %14 = arith.addf %8, %13 : vector<128x128xf32>
    %15 = vector.extract_strided_slice %1 {offsets = [0, 2, 0], sizes = [8, 16, 8], strides = [1, 1, 1]} : vector<10x18x8xbf16> to vector<8x16x8xbf16>
    %16 = vector.shape_cast %15 : vector<8x16x8xbf16> to vector<128x8xbf16>
    %c2 = arith.constant 2 : index
    %c0_10 = arith.constant 0 : index
    %c0_11 = arith.constant 0 : index
    %17 = vector.load %arg3[%c2, %c0_10, %c0_11] : memref<9x8x128xbf16, #tpu.memory_space<vmem>>, vector<1x8x128xbf16>
    %18 = vector.shape_cast %17 : vector<1x8x128xbf16> to vector<8x128xbf16>
    %cst_12 = arith.constant dense<0.000000e+00> : vector<128x128xf32>
    %19 = tpu.matmul %16, %18, %cst_12 {dimension_numbers = #tpu.dot_dimension_numbers<[1], [0], [0], [1], [0, 0, 1, 1], [], []>} : vector<128x8xbf16>, vector<8x128xbf16>, vector<128x128xf32> -> vector<128x128xf32>
    %20 = arith.addf %14, %19 : vector<128x128xf32>
    %21 = vector.extract_strided_slice %1 {offsets = [1, 0, 0], sizes = [8, 16, 8], strides = [1, 1, 1]} : vector<10x18x8xbf16> to vector<8x16x8xbf16>
    %22 = vector.shape_cast %21 : vector<8x16x8xbf16> to vector<128x8xbf16>
    %c3 = arith.constant 3 : index
    %c0_13 = arith.constant 0 : index
    %c0_14 = arith.constant 0 : index
    %23 = vector.load %arg3[%c3, %c0_13, %c0_14] : memref<9x8x128xbf16, #tpu.memory_space<vmem>>, vector<1x8x128xbf16>
    %24 = vector.shape_cast %23 : vector<1x8x128xbf16> to vector<8x128xbf16>
    %cst_15 = arith.constant dense<0.000000e+00> : vector<128x128xf32>
    %25 = tpu.matmul %22, %24, %cst_15 {dimension_numbers = #tpu.dot_dimension_numbers<[1], [0], [0], [1], [0, 0, 1, 1], [], []>} : vector<128x8xbf16>, vector<8x128xbf16>, vector<128x128xf32> -> vector<128x128xf32>
    %26 = arith.addf %20, %25 : vector<128x128xf32>
    %27 = vector.extract_strided_slice %1 {offsets = [1, 1, 0], sizes = [8, 16, 8], strides = [1, 1, 1]} : vector<10x18x8xbf16> to vector<8x16x8xbf16>
    %28 = vector.shape_cast %27 : vector<8x16x8xbf16> to vector<128x8xbf16>
    %c4 = arith.constant 4 : index
    %c0_16 = arith.constant 0 : index
    %c0_17 = arith.constant 0 : index
    %29 = vector.load %arg3[%c4, %c0_16, %c0_17] : memref<9x8x128xbf16, #tpu.memory_space<vmem>>, vector<1x8x128xbf16>
    %30 = vector.shape_cast %29 : vector<1x8x128xbf16> to vector<8x128xbf16>
    %cst_18 = arith.constant dense<0.000000e+00> : vector<128x128xf32>
    %31 = tpu.matmul %28, %30, %cst_18 {dimension_numbers = #tpu.dot_dimension_numbers<[1], [0], [0], [1], [0, 0, 1, 1], [], []>} : vector<128x8xbf16>, vector<8x128xbf16>, vector<128x128xf32> -> vector<128x128xf32>
    %32 = arith.addf %26, %31 : vector<128x128xf32>
    %33 = vector.extract_strided_slice %1 {offsets = [1, 2, 0], sizes = [8, 16, 8], strides = [1, 1, 1]} : vector<10x18x8xbf16> to vector<8x16x8xbf16>
    %34 = vector.shape_cast %33 : vector<8x16x8xbf16> to vector<128x8xbf16>
    %c5 = arith.constant 5 : index
    %c0_19 = arith.constant 0 : index
    %c0_20 = arith.constant 0 : index
    %35 = vector.load %arg3[%c5, %c0_19, %c0_20] : memref<9x8x128xbf16, #tpu.memory_space<vmem>>, vector<1x8x128xbf16>
    %36 = vector.shape_cast %35 : vector<1x8x128xbf16> to vector<8x128xbf16>
    %cst_21 = arith.constant dense<0.000000e+00> : vector<128x128xf32>
    %37 = tpu.matmul %34, %36, %cst_21 {dimension_numbers = #tpu.dot_dimension_numbers<[1], [0], [0], [1], [0, 0, 1, 1], [], []>} : vector<128x8xbf16>, vector<8x128xbf16>, vector<128x128xf32> -> vector<128x128xf32>
    %38 = arith.addf %32, %37 : vector<128x128xf32>
    %39 = vector.extract_strided_slice %1 {offsets = [2, 0, 0], sizes = [8, 16, 8], strides = [1, 1, 1]} : vector<10x18x8xbf16> to vector<8x16x8xbf16>
    %40 = vector.shape_cast %39 : vector<8x16x8xbf16> to vector<128x8xbf16>
    %c6 = arith.constant 6 : index
    %c0_22 = arith.constant 0 : index
    %c0_23 = arith.constant 0 : index
    %41 = vector.load %arg3[%c6, %c0_22, %c0_23] : memref<9x8x128xbf16, #tpu.memory_space<vmem>>, vector<1x8x128xbf16>
    %42 = vector.shape_cast %41 : vector<1x8x128xbf16> to vector<8x128xbf16>
    %cst_24 = arith.constant dense<0.000000e+00> : vector<128x128xf32>
    %43 = tpu.matmul %40, %42, %cst_24 {dimension_numbers = #tpu.dot_dimension_numbers<[1], [0], [0], [1], [0, 0, 1, 1], [], []>} : vector<128x8xbf16>, vector<8x128xbf16>, vector<128x128xf32> -> vector<128x128xf32>
    %44 = arith.addf %38, %43 : vector<128x128xf32>
    %45 = vector.extract_strided_slice %1 {offsets = [2, 1, 0], sizes = [8, 16, 8], strides = [1, 1, 1]} : vector<10x18x8xbf16> to vector<8x16x8xbf16>
    %46 = vector.shape_cast %45 : vector<8x16x8xbf16> to vector<128x8xbf16>
    %c7 = arith.constant 7 : index
    %c0_25 = arith.constant 0 : index
    %c0_26 = arith.constant 0 : index
    %47 = vector.load %arg3[%c7, %c0_25, %c0_26] : memref<9x8x128xbf16, #tpu.memory_space<vmem>>, vector<1x8x128xbf16>
    %48 = vector.shape_cast %47 : vector<1x8x128xbf16> to vector<8x128xbf16>
    %cst_27 = arith.constant dense<0.000000e+00> : vector<128x128xf32>
    %49 = tpu.matmul %46, %48, %cst_27 {dimension_numbers = #tpu.dot_dimension_numbers<[1], [0], [0], [1], [0, 0, 1, 1], [], []>} : vector<128x8xbf16>, vector<8x128xbf16>, vector<128x128xf32> -> vector<128x128xf32>
    %50 = arith.addf %44, %49 : vector<128x128xf32>
    %51 = vector.extract_strided_slice %1 {offsets = [2, 2, 0], sizes = [8, 16, 8], strides = [1, 1, 1]} : vector<10x18x8xbf16> to vector<8x16x8xbf16>
    %52 = vector.shape_cast %51 : vector<8x16x8xbf16> to vector<128x8xbf16>
    %c8 = arith.constant 8 : index
    %c0_28 = arith.constant 0 : index
    %c0_29 = arith.constant 0 : index
    %53 = vector.load %arg3[%c8, %c0_28, %c0_29] : memref<9x8x128xbf16, #tpu.memory_space<vmem>>, vector<1x8x128xbf16>
    %54 = vector.shape_cast %53 : vector<1x8x128xbf16> to vector<8x128xbf16>
    %cst_30 = arith.constant dense<0.000000e+00> : vector<128x128xf32>
    %55 = tpu.matmul %52, %54, %cst_30 {dimension_numbers = #tpu.dot_dimension_numbers<[1], [0], [0], [1], [0, 0, 1, 1], [], []>} : vector<128x8xbf16>, vector<8x128xbf16>, vector<128x128xf32> -> vector<128x128xf32>
    %56 = arith.addf %50, %55 : vector<128x128xf32>
    %c0_31 = arith.constant 0 : index
    %c0_32 = arith.constant 0 : index
    %57 = vector.load %arg6[%c0_31, %c0_32] : memref<128x128xf32, #tpu.memory_space<vmem>>, vector<128x128xf32>
    tpu.vector_store %arg6[%c0_31, %c0_32], %56 {strides = array<i32>} : memref<128x128xf32, #tpu.memory_space<vmem>>, vector<128x128xf32>,
    %cst_33 = arith.constant dense<0.000000e+00> : vector<128xf32>
    %58 = vector.multi_reduction <add>, %56, %cst_33 [0] : vector<128x128xf32> to vector<128xf32>
    %59 = vector.shape_cast %58 : vector<128xf32> to vector<1x128xf32>
    %60 = arith.mulf %56, %56 : vector<128x128xf32>
    %cst_34 = arith.constant dense<0.000000e+00> : vector<128xf32>
    %61 = vector.multi_reduction <add>, %60, %cst_34 [0] : vector<128x128xf32> to vector<128xf32>
    %62 = vector.shape_cast %61 : vector<128xf32> to vector<1x128xf32>
    %63 = tpu.concatenate %59, %62 in 0 : vector<1x128xf32>, vector<1x128xf32> -> vector<2x128xf32>
    %64 = vector.shape_cast %63 : vector<2x128xf32> to vector<1x2x128xf32>
    %c0_35 = arith.constant 0 : index
    %c0_36 = arith.constant 0 : index
    %c0_37 = arith.constant 0 : index
    %65 = vector.load %arg7[%c0_35, %c0_36, %c0_37] : memref<1x2x128xf32, #tpu.memory_space<vmem>>, vector<1x2x128xf32>
    tpu.vector_store %arg7[%c0_35, %c0_36, %c0_37], %64 {strides = array<i32>} : memref<1x2x128xf32, #tpu.memory_space<vmem>>, vector<1x2x128xf32>,
    return
  }
  func.func @transform_0(%arg0: i32, %arg1: i32) -> (i32, i32, i32, i32) {
    %c2_i32 = arith.constant 2 : i32
    %0 = arith.muli %arg0, %c2_i32 : i32
    %1 = arith.addi %0, %arg1 : i32
    %c0_i32 = arith.constant 0 : i32
    %c0_i32_0 = arith.constant 0 : i32
    %c0_i32_1 = arith.constant 0 : i32
    %c0_i32_2 = arith.constant 0 : i32
    return %1, %c0_i32, %c0_i32_0, %c0_i32_1 : i32, i32, i32, i32
  }
  func.func @transform_1(%arg0: i32, %arg1: i32) -> (i32, i32, i32) {
    %c0_i32 = arith.constant 0 : i32
    %c0_i32_0 = arith.constant 0 : i32
    %c0_i32_1 = arith.constant 0 : i32
    %c0_i32_2 = arith.constant 0 : i32
    return %c0_i32, %c0_i32_0, %c0_i32_1 : i32, i32, i32
  }
  func.func @transform_2(%arg0: i32, %arg1: i32) -> (i32, i32) {
    %c0_i32 = arith.constant 0 : i32
    %c0_i32_0 = arith.constant 0 : i32
    %c0_i32_1 = arith.constant 0 : i32
    return %c0_i32, %c0_i32_0 : i32, i32
  }
  func.func @transform_3(%arg0: i32, %arg1: i32) -> (i32, i32) {
    %c0_i32 = arith.constant 0 : i32
    %c0_i32_0 = arith.constant 0 : i32
    %c0_i32_1 = arith.constant 0 : i32
    return %c0_i32, %c0_i32_0 : i32, i32
  }
  func.func @transform_4(%arg0: i32, %arg1: i32) -> (i32, i32) {
    %c2_i32 = arith.constant 2 : i32
    %0 = arith.muli %arg0, %c2_i32 : i32
    %1 = arith.addi %0, %arg1 : i32
    %c0_i32 = arith.constant 0 : i32
    %c0_i32_0 = arith.constant 0 : i32
    return %1, %c0_i32 : i32, i32
  }
  func.func @transform_5(%arg0: i32, %arg1: i32) -> (i32, i32, i32) {
    %c2_i32 = arith.constant 2 : i32
    %0 = arith.muli %arg0, %c2_i32 : i32
    %1 = arith.addi %0, %arg1 : i32
    %c0_i32 = arith.constant 0 : i32
    %c0_i32_0 = arith.constant 0 : i32
    %c0_i32_1 = arith.constant 0 : i32
    return %1, %c0_i32, %c0_i32_0 : i32, i32, i32
  }
}

module attributes {stable_mosaic.version = 11 : i64} {
  func.func @_bn_relu_kernel(%arg0: i32, %arg1: memref<128x128xf32, #tpu.memory_space<vmem>>, %arg2: memref<1x128xf32, #tpu.memory_space<vmem>>, %arg3: memref<1x128xf32, #tpu.memory_space<vmem>>, %arg4: memref<128x128xf32, #tpu.memory_space<vmem>>) attributes {dimension_semantics = [#tpu.dimension_semantics<parallel>], iteration_bounds = array<i64: 4>, scalar_prefetch = 0 : i64, scratch_operands = 0 : i64, tpu.core_type = #tpu.core_type<tc>, window_params = [{transform_indices = @transform_0, window_bounds = array<i64: 128, 128>}, {pipeline_mode = #tpu.pipeline_mode<synchronous>, transform_indices = @transform_1, window_bounds = array<i64: 1, 128>}, {pipeline_mode = #tpu.pipeline_mode<synchronous>, transform_indices = @transform_2, window_bounds = array<i64: 1, 128>}, {transform_indices = @transform_3, window_bounds = array<i64: 128, 128>}]} {
    %c0 = arith.constant 0 : index
    %c0_0 = arith.constant 0 : index
    %0 = vector.load %arg1[%c0, %c0_0] : memref<128x128xf32, #tpu.memory_space<vmem>>, vector<128x128xf32>
    %c0_1 = arith.constant 0 : index
    %c0_2 = arith.constant 0 : index
    %1 = vector.load %arg2[%c0_1, %c0_2] : memref<1x128xf32, #tpu.memory_space<vmem>>, vector<1x128xf32>
    %2 = vector.broadcast %1 : vector<1x128xf32> to vector<128x128xf32>
    %3 = arith.mulf %0, %2 : vector<128x128xf32>
    %c0_3 = arith.constant 0 : index
    %c0_4 = arith.constant 0 : index
    %4 = vector.load %arg3[%c0_3, %c0_4] : memref<1x128xf32, #tpu.memory_space<vmem>>, vector<1x128xf32>
    %5 = vector.broadcast %4 : vector<1x128xf32> to vector<128x128xf32>
    %6 = arith.addf %3, %5 : vector<128x128xf32>
    %cst = arith.constant 0.000000e+00 : f32
    %7 = vector.broadcast %cst : f32 to vector<128x128xf32>
    %8 = arith.maximumf %6, %7 : vector<128x128xf32>
    %c0_5 = arith.constant 0 : index
    %c0_6 = arith.constant 0 : index
    %9 = vector.load %arg4[%c0_5, %c0_6] : memref<128x128xf32, #tpu.memory_space<vmem>>, vector<128x128xf32>
    tpu.vector_store %arg4[%c0_5, %c0_6], %8 {strides = array<i32>} : memref<128x128xf32, #tpu.memory_space<vmem>>, vector<128x128xf32>,
    return
  }
  func.func @transform_0(%arg0: i32) -> (i32, i32) {
    %c0_i32 = arith.constant 0 : i32
    %c0_i32_0 = arith.constant 0 : i32
    return %arg0, %c0_i32 : i32, i32
  }
  func.func @transform_1(%arg0: i32) -> (i32, i32) {
    %c0_i32 = arith.constant 0 : i32
    %c0_i32_0 = arith.constant 0 : i32
    %c0_i32_1 = arith.constant 0 : i32
    return %c0_i32, %c0_i32_0 : i32, i32
  }
  func.func @transform_2(%arg0: i32) -> (i32, i32) {
    %c0_i32 = arith.constant 0 : i32
    %c0_i32_0 = arith.constant 0 : i32
    %c0_i32_1 = arith.constant 0 : i32
    return %c0_i32, %c0_i32_0 : i32, i32
  }
  func.func @transform_3(%arg0: i32) -> (i32, i32) {
    %c0_i32 = arith.constant 0 : i32
    %c0_i32_0 = arith.constant 0 : i32
    return %arg0, %c0_i32 : i32, i32
  }
}

module attributes {stable_mosaic.version = 11 : i64} {
  func.func @_conv_tile_kernel(%arg0: i32, %arg1: i32, %arg2: memref<1x10x18x128xf32, #tpu.memory_space<vmem>>, %arg3: memref<9x128x128xbf16, #tpu.memory_space<vmem>>, %arg4: memref<1x128xf32, #tpu.memory_space<vmem>>, %arg5: memref<1x128xf32, #tpu.memory_space<vmem>>, %arg6: memref<128x128xf32, #tpu.memory_space<vmem>>, %arg7: memref<1x2x128xf32, #tpu.memory_space<vmem>>) attributes {dimension_semantics = [#tpu.dimension_semantics<parallel>, #tpu.dimension_semantics<parallel>], iteration_bounds = array<i64: 2, 2>, scalar_prefetch = 0 : i64, scratch_operands = 0 : i64, tpu.core_type = #tpu.core_type<tc>, window_params = [{transform_indices = @transform_0, window_bounds = array<i64: 1, 10, 18, 128>}, {pipeline_mode = #tpu.pipeline_mode<synchronous>, transform_indices = @transform_1, window_bounds = array<i64: 9, 128, 128>}, {pipeline_mode = #tpu.pipeline_mode<synchronous>, transform_indices = @transform_2, window_bounds = array<i64: 1, 128>}, {pipeline_mode = #tpu.pipeline_mode<synchronous>, transform_indices = @transform_3, window_bounds = array<i64: 1, 128>}, {transform_indices = @transform_4, window_bounds = array<i64: 128, 128>}, {transform_indices = @transform_5, window_bounds = array<i64: 1, 2, 128>}]} {
    %c0 = arith.constant 0 : index
    %c0_0 = arith.constant 0 : index
    %c0_1 = arith.constant 0 : index
    %c0_2 = arith.constant 0 : index
    %0 = vector.load %arg2[%c0, %c0_0, %c0_1, %c0_2] : memref<1x10x18x128xf32, #tpu.memory_space<vmem>>, vector<1x10x18x128xf32>
    %1 = vector.shape_cast %0 : vector<1x10x18x128xf32> to vector<10x18x128xf32>
    %c0_3 = arith.constant 0 : index
    %c0_4 = arith.constant 0 : index
    %2 = vector.load %arg4[%c0_3, %c0_4] : memref<1x128xf32, #tpu.memory_space<vmem>>, vector<1x128xf32>
    %3 = vector.shape_cast %2 : vector<1x128xf32> to vector<1x1x128xf32>
    %4 = vector.broadcast %3 : vector<1x1x128xf32> to vector<10x18x128xf32>
    %5 = arith.mulf %1, %4 : vector<10x18x128xf32>
    %c0_5 = arith.constant 0 : index
    %c0_6 = arith.constant 0 : index
    %6 = vector.load %arg5[%c0_5, %c0_6] : memref<1x128xf32, #tpu.memory_space<vmem>>, vector<1x128xf32>
    %7 = vector.shape_cast %6 : vector<1x128xf32> to vector<1x1x128xf32>
    %8 = vector.broadcast %7 : vector<1x1x128xf32> to vector<10x18x128xf32>
    %9 = arith.addf %5, %8 : vector<10x18x128xf32>
    %cst = arith.constant 0.000000e+00 : f32
    %10 = vector.broadcast %cst : f32 to vector<10x18x128xf32>
    %11 = arith.maximumf %9, %10 : vector<10x18x128xf32>
    %12 = tpu.iota {dimensions = array<i32: 0>} : vector<10x18x1xi32>
    %13 = tpu.iota {dimensions = array<i32: 1>} : vector<10x18x1xi32>
    %c0_i32 = arith.constant 0 : i32
    %14 = vector.broadcast %c0_i32 : i32 to vector<10x18x1xi32>
    %15 = arith.cmpi eq, %13, %14 : vector<10x18x1xi32>
    %c17_i32 = arith.constant 17 : i32
    %16 = vector.broadcast %c17_i32 : i32 to vector<10x18x1xi32>
    %17 = arith.cmpi eq, %13, %16 : vector<10x18x1xi32>
    %18 = arith.ori %15, %17 : vector<10x18x1xi1>
    %c0_i32_7 = arith.constant 0 : i32
    %19 = vector.broadcast %c0_i32_7 : i32 to vector<10x18x1xi32>
    %20 = arith.cmpi eq, %12, %19 : vector<10x18x1xi32>
    %c0_i32_8 = arith.constant 0 : i32
    %21 = arith.cmpi eq, %arg1, %c0_i32_8 : i32
    %22 = vector.broadcast %21 : i1 to vector<10x18x1xi1>
    %23 = arith.andi %20, %22 : vector<10x18x1xi1>
    %24 = arith.ori %18, %23 : vector<10x18x1xi1>
    %c9_i32 = arith.constant 9 : i32
    %25 = vector.broadcast %c9_i32 : i32 to vector<10x18x1xi32>
    %26 = arith.cmpi eq, %12, %25 : vector<10x18x1xi32>
    %c1_i32 = arith.constant 1 : i32
    %27 = arith.cmpi eq, %arg1, %c1_i32 : i32
    %28 = vector.broadcast %27 : i1 to vector<10x18x1xi1>
    %29 = arith.andi %26, %28 : vector<10x18x1xi1>
    %30 = arith.ori %24, %29 : vector<10x18x1xi1>
    %cst_9 = arith.constant 0.000000e+00 : f32
    %31 = vector.shape_cast %30 : vector<10x18x1xi1> to vector<10x18x1xi1>
    %32 = vector.broadcast %31 : vector<10x18x1xi1> to vector<10x18x128xi1>
    %33 = vector.broadcast %cst_9 : f32 to vector<10x18x128xf32>
    %34 = arith.select %32, %33, %11 : vector<10x18x128xi1>, vector<10x18x128xf32>
    %35 = arith.truncf %34 : vector<10x18x128xf32> to vector<10x18x128xbf16>
    %cst_10 = arith.constant 0.000000e+00 : f32
    %36 = vector.broadcast %cst_10 : f32 to vector<128x128xf32>
    %37 = vector.extract_strided_slice %35 {offsets = [0, 0, 0], sizes = [8, 16, 128], strides = [1, 1, 1]} : vector<10x18x128xbf16> to vector<8x16x128xbf16>
    %38 = vector.shape_cast %37 : vector<8x16x128xbf16> to vector<128x128xbf16>
    %c0_11 = arith.constant 0 : index
    %c0_12 = arith.constant 0 : index
    %c0_13 = arith.constant 0 : index
    %39 = vector.load %arg3[%c0_11, %c0_12, %c0_13] : memref<9x128x128xbf16, #tpu.memory_space<vmem>>, vector<1x128x128xbf16>
    %40 = vector.shape_cast %39 : vector<1x128x128xbf16> to vector<128x128xbf16>
    %cst_14 = arith.constant dense<0.000000e+00> : vector<128x128xf32>
    %41 = tpu.matmul %38, %40, %cst_14 {dimension_numbers = #tpu.dot_dimension_numbers<[1], [0], [0], [1], [0, 0, 1, 1], [], []>} : vector<128x128xbf16>, vector<128x128xbf16>, vector<128x128xf32> -> vector<128x128xf32>
    %42 = arith.addf %36, %41 : vector<128x128xf32>
    %43 = vector.extract_strided_slice %35 {offsets = [0, 1, 0], sizes = [8, 16, 128], strides = [1, 1, 1]} : vector<10x18x128xbf16> to vector<8x16x128xbf16>
    %44 = vector.shape_cast %43 : vector<8x16x128xbf16> to vector<128x128xbf16>
    %c1 = arith.constant 1 : index
    %c0_15 = arith.constant 0 : index
    %c0_16 = arith.constant 0 : index
    %45 = vector.load %arg3[%c1, %c0_15, %c0_16] : memref<9x128x128xbf16, #tpu.memory_space<vmem>>, vector<1x128x128xbf16>
    %46 = vector.shape_cast %45 : vector<1x128x128xbf16> to vector<128x128xbf16>
    %cst_17 = arith.constant dense<0.000000e+00> : vector<128x128xf32>
    %47 = tpu.matmul %44, %46, %cst_17 {dimension_numbers = #tpu.dot_dimension_numbers<[1], [0], [0], [1], [0, 0, 1, 1], [], []>} : vector<128x128xbf16>, vector<128x128xbf16>, vector<128x128xf32> -> vector<128x128xf32>
    %48 = arith.addf %42, %47 : vector<128x128xf32>
    %49 = vector.extract_strided_slice %35 {offsets = [0, 2, 0], sizes = [8, 16, 128], strides = [1, 1, 1]} : vector<10x18x128xbf16> to vector<8x16x128xbf16>
    %50 = vector.shape_cast %49 : vector<8x16x128xbf16> to vector<128x128xbf16>
    %c2 = arith.constant 2 : index
    %c0_18 = arith.constant 0 : index
    %c0_19 = arith.constant 0 : index
    %51 = vector.load %arg3[%c2, %c0_18, %c0_19] : memref<9x128x128xbf16, #tpu.memory_space<vmem>>, vector<1x128x128xbf16>
    %52 = vector.shape_cast %51 : vector<1x128x128xbf16> to vector<128x128xbf16>
    %cst_20 = arith.constant dense<0.000000e+00> : vector<128x128xf32>
    %53 = tpu.matmul %50, %52, %cst_20 {dimension_numbers = #tpu.dot_dimension_numbers<[1], [0], [0], [1], [0, 0, 1, 1], [], []>} : vector<128x128xbf16>, vector<128x128xbf16>, vector<128x128xf32> -> vector<128x128xf32>
    %54 = arith.addf %48, %53 : vector<128x128xf32>
    %55 = vector.extract_strided_slice %35 {offsets = [1, 0, 0], sizes = [8, 16, 128], strides = [1, 1, 1]} : vector<10x18x128xbf16> to vector<8x16x128xbf16>
    %56 = vector.shape_cast %55 : vector<8x16x128xbf16> to vector<128x128xbf16>
    %c3 = arith.constant 3 : index
    %c0_21 = arith.constant 0 : index
    %c0_22 = arith.constant 0 : index
    %57 = vector.load %arg3[%c3, %c0_21, %c0_22] : memref<9x128x128xbf16, #tpu.memory_space<vmem>>, vector<1x128x128xbf16>
    %58 = vector.shape_cast %57 : vector<1x128x128xbf16> to vector<128x128xbf16>
    %cst_23 = arith.constant dense<0.000000e+00> : vector<128x128xf32>
    %59 = tpu.matmul %56, %58, %cst_23 {dimension_numbers = #tpu.dot_dimension_numbers<[1], [0], [0], [1], [0, 0, 1, 1], [], []>} : vector<128x128xbf16>, vector<128x128xbf16>, vector<128x128xf32> -> vector<128x128xf32>
    %60 = arith.addf %54, %59 : vector<128x128xf32>
    %61 = vector.extract_strided_slice %35 {offsets = [1, 1, 0], sizes = [8, 16, 128], strides = [1, 1, 1]} : vector<10x18x128xbf16> to vector<8x16x128xbf16>
    %62 = vector.shape_cast %61 : vector<8x16x128xbf16> to vector<128x128xbf16>
    %c4 = arith.constant 4 : index
    %c0_24 = arith.constant 0 : index
    %c0_25 = arith.constant 0 : index
    %63 = vector.load %arg3[%c4, %c0_24, %c0_25] : memref<9x128x128xbf16, #tpu.memory_space<vmem>>, vector<1x128x128xbf16>
    %64 = vector.shape_cast %63 : vector<1x128x128xbf16> to vector<128x128xbf16>
    %cst_26 = arith.constant dense<0.000000e+00> : vector<128x128xf32>
    %65 = tpu.matmul %62, %64, %cst_26 {dimension_numbers = #tpu.dot_dimension_numbers<[1], [0], [0], [1], [0, 0, 1, 1], [], []>} : vector<128x128xbf16>, vector<128x128xbf16>, vector<128x128xf32> -> vector<128x128xf32>
    %66 = arith.addf %60, %65 : vector<128x128xf32>
    %67 = vector.extract_strided_slice %35 {offsets = [1, 2, 0], sizes = [8, 16, 128], strides = [1, 1, 1]} : vector<10x18x128xbf16> to vector<8x16x128xbf16>
    %68 = vector.shape_cast %67 : vector<8x16x128xbf16> to vector<128x128xbf16>
    %c5 = arith.constant 5 : index
    %c0_27 = arith.constant 0 : index
    %c0_28 = arith.constant 0 : index
    %69 = vector.load %arg3[%c5, %c0_27, %c0_28] : memref<9x128x128xbf16, #tpu.memory_space<vmem>>, vector<1x128x128xbf16>
    %70 = vector.shape_cast %69 : vector<1x128x128xbf16> to vector<128x128xbf16>
    %cst_29 = arith.constant dense<0.000000e+00> : vector<128x128xf32>
    %71 = tpu.matmul %68, %70, %cst_29 {dimension_numbers = #tpu.dot_dimension_numbers<[1], [0], [0], [1], [0, 0, 1, 1], [], []>} : vector<128x128xbf16>, vector<128x128xbf16>, vector<128x128xf32> -> vector<128x128xf32>
    %72 = arith.addf %66, %71 : vector<128x128xf32>
    %73 = vector.extract_strided_slice %35 {offsets = [2, 0, 0], sizes = [8, 16, 128], strides = [1, 1, 1]} : vector<10x18x128xbf16> to vector<8x16x128xbf16>
    %74 = vector.shape_cast %73 : vector<8x16x128xbf16> to vector<128x128xbf16>
    %c6 = arith.constant 6 : index
    %c0_30 = arith.constant 0 : index
    %c0_31 = arith.constant 0 : index
    %75 = vector.load %arg3[%c6, %c0_30, %c0_31] : memref<9x128x128xbf16, #tpu.memory_space<vmem>>, vector<1x128x128xbf16>
    %76 = vector.shape_cast %75 : vector<1x128x128xbf16> to vector<128x128xbf16>
    %cst_32 = arith.constant dense<0.000000e+00> : vector<128x128xf32>
    %77 = tpu.matmul %74, %76, %cst_32 {dimension_numbers = #tpu.dot_dimension_numbers<[1], [0], [0], [1], [0, 0, 1, 1], [], []>} : vector<128x128xbf16>, vector<128x128xbf16>, vector<128x128xf32> -> vector<128x128xf32>
    %78 = arith.addf %72, %77 : vector<128x128xf32>
    %79 = vector.extract_strided_slice %35 {offsets = [2, 1, 0], sizes = [8, 16, 128], strides = [1, 1, 1]} : vector<10x18x128xbf16> to vector<8x16x128xbf16>
    %80 = vector.shape_cast %79 : vector<8x16x128xbf16> to vector<128x128xbf16>
    %c7 = arith.constant 7 : index
    %c0_33 = arith.constant 0 : index
    %c0_34 = arith.constant 0 : index
    %81 = vector.load %arg3[%c7, %c0_33, %c0_34] : memref<9x128x128xbf16, #tpu.memory_space<vmem>>, vector<1x128x128xbf16>
    %82 = vector.shape_cast %81 : vector<1x128x128xbf16> to vector<128x128xbf16>
    %cst_35 = arith.constant dense<0.000000e+00> : vector<128x128xf32>
    %83 = tpu.matmul %80, %82, %cst_35 {dimension_numbers = #tpu.dot_dimension_numbers<[1], [0], [0], [1], [0, 0, 1, 1], [], []>} : vector<128x128xbf16>, vector<128x128xbf16>, vector<128x128xf32> -> vector<128x128xf32>
    %84 = arith.addf %78, %83 : vector<128x128xf32>
    %85 = vector.extract_strided_slice %35 {offsets = [2, 2, 0], sizes = [8, 16, 128], strides = [1, 1, 1]} : vector<10x18x128xbf16> to vector<8x16x128xbf16>
    %86 = vector.shape_cast %85 : vector<8x16x128xbf16> to vector<128x128xbf16>
    %c8 = arith.constant 8 : index
    %c0_36 = arith.constant 0 : index
    %c0_37 = arith.constant 0 : index
    %87 = vector.load %arg3[%c8, %c0_36, %c0_37] : memref<9x128x128xbf16, #tpu.memory_space<vmem>>, vector<1x128x128xbf16>
    %88 = vector.shape_cast %87 : vector<1x128x128xbf16> to vector<128x128xbf16>
    %cst_38 = arith.constant dense<0.000000e+00> : vector<128x128xf32>
    %89 = tpu.matmul %86, %88, %cst_38 {dimension_numbers = #tpu.dot_dimension_numbers<[1], [0], [0], [1], [0, 0, 1, 1], [], []>} : vector<128x128xbf16>, vector<128x128xbf16>, vector<128x128xf32> -> vector<128x128xf32>
    %90 = arith.addf %84, %89 : vector<128x128xf32>
    %c0_39 = arith.constant 0 : index
    %c0_40 = arith.constant 0 : index
    %91 = vector.load %arg6[%c0_39, %c0_40] : memref<128x128xf32, #tpu.memory_space<vmem>>, vector<128x128xf32>
    tpu.vector_store %arg6[%c0_39, %c0_40], %90 {strides = array<i32>} : memref<128x128xf32, #tpu.memory_space<vmem>>, vector<128x128xf32>,
    %cst_41 = arith.constant dense<0.000000e+00> : vector<128xf32>
    %92 = vector.multi_reduction <add>, %90, %cst_41 [0] : vector<128x128xf32> to vector<128xf32>
    %93 = vector.shape_cast %92 : vector<128xf32> to vector<1x128xf32>
    %94 = arith.mulf %90, %90 : vector<128x128xf32>
    %cst_42 = arith.constant dense<0.000000e+00> : vector<128xf32>
    %95 = vector.multi_reduction <add>, %94, %cst_42 [0] : vector<128x128xf32> to vector<128xf32>
    %96 = vector.shape_cast %95 : vector<128xf32> to vector<1x128xf32>
    %97 = tpu.concatenate %93, %96 in 0 : vector<1x128xf32>, vector<1x128xf32> -> vector<2x128xf32>
    %98 = vector.shape_cast %97 : vector<2x128xf32> to vector<1x2x128xf32>
    %c0_43 = arith.constant 0 : index
    %c0_44 = arith.constant 0 : index
    %c0_45 = arith.constant 0 : index
    %99 = vector.load %arg7[%c0_43, %c0_44, %c0_45] : memref<1x2x128xf32, #tpu.memory_space<vmem>>, vector<1x2x128xf32>
    tpu.vector_store %arg7[%c0_43, %c0_44, %c0_45], %98 {strides = array<i32>} : memref<1x2x128xf32, #tpu.memory_space<vmem>>, vector<1x2x128xf32>,
    return
  }
  func.func @transform_0(%arg0: i32, %arg1: i32) -> (i32, i32, i32, i32) {
    %c2_i32 = arith.constant 2 : i32
    %0 = arith.muli %arg0, %c2_i32 : i32
    %1 = arith.addi %0, %arg1 : i32
    %c0_i32 = arith.constant 0 : i32
    %c0_i32_0 = arith.constant 0 : i32
    %c0_i32_1 = arith.constant 0 : i32
    %c0_i32_2 = arith.constant 0 : i32
    return %1, %c0_i32, %c0_i32_0, %c0_i32_1 : i32, i32, i32, i32
  }
  func.func @transform_1(%arg0: i32, %arg1: i32) -> (i32, i32, i32) {
    %c0_i32 = arith.constant 0 : i32
    %c0_i32_0 = arith.constant 0 : i32
    %c0_i32_1 = arith.constant 0 : i32
    %c0_i32_2 = arith.constant 0 : i32
    return %c0_i32, %c0_i32_0, %c0_i32_1 : i32, i32, i32
  }
  func.func @transform_2(%arg0: i32, %arg1: i32) -> (i32, i32) {
    %c0_i32 = arith.constant 0 : i32
    %c0_i32_0 = arith.constant 0 : i32
    %c0_i32_1 = arith.constant 0 : i32
    return %c0_i32, %c0_i32_0 : i32, i32
  }
  func.func @transform_3(%arg0: i32, %arg1: i32) -> (i32, i32) {
    %c0_i32 = arith.constant 0 : i32
    %c0_i32_0 = arith.constant 0 : i32
    %c0_i32_1 = arith.constant 0 : i32
    return %c0_i32, %c0_i32_0 : i32, i32
  }
  func.func @transform_4(%arg0: i32, %arg1: i32) -> (i32, i32) {
    %c2_i32 = arith.constant 2 : i32
    %0 = arith.muli %arg0, %c2_i32 : i32
    %1 = arith.addi %0, %arg1 : i32
    %c0_i32 = arith.constant 0 : i32
    %c0_i32_0 = arith.constant 0 : i32
    return %1, %c0_i32 : i32, i32
  }
  func.func @transform_5(%arg0: i32, %arg1: i32) -> (i32, i32, i32) {
    %c2_i32 = arith.constant 2 : i32
    %0 = arith.muli %arg0, %c2_i32 : i32
    %1 = arith.addi %0, %arg1 : i32
    %c0_i32 = arith.constant 0 : i32
    %c0_i32_0 = arith.constant 0 : i32
    %c0_i32_1 = arith.constant 0 : i32
    return %1, %c0_i32, %c0_i32_0 : i32, i32, i32
  }
}

</mosaic_0001>

<bundles_post_ra>
// kernel: double_conv.5
= control target key start
LH: loop header
LB: loop body
LE: loop exit
PB: predicated region body
PF: predicated region fallthrough
CT: control target
= control target key end

     0   :  { %s373_s12 = smov 0   ;;  %s468_s0 = inlined_call_operand.vmem [shape: f32[512,128], index: 0, kind: input, shape index: {}]   ;;  %s469_s1 = inlined_call_operand.vmem [shape: f32[1,128], index: 1, kind: input, shape index: {}]   ;;  %s470_s2 = inlined_call_operand.vmem [shape: f32[1,128], index: 2, kind: input, shape index: {}]   ;;  %s471_s3 = inlined_call_operand.vmem [shape: f32[512,128], index: 3, kind: output, shape index: {}]  }
   0x1 LB: > { %s324_s13 = sadd.s32 4294967295, %s351_s12   ;;  %p328_p0 = scmp.ge.s32.totalorder %s351_s12, 1  ;;  %s351_s12 = sphi %s373_s12, %s13_s12  }
   0x2   : > { %p138_p1 = scmp.lt.s32.totalorder %s351_s12, 5 }
   0x4   : > { %p139_p2 = pnand %p328_p0, %p138_p1 }
   0x5   : > { %s329_s14 = sshll.u32 (!%p139_p2), %s324_s13, 4 }
   0x6   : > { %142 = sbr.rel (%p139_p2) target bundleno = 32 (0x20), region = 32  ;;  %p163_p3 = scmp.lt.s32.totalorder (!%p139_p2), %s329_s14, 63 }
   0xb   : > { %s473_s14 = smov (!%p163_p3, %s329_s14), 63  ;;  %v384_v0 = vld [vmem:[%s469_s1] ss:$0 sm:$0xff] }
   0xc   : > { %s330_s15 = sshll.u32 %s473_s14, 3  ;;  %v394_v1 = vld [vmem:[%s470_s2] ss:$0 sm:$0xff] }
   0xd   : > { %s389_s20 = scalar_lea.vmem %s468_s0, %s330_s15  ;;  %s417_s25 = scalar_lea.vmem %s471_s3, %s330_s15 }
   0xe   : > { %v174_v2 = vld [vmem:[%s389_s20] sm:$0xff]  ;;  %v175_v3 = vld [vmem:[%s389_s20 + $0x8] sm:$0xff]  ;;  %v176_v4 = vld [vmem:[%s389_s20 + $0x10] sm:$0xff] }
   0xf   : > { %v197_v5 = vmul.f32 %v384_v0, %v174_v2  ;;  %v198_v6 = vmul.f32 %v384_v0, %v175_v3  ;;  %v199_v7 = vmul.f32 %v384_v0, %v176_v4  ;;  %v177_v8 = vld [vmem:[%s389_s20 + $0x18] sm:$0xff]  ;;  %v178_v9 = vld [vmem:[%s389_s20 + $0x20] sm:$0xff]  ;;  %v179_v10 = vld [vmem:[%s389_s20 + $0x28] sm:$0xff] }
  0x10   : > { %v200_v11 = vmul.f32 %v384_v0, %v177_v8  ;;  %v201_v12 = vmul.f32 %v384_v0, %v178_v9  ;;  %v202_v13 = vmul.f32 %v384_v0, %v179_v10  ;;  %v180_v14 = vld [vmem:[%s389_s20 + $0x30] sm:$0xff]  ;;  %v181_v15 = vld [vmem:[%s389_s20 + $0x38] sm:$0xff]  ;;  %v182_v24 = vld [vmem:[%s389_s20 + $0x40] sm:$0xff] }
  0x11   : > { %v220_v16 = vadd.f32 %v394_v1, %v197_v5  ;;  %v221_v17 = vadd.f32 %v394_v1, %v198_v6  ;;  %v222_v18 = vadd.f32 %v394_v1, %v199_v7  ;;  %v203_v19 = vmul.f32 %v384_v0, %v180_v14  ;;  %v183_v25 = vld [vmem:[%s389_s20 + $0x48] sm:$0xff]  ;;  %v184_v26 = vld [vmem:[%s389_s20 + $0x50] sm:$0xff]  ;;  %v185_v31 = vld [vmem:[%s389_s20 + $0x58] sm:$0xff] }
  0x12   : > { %v223_v20 = vadd.f32 %v394_v1, %v200_v11  ;;  %v224_v21 = vadd.f32 %v394_v1, %v201_v12  ;;  %v225_v22 = vadd.f32 %v394_v1, %v202_v13  ;;  %v204_v23 = vmul.f32 %v384_v0, %v181_v15  ;;  %v186_v32 = vld [vmem:[%s389_s20 + $0x60] sm:$0xff]  ;;  %v187_v33 = vld [vmem:[%s389_s20 + $0x68] sm:$0xff]  ;;  %v188_v38 = vld [vmem:[%s389_s20 + $0x70] sm:$0xff] }
  0x13   : > { %v236_v27 = vmax.f32 %v220_v16, 0.0  ;;  %v237_v28 = vmax.f32 %v221_v17, 0.0  ;;  %v238_v29 = vmax.f32 %v222_v18, 0.0  ;;  %v226_v30 = vadd.f32 %v394_v1, %v203_v19  ;;  %v189_v43 = vld [vmem:[%s389_s20 + $0x78] sm:$0xff] }
  0x14   : > { %v239_v34 = vmax.f32 %v223_v20, 0.0  ;;  %v240_v35 = vmax.f32 %v224_v21, 0.0  ;;  %v241_v36 = vmax.f32 %v225_v22, 0.0  ;;  %v227_v37 = vadd.f32 %v394_v1, %v204_v23 }
  0x15   : > { %252 = vst [vmem:[%s417_s25] sm:$0xff] %v236_v27  ;;  %253 = vst [vmem:[%s417_s25 + $0x8] sm:$0xff] %v237_v28  ;;  %v242_v39 = vmax.f32 %v226_v30, 0.0  ;;  %v205_v40 = vmul.f32 %v384_v0, %v182_v24  ;;  %v206_v41 = vmul.f32 %v384_v0, %v183_v25  ;;  %v207_v42 = vmul.f32 %v384_v0, %v184_v26 }
  0x16   : > { %254 = vst [vmem:[%s417_s25 + $0x10] sm:$0xff] %v238_v29  ;;  %255 = vst [vmem:[%s417_s25 + $0x18] sm:$0xff] %v239_v34  ;;  %v243_v44 = vmax.f32 %v227_v37, 0.0  ;;  %v208_v45 = vmul.f32 %v384_v0, %v185_v31  ;;  %v209_v46 = vmul.f32 %v384_v0, %v186_v32  ;;  %v210_v47 = vmul.f32 %v384_v0, %v187_v33 }
  0x17   : > { %256 = vst [vmem:[%s417_s25 + $0x20] sm:$0xff] %v240_v35  ;;  %257 = vst [vmem:[%s417_s25 + $0x28] sm:$0xff] %v241_v36  ;;  %v228_v48 = vadd.f32 %v394_v1, %v205_v40  ;;  %v229_v49 = vadd.f32 %v394_v1, %v206_v41  ;;  %v230_v50 = vadd.f32 %v394_v1, %v207_v42 }
  0x18   : > { %258 = vst [vmem:[%s417_s25 + $0x30] sm:$0xff] %v242_v39  ;;  %v211_v51 = vmul.f32 %v384_v0, %v188_v38  ;;  %259 = vst [vmem:[%s417_s25 + $0x38] sm:$0xff] %v243_v44  ;;  %v231_v52 = vadd.f32 %v394_v1, %v208_v45  ;;  %v232_v53 = vadd.f32 %v394_v1, %v209_v46 }
  0x19   : > { %v233_v54 = vadd.f32 %v394_v1, %v210_v47  ;;  %v212_v55 = vmul.f32 %v384_v0, %v189_v43  ;;  %v244_v56 = vmax.f32 %v228_v48, 0.0  ;;  %v245_v57 = vmax.f32 %v229_v49, 0.0 }
  0x1a   : > { %v246_v58 = vmax.f32 %v230_v50, 0.0  ;;  %v234_v59 = vadd.f32 %v394_v1, %v211_v51  ;;  %v247_v60 = vmax.f32 %v231_v52, 0.0  ;;  %v248_v61 = vmax.f32 %v232_v53, 0.0 }
  0x1b   : > { %v249_v62 = vmax.f32 %v233_v54, 0.0  ;;  %v235_v63 = vadd.f32 %v394_v1, %v212_v55  ;;  %260 = vst [vmem:[%s417_s25 + $0x40] sm:$0xff] %v244_v56  ;;  %261 = vst [vmem:[%s417_s25 + $0x48] sm:$0xff] %v245_v57 }
  0x1c   : > { %262 = vst [vmem:[%s417_s25 + $0x50] sm:$0xff] %v246_v58  ;;  %v250_v2 = vmax.f32 %v234_v59, 0.0  ;;  %263 = vst [vmem:[%s417_s25 + $0x58] sm:$0xff] %v247_v60 }
  0x1d   : > { %264 = vst [vmem:[%s417_s25 + $0x60] sm:$0xff] %v248_v61  ;;  %265 = vst [vmem:[%s417_s25 + $0x68] sm:$0xff] %v249_v62  ;;  %v251_v0 = vmax.f32 %v235_v63, 0.0 }
  0x1e   : > { %266 = vst [vmem:[%s417_s25 + $0x70] sm:$0xff] %v250_v2 }
  0x1f   : > { %267 = vst [vmem:[%s417_s25 + $0x78] sm:$0xff] %v251_v0 }
  0x20 PF: > { %s13_s12 = sadd.s32 1, %s351_s12  }
  0x21   : > { %p10_p4 = scmp.ge.s32.totalorder %s13_s12, 6  }
  0x23   :  { %12 = sbr.rel (!%p10_p4) target bundleno = 1 (0x1), region = 62 }

// kernel: double_conv.3
= control target key start
LH: loop header
LB: loop body
LE: loop exit
PB: predicated region body
PF: predicated region fallthrough
CT: control target
= control target key end

     0   :  { %s2575_s18 = smov 0   ;;  %s2577_s19 = smov 0   ;;  %s3390_s0 = inlined_call_operand.vmem [shape: bf16[4,10,18,8], index: 0, kind: input, shape index: {}]   ;;  %s3391_s1 = inlined_call_operand.vmem [shape: bf16[9,8,128], index: 1, kind: input, shape index: {}]   ;;  %s3392_s2 = inlined_call_operand.vmem [shape: f32[1,8], index: 2, kind: input, shape index: {}]   ;;  %s3393_s3 = inlined_call_operand.vmem [shape: f32[1,8], index: 3, kind: input, shape index: {}]   ;;  %s3394_s4 = inlined_call_operand.vmem [shape: f32[512,128], index: 4, kind: output, shape index: {0}]   ;;  %s3395_s5 = inlined_call_operand.vmem [shape: f32[4,2,128], index: 5, kind: output, shape index: {1}]  }
   0x1   :  { %s2579_s20 = smov 0   ;;  %s2581_s21 = smov 0  }
   0x2   :  { %s2583_s22 = smov 0  }
   0x3 LB: > { %s25_s2 = sadd.s32 1, %s2535_s20  ;;  %s28_s3 = sadd.s32 1, %s2539_s21  ;;  %s2543_s22 = sphi %s2583_s22, %s16_s22   ;;  %s2539_s21 = sphi %s2581_s21, %s3447_s21   ;;  %s2535_s20 = sphi %s2579_s20, %s3446_s20   ;;  %s2531_s19 = sphi %s2577_s19, %s3445_s19   ;;  %s2527_s18 = sphi %s2575_s18, %s3444_s18  }
   0x4   : > { %p26_p0 = scmp.ge.s32.totalorder %s25_s2, 2  ;;  %p2069_p1 = scmp.ge.s32.totalorder %s2543_s22, 1 }
   0x5   : > { %p218_p2 = scmp.lt.s32.totalorder %s2543_s22, 5 }
   0x6   : > { %s3449_s2 = smov (%p26_p0, %s25_s2), 0  ;;  %s3451_s3 = smov (!%p26_p0, %s28_s3), %s2539_s21 }
   0x7   : > { %p219_p3 = pnand %p2069_p1, %p218_p2  ;;  %p30_p4 = scmp.ge.s32.totalorder %s3451_s3, 2 }
   0x9   : > { %s3453_s3 = smov (%p30_p4, %s3451_s3), 0  ;;  %222 = sbr.rel (%p219_p3) target bundleno = 417 (0x1a1), region = 36 }
   0xe   : > { %v2077_v0 = vld [vmem:[%s3391_s1 + $0x4] sm:$0xf]  ;;  %vm561_vm0 = vcmask 1043456   ;;  %s2070_s25 = sshll.u32 %s2531_s19, 1  ;;  %v314_v2 = vld [vmem:[%s3391_s1] sm:$0xf] }
   0xf   : > { %2445 = vmatprep.subr.msk.bf16.mxu1 %vm561_vm0, %v2077_v0  ;;  %2444 = vmatprep.subr.msk.bf16.mxu0 %vm561_vm0, %v2077_v0  ;;  %v563_v1 = vsel %vm561_vm0, %v2077_v0, 0  ;;  %s2611_s26 = sadd.s32 %s2527_s18, %s2070_s25  ;;  %v2118_v3 = vld [vmem:[%s3391_s1 + $0x8] sm:$0xf]  ;;  %vm315_vm1 = vsmask.f32 3328  ;;  %vm536_vm3 = vcmask 64512  }
  0x10   : > { %2443 = vmatpush3.bf16.msra.mxu1 %v563_v1  ;;  %2281 = vmatpush3.bf16.msra.mxu0 %v563_v1  ;;  %p258_p5 = scmp.lt.s32.totalorder %s2611_s26, 3  ;;  %vm316_vm2 = vsmask.f32 7440  ;;  %v2655_v15 = vsel %vm561_vm0, %v314_v2, 0  ;;  %v2675_v34 = vsel %vm561_vm0, %v2118_v3, 0  ;;  %vm834_vm5 = vcmask 1042432  }
  0x11   : > { %2446 = vmatprep.subr.msk.bf16.mxu1 %vm561_vm0, %v314_v2  ;;  %2447 = vmatprep.subr.msk.bf16.mxu0 %vm561_vm0, %v2118_v3  ;;  %vm2670_vm4 = vmor %vm315_vm1, %vm316_vm2  ;;  %vm835_vm6 = vcmask 1046532   ;;  %s2073_s27 = sshll.u32 %s2611_s26, 4  ;;  %vm1945_vm8 = vcmask 1040384  }
  0x12   : > { %s2623_s6 = scalar_select %p258_p5, %s2611_s26, 3  ;;  %vm2818_vm7 = vmor %vm834_vm5, %vm835_vm6 }
  0x13   : > { %p268_p6 = scmp.lt.s32.totalorder %s2073_s27, 63 }
  0x14   : > { %s2454_s7 = smul.u32 120, %s2623_s6 }
  0x15   : > { %s3455_s27 = smov (!%p268_p6, %s2073_s27), 63 }
  0x16   : > { %s2629_s10 = scalar_lea.vmem %s3390_s0, %s2454_s7  ;;  %s2074_s26 = sshll.u32 %s3455_s27, 3 }
  0x17   : > { %v2632_v4 = vld [vmem:[%s2629_s10] sm:$0xf]  ;;  %v2635_v5 = vld [vmem:[%s2629_s10 + $0x4] sm:$0xf]  ;;  %v2638_v6 = vld [vmem:[%s2629_s10 + $0x8] sm:$0x1]  ;;  %s3304_s30 = scalar_lea.vmem %s3394_s4, %s2074_s26 }
  0x18   : > { %v319_v7 = vshrl.u32 %v2632_v4, 16  ;;  %v322_v8 = vshll.u32 %v2632_v4, 16  ;;  %v328_v9 = vshll.u32 %v2635_v5, 16  ;;  %v332_v10 = vshrl.u32 %v2635_v5, 16  ;;  %v2645_v11 = vld [vmem:[%s2629_s10 + $0x30] sm:$0xf] }
  0x19   : > { %v338_v12 = vshll.u32 %v2638_v6, 16  ;;  %v2649_v13 = vld [vmem:[%s2629_s10 + $0x34] sm:$0xf]  ;;  %v2652_v14 = vld [vmem:[%s2629_s10 + $0x38] sm:$0x1]  ;;  %v415_v21 = vshrl.u32 %v2645_v11, 16 }
  0x1a   : > { %v321_v16 = vrot.slane %v319_v7, 4  ;;  %v324_v17 = vrot.slane %v322_v8, 5  ;;  %v330_v18 = vrot.slane %v328_v9, 5  ;;  %v334_v19 = vrot.slane %v332_v10, 4  ;;  %v2663_v28 = vld [vmem:[%s2629_s10 + $0xc] sm:$0xf] }
  0x1b   : > { %v340_v20 = vrot.slane %v338_v12, 5  ;;  %v418_v22 = vshll.u32 %v2645_v11, 16  ;;  %v424_v23 = vshll.u32 %v2649_v13, 16  ;;  %v428_v26 = vshrl.u32 %v2649_v13, 16  ;;  %v2666_v29 = vld [vmem:[%s2629_s10 + $0x10] sm:$0xf] }
  0x1c   : > { %v325_v24 = vor.u32 %v324_v17, %v321_v16  ;;  %v335_v25 = vor.u32 %v334_v19, %v330_v18  ;;  %v434_v27 = vshll.u32 %v2652_v14, 16  ;;  %v417_v31 = vrot.slane %v415_v21, 4  ;;  %v2678_v40 = vld [vmem:[%s2629_s10 + $0x14] sm:$0x1]  ;;  %v2689_v52 = vld [vmem:[%s2629_s10 + $0x3c] sm:$0xf] }
  0x1d   : > { %v420_v32 = vrot.slane %v418_v22, 5  ;;  %v426_v33 = vrot.slane %v424_v23, 5  ;;  %v430_v37 = vrot.slane %v428_v26, 4  ;;  %v343_v41 = vshrl.u32 %v2663_v28, 16  ;;  %v2693_v57 = vld [vmem:[%s2629_s10 + $0x40] sm:$0xf] }
  0x1e   : > { %v326_v35 = vrot.slane %v325_v24, 4  ;;  %v336_v36 = vrot.slane %v335_v25, 4  ;;  %v436_v38 = vrot.slane %v434_v27, 5  ;;  %v346_v42 = vshll.u32 %v2663_v28, 16  ;;  %v2701_v62 = vld [vmem:[%s2629_s10 + $0x44] sm:$0x1] }
  0x1f   : > { %v421_v39 = vor.u32 %v420_v32, %v417_v31  ;;  %v352_v43 = vshll.u32 %v2666_v29, 16  ;;  %v431_v46 = vor.u32 %v430_v37, %v426_v33  ;;  %v356_v47 = vshrl.u32 %v2666_v29, 16  ;;  %v2707_v3 = vld [vmem:[%s2629_s10 + $0x18] sm:$0xf]  ;;  %v2716_v19 = vld [vmem:[%s2629_s10 + $0x1c] sm:$0xf] }
  0x20   : > { %v331_v44 = vsel %vm2670_vm4, %v326_v35, %v330_v18  ;;  %v341_v45 = vsel %vm2670_vm4, %v336_v36, %v340_v20  ;;  %v345_v50 = vrot.slane %v343_v41, 4  ;;  %v348_v51 = vrot.slane %v346_v42, 5  ;;  %v2723_v23 = vld [vmem:[%s2629_s10 + $0x20] sm:$0x1]  ;;  %v2730_v32 = vld [vmem:[%s2629_s10 + $0x48] sm:$0xf] }
  0x21   : > { %v2078_v48 = vcombine.low %v331_v44, %v341_v45  ;;  %v422_v49 = vrot.slane %v421_v39, 4  ;;  %v432_v53 = vrot.slane %v431_v46, 4  ;;  %v354_v54 = vrot.slane %v352_v43, 5  ;;  %v2743_v44 = vld [vmem:[%s2629_s10 + $0x4c] sm:$0xf]  ;;  %s2076_s7 = sshll.u32 %s2623_s6, 1 }
  0x22   : > { %v358_v55 = vrot.slane %v356_v47, 4  ;;  %v362_v56 = vshll.u32 %v2678_v40, 16  ;;  %v842_v58 = vrot.slane %v2638_v6, 5  ;;  %v349_v60 = vor.u32 %v348_v51, %v345_v50 }
  0x23   : > { %2282 = vmatprep.mubr.msk.bf16.mxu0 %vm536_vm3, %v2078_v48  ;;  %v427_v59 = vsel %vm2670_vm4, %v422_v49, %v426_v33  ;;  %v846_v61 = vrot.slane %v2666_v29, 5  ;;  %v437_v63 = vsel %vm2670_vm4, %v432_v53, %v436_v38  ;;  %v439_v2 = vshrl.u32 %v2689_v52, 16  ;;  %v2738_v38 = vld [vmem:[%s3391_s1 + $0x10] sm:$0xf] }
  0x24   : > { %v359_v0 = vor.u32 %v358_v55, %v354_v54  ;;  %v364_v1 = vrot.slane %v362_v56, 5  ;;  %v2709_v7 = vcombine.low %v427_v59, %v437_v63  ;;  %v350_v8 = vrot.slane %v349_v60, 4  ;;  %v2757_v63 = vld [vmem:[%s2629_s10 + $0x24] sm:$0xf] }
  0x25   : > { %v442_v9 = vshll.u32 %v2689_v52, 16  ;;  %v448_v10 = vshll.u32 %v2693_v57, 16  ;;  %v441_v16 = vrot.slane %v439_v2, 4  ;;  %v452_v17 = vshrl.u32 %v2693_v57, 16 }
  0x26   : > { %v360_v12 = vrot.slane %v359_v0, 4  ;;  %v458_v18 = vshll.u32 %v2701_v62, 16  ;;  %2290 = vmatprep.mubr.msk.bf16.mxu1 %vm536_vm3, %v2709_v7  ;;  %v355_v20 = vsel %vm2670_vm4, %v350_v8, %v354_v54  ;;  %v367_v24 = vshrl.u32 %v2707_v3, 16  ;;  %v2751_v54 = vld [vmem:[%s2629_s10 + $0x50] sm:$0x1] }
  0x27   : > { %v444_v21 = vrot.slane %v442_v9, 5  ;;  %v450_v22 = vrot.slane %v448_v10, 5  ;;  %v454_v26 = vrot.slane %v452_v17, 4  ;;  %v370_v31 = vshll.u32 %v2707_v3, 16  ;;  %v2765_v8 = vld [vmem:[%s2629_s10 + $0x28] sm:$0xf] }
  0x28   : > { %v365_v25 = vsel %vm2670_vm4, %v360_v12, %v364_v1  ;;  %v460_v27 = vrot.slane %v458_v18, 5  ;;  %v369_v36 = vrot.slane %v367_v24, 4  ;;  %v376_v37 = vshll.u32 %v2716_v19, 16  ;;  %v2773_v17 = vld [vmem:[%s3391_s1 + $0xc] sm:$0xf] }
  0x29   : > { %v2732_v33 = vcombine.low %v355_v20, %v365_v25  ;;  %v445_v35 = vor.u32 %v444_v21, %v441_v16  ;;  %v455_v39 = vor.u32 %v454_v26, %v450_v22  ;;  %v372_v41 = vrot.slane %v370_v31, 5 }
  0x2a   : > { %v380_v42 = vshrl.u32 %v2716_v19, 16  ;;  %v386_v43 = vshll.u32 %v2723_v23, 16  ;;  %v378_v46 = vrot.slane %v376_v37, 5  ;;  %v463_v47 = vshrl.u32 %v2730_v32, 16 }
  0x2b   : > { %2283 = vmatmul.mubr.msk.bf16.vlgmr.msra.gmra.mxu0 %vm536_vm3, %v2732_v33  ;;  %v446_v45 = vrot.slane %v445_v35, 4  ;;  %v466_v48 = vshll.u32 %v2730_v32, 16  ;;  %v456_v49 = vrot.slane %v455_v39, 4  ;;  %v373_v50 = vor.u32 %v372_v41, %v369_v36  ;;  %v2786_v35 = vld [vmem:[%s2629_s10 + $0x54] sm:$0xf] }
  0x2c   : > { %2317 = vmatpush3.bf16.msra.mxu0 %v2675_v34  ;;  %v382_v51 = vrot.slane %v380_v42, 4  ;;  %v388_v53 = vrot.slane %v386_v43, 5  ;;  %v465_v56 = vrot.slane %v463_v47, 4  ;;  %v472_v60 = vshll.u32 %v2743_v44, 16  ;;  %v2793_v42 = vld [vmem:[%s2629_s10 + $0x58] sm:$0xf] }
  0x2d   : > { %v451_v55 = vsel %vm2670_vm4, %v446_v45, %v450_v22  ;;  %v468_v59 = vrot.slane %v466_v48, 5  ;;  %2449 = vmatprep.subr.msk.bf16.mxu0 %vm561_vm0, %v2738_v38  ;;  %v461_v34 = vsel %vm2670_vm4, %v456_v49, %v460_v27  ;;  %v374_v0 = vrot.slane %v373_v50, 4  ;;  %v2778_v22 = vld [vmem:[%s2629_s10 + $0x2c] sm:$0x1] }
  0x2e   : > { %v383_v1 = vor.u32 %v382_v51, %v378_v46  ;;  %v476_v2 = vshrl.u32 %v2743_v44, 16  ;;  %v2767_v9 = vcombine.low %v451_v55, %v461_v34  ;;  %v474_v12 = vrot.slane %v472_v60, 5 }
  0x2f   : > { %v469_v10 = vor.u32 %v468_v59, %v465_v56  ;;  %v482_v16 = vshll.u32 %v2751_v54, 16  ;;  %v379_v18 = vsel %vm2670_vm4, %v374_v0, %v378_v46  ;;  %v391_v24 = vshrl.u32 %v2757_v63, 16 }
  0x30   : > { %v384_v20 = vrot.slane %v383_v1, 4  ;;  %v478_v21 = vrot.slane %v476_v2, 4  ;;  %2291 = vmatmul.mubr.msk.bf16.vlgmr.msra.gmra.mxu1 %vm536_vm3, %v2767_v9  ;;  %v394_v27 = vshll.u32 %v2757_v63, 16  ;;  %v400_v31 = vshll.u32 %v2765_v8, 16 }
  0x31   : > { %v470_v25 = vrot.slane %v469_v10, 4  ;;  %v484_v26 = vrot.slane %v482_v16, 5  ;;  %2299 = vmatpush3.bf16.msra.mxu1 %v2655_v15  ;;  %v393_v39 = vrot.slane %v391_v24, 4  ;;  %v404_v41 = vshrl.u32 %v2765_v8, 16  ;;  %v2187_v24 = vld [vmem:[%s3391_s1 + $0x20] sm:$0xf] }
  0x32   : > { %v389_v36 = vsel %vm2670_vm4, %v384_v20, %v388_v53  ;;  %v479_v37 = vor.u32 %v478_v21, %v474_v12  ;;  %v396_v46 = vrot.slane %v394_v27, 5  ;;  %v402_v47 = vrot.slane %v400_v31, 5  ;;  %2448 = vmatprep.subr.msk.bf16.mxu1 %vm561_vm0, %v2773_v17  ;;  %v2806_v53 = vld [vmem:[%s2629_s10 + $0x5c] sm:$0x1] }
  0x33   : > { %v2795_v43 = vcombine.low %v379_v18, %v389_v36  ;;  %v475_v45 = vsel %vm2670_vm4, %v470_v25, %v474_v12  ;;  %v406_v48 = vrot.slane %v404_v41, 4  ;;  %v410_v49 = vshll.u32 %v2778_v22, 16 }
  0x34   : > { %v480_v15 = vrot.slane %v479_v37, 4  ;;  %v487_v50 = vshrl.u32 %v2786_v35, 16  ;;  %v397_v51 = vor.u32 %v396_v46, %v393_v39  ;;  %v490_v55 = vshll.u32 %v2786_v35, 16 }
  0x35   : > { %2286 = vmatprep.mubr.msk.bf16.mxu0 %vm536_vm3, %v2795_v43  ;;  %v496_v56 = vshll.u32 %v2793_v42, 16  ;;  %v500_v59 = vshrl.u32 %v2793_v42, 16  ;;  %v407_v34 = vor.u32 %v406_v48, %v402_v47  ;;  %v412_v0 = vrot.slane %v410_v49, 5 }
  0x36   : > { %v485_v60 = vsel %vm2670_vm4, %v480_v15, %v484_v26  ;;  %v489_v1 = vrot.slane %v487_v50, 4  ;;  %v398_v10 = vrot.slane %v397_v51, 4  ;;  %v492_v12 = vrot.slane %v490_v55, 5 }
  0x37   : > { %v2813_v2 = vcombine.low %v475_v45, %v485_v60  ;;  %v498_v16 = vrot.slane %v496_v56, 5  ;;  %v408_v18 = vrot.slane %v407_v34, 4  ;;  %v502_v20 = vrot.slane %v500_v59, 4 }
  0x38   : > { %v506_v21 = vshll.u32 %v2806_v53, 16  ;;  %v2110_v25 = vrot.slane %v2632_v4, 9  ;;  %v849_v26 = vrot.slane %v2678_v40, 5  ;;  %v403_v27 = vsel %vm2670_vm4, %v398_v10, %v402_v47 }
  0x39   : > { %2294 = vmatprep.mubr.msk.bf16.mxu1 %vm536_vm3, %v2813_v2  ;;  %v493_v31 = vor.u32 %v492_v12, %v489_v1  ;;  %v839_v36 = vrot.slane %v2635_v5, 5  ;;  %v413_v37 = vsel %vm2670_vm4, %v408_v18, %v412_v0  ;;  %v503_v39 = vor.u32 %v502_v20, %v498_v16 }
  0x3a   : > { %v508_v41 = vrot.slane %v506_v21, 5  ;;  %v2111_v45 = vrot.slane %v2663_v28, 9  ;;  %v2832_v46 = vcombine.low %v403_v27, %v413_v37  ;;  %v2094_v47 = vcombine.low %v2632_v4, %v2635_v5 }
  0x3b   : > { %v494_v15 = vrot.slane %v493_v31, 4  ;;  %v840_v40 = vsel %vm2818_vm7, %v2110_v25, %v839_v36  ;;  %v841_v48 = vrot.slane %v839_v36, 4  ;;  %v504_v49 = vrot.slane %v503_v39, 4 }
  0x3c   : > { %v847_v50 = vsel %vm2818_vm7, %v2111_v45, %v846_v61  ;;  %v848_v51 = vrot.slane %v846_v61, 4  ;;  %2287 = vmatmul.mubr.msk.bf16.gmra.mxu0 %vm536_vm3, %v2832_v46  ;;  %v2112_v4 = vrot.slane %v2707_v3, 9  ;;  %v853_v5 = vrot.slane %v2716_v19, 5 }
  0x3d   : > { %v499_v55 = vsel %vm2670_vm4, %v494_v15, %v498_v16  ;;  %v843_v56 = vsel %vm2818_vm7, %v841_v48, %v842_v58  ;;  %v509_v59 = vsel %vm2670_vm4, %v504_v49, %v508_v41  ;;  %v856_v34 = vrot.slane %v2723_v23, 5 }
  0x3e   : > { %v2119_v60 = vcombine.low %v840_v40, %v843_v56  ;;  %v850_v61 = vsel %vm2818_vm7, %v848_v51, %v849_v26  ;;  %v2859_v0 = vcombine.low %v499_v55, %v509_v59  ;;  %v854_v6 = vsel %vm2818_vm7, %v2112_v4, %v853_v5 }
  0x3f   : > { %v855_v1 = vrot.slane %v853_v5, 4  ;;  %v870_v58 = vrot.slane %v2652_v14, 5  ;;  %v2113_v10 = vrot.slane %v2757_v63, 9  ;;  %v860_v12 = vrot.slane %v2765_v8, 5 }
  0x40   : > { %2318 = vmatprep.mubr.msk.bf16.mxu0 %vm536_vm3, %v2119_v60  ;;  %v863_v16 = vrot.slane %v2778_v22, 5  ;;  %2295 = vmatmul.mubr.msk.bf16.gmra.mxu1 %vm536_vm3, %v2859_v0  ;;  %v2870_v23 = vcombine.low %v847_v50, %v850_v61  ;;  %v2114_v20 = vrot.slane %v2645_v11, 9  ;;  %v867_v14 = vrot.slane %v2649_v13, 5 }
  0x41   : > { %v857_v18 = vsel %vm2818_vm7, %v855_v1, %v856_v34  ;;  %2300 = vmatprep.mubr.msk.bf16.mxu1 %vm536_vm3, %v2094_v47  ;;  %v862_v25 = vrot.slane %v860_v12, 4  ;;  %v1218_v22 = vsel %vm561_vm0, %v2738_v38, 0  ;;  %v2115_v27 = vrot.slane %v2689_v52, 9  ;;  %v2895_v38 = vld [vmem:[%s3391_s1 + $0x18] sm:$0xf] }
  0x42   : > { %v2877_v21 = vcombine.low %v854_v6, %v857_v18  ;;  %v869_v26 = vrot.slane %v867_v14, 4  ;;  %v874_v31 = vrot.slane %v2693_v57, 5  ;;  %v2885_v36 = vcombine.low %v2663_v28, %v2666_v29  ;;  %v2915_v47 = vld [vmem:[%s2629_s10 + $0x60] sm:$0xf] }
  0x43   : > { %v861_v37 = vsel %vm2818_vm7, %v2113_v10, %v860_v12  ;;  %v864_v39 = vsel %vm2818_vm7, %v862_v25, %v863_v16  ;;  %v877_v41 = vrot.slane %v2701_v62, 5  ;;  %v868_v28 = vsel %vm2818_vm7, %v2114_v20, %v867_v14  ;;  %v2968_v25 = vld [vmem:[%s2629_s10 + $0x6c] sm:$0xf] }
  0x44   : > { %2319 = vmatmul.mubr.msk.bf16.vlgmr.msra.gmra.mxu0 %vm536_vm3, %v2870_v23  ;;  %v871_v29 = vsel %vm2818_vm7, %v869_v26, %v870_v58  ;;  %v876_v45 = vrot.slane %v874_v31, 4  ;;  %v2116_v15 = vrot.slane %v2730_v32, 9  ;;  %v1070_v62 = vsel %vm561_vm0, %v2773_v17, 0 }
  0x45   : > { %2353 = vmatpush3.bf16.msra.mxu0 %v1218_v22  ;;  %v2908_v40 = vcombine.low %v2707_v3, %v2716_v19  ;;  %2322 = vmatprep.mubr.msk.bf16.mxu0 %vm536_vm3, %v2877_v21  ;;  %v881_v48 = vrot.slane %v2743_v44, 5  ;;  %v884_v49 = vrot.slane %v2751_v54, 5  ;;  %v2919_v50 = vcombine.low %v2757_v63, %v2765_v8  ;;  %v2932_v19 = vld [vmem:[%s2629_s10 + $0x64] sm:$0xf]  ;;  %v310_v54 = vld [vmem:[%s2629_s10 + $0x68] sm:$0x1] }
  0x46   : > { %v2921_v51 = vcombine.low %v861_v37, %v864_v39  ;;  %v2925_v17 = vcombine.low %v2645_v11, %v2649_v13  ;;  %v875_v3 = vsel %vm2818_vm7, %v2115_v27, %v874_v31  ;;  %2451 = vmatprep.subr.msk.bf16.mxu0 %vm561_vm0, %v2895_v38  ;;  %v2935_v55 = vcombine.low %v868_v28, %v871_v29  ;;  %v2943_v11 = vld [vmem:[%s3391_s1 + $0x14] sm:$0xf]  ;;  %v2975_v31 = vld [vmem:[%s2629_s10 + $0x70] sm:$0xf] }
  0x47   : > { %v878_v63 = vsel %vm2818_vm7, %v876_v45, %v877_v41  ;;  %v883_v8 = vrot.slane %v881_v48, 4  ;;  %v888_v56 = vrot.slane %v2793_v42, 5  ;;  %v882_v13 = vsel %vm2818_vm7, %v2116_v15, %v881_v48  ;;  %v313_v29 = vld [vmem:[%s2629_s10 + $0x74] sm:$0x1]  ;;  %s280_s10 = scalar_lea.vmem %s3395_s5, %s2076_s7 }
  0x48   : > { %2301 = vmatmul.mubr.msk.bf16.vlgmr.msra.gmra.mxu1 %vm536_vm3, %v2885_v36  ;;  %v2117_v4 = vrot.slane %v2786_v35, 9  ;;  %v1186_v5 = vshrl.u32 %v2915_v47, 16  ;;  %v1189_v59 = vshll.u32 %v2915_v47, 16  ;;  %v1199_v61 = vshrl.u32 %v2932_v19, 16 }
  0x49   : > { %2335 = vmatpush3.bf16.msra.mxu1 %v1070_v62  ;;  %2304 = vmatprep.mubr.msk.bf16.mxu1 %vm536_vm3, %v2908_v40  ;;  %v885_v60 = vsel %vm2818_vm7, %v883_v8, %v884_v49  ;;  %v1195_v34 = vshll.u32 %v2932_v19, 16  ;;  %v1205_v6 = vshll.u32 %v310_v54, 16  ;;  %v2958_v1 = vcombine.low %v875_v3, %v878_v63 }
  0x4a   : > { %v891_v58 = vrot.slane %v2806_v53, 5  ;;  %2450 = vmatprep.subr.msk.bf16.mxu1 %vm561_vm0, %v2943_v11  ;;  %v1188_v10 = vrot.slane %v1186_v5, 4  ;;  %v1191_v12 = vrot.slane %v1189_v59, 5  ;;  %v2963_v16 = vcombine.low %v882_v13, %v885_v60 }
  0x4b   : > { %v890_v18 = vrot.slane %v888_v56, 4  ;;  %v1197_v20 = vrot.slane %v1195_v34, 5  ;;  %v1201_v14 = vrot.slane %v1199_v61, 4  ;;  %v2155_v53 = vrot.slane %v2915_v47, 9 }
  0x4c   : > { %2323 = vmatmul.mubr.msk.bf16.gmra.mxu0 %vm536_vm3, %v2921_v51  ;;  %v1192_v22 = vor.u32 %v1191_v12, %v1188_v10  ;;  %v1336_v26 = vrot.slane %v2932_v19, 5  ;;  %v1339_v27 = vrot.slane %v310_v54, 5  ;;  %v1207_v39 = vrot.slane %v1205_v6, 5 }
  0x4d   : > { %2326 = vmatprep.mubr.msk.bf16.mxu0 %vm536_vm3, %v2935_v55  ;;  %v1202_v37 = vor.u32 %v1201_v14, %v1197_v20  ;;  %v1592_v41 = vshrl.u32 %v2968_v25, 16  ;;  %v1595_v28 = vshll.u32 %v2968_v25, 16  ;;  %v1605_v48 = vshrl.u32 %v2975_v31, 16 }
  0x4e   : > { %v1193_v45 = vrot.slane %v1192_v22, 4  ;;  %v1337_v15 = vsel %vm2818_vm7, %v2155_v53, %v1336_v26  ;;  %v1338_v62 = vrot.slane %v1336_v26, 4  ;;  %v1601_v63 = vshll.u32 %v2975_v31, 16 }
  0x4f   : > { %v1203_v49 = vrot.slane %v1202_v37, 4  ;;  %v1594_v3 = vrot.slane %v1592_v41, 4  ;;  %v1597_v54 = vrot.slane %v1595_v28, 5  ;;  %v1607_v5 = vrot.slane %v1605_v48, 4 }
  0x50   : > { %2305 = vmatmul.mubr.msk.bf16.gmra.mxu1 %vm536_vm3, %v2919_v50  ;;  %v1198_v8 = vsel %vm2670_vm4, %v1193_v45, %v1197_v20  ;;  %v1340_v13 = vsel %vm2818_vm7, %v1338_v62, %v1339_v27  ;;  %v1611_v59 = vshll.u32 %v313_v29, 16  ;;  %v1603_v6 = vrot.slane %v1601_v63, 5 }
  0x51   : > { %2308 = vmatprep.mubr.msk.bf16.mxu1 %vm536_vm3, %v2925_v17  ;;  %v1208_v60 = vsel %vm2670_vm4, %v1203_v49, %v1207_v39  ;;  %v2996_v61 = vcombine.low %v1337_v15, %v1340_v13  ;;  %v1598_v34 = vor.u32 %v1597_v54, %v1594_v3  ;;  %v2186_v12 = vrot.slane %v2968_v25, 9 }
  0x52   : > { %v2998_v10 = vcombine.low %v1198_v8, %v1208_v60  ;;  %v1742_v20 = vrot.slane %v2975_v31, 5  ;;  %v1608_v22 = vor.u32 %v1607_v5, %v1603_v6  ;;  %v1613_v53 = vrot.slane %v1611_v59, 5 }
  0x53   : > { %v1599_v14 = vrot.slane %v1598_v34, 4  ;;  %v1745_v26 = vrot.slane %v313_v29, 5  ;;  %v2099_v27 = vcombine.low %v2689_v52, %v2693_v57  ;;  %v2100_v37 = vcombine.low %v2730_v32, %v2743_v44 }
  0x54   : > { %2327 = vmatmul.mubr.msk.bf16.gmra.mxu0 %vm536_vm3, %v2958_v1  ;;  %v3010_v39 = vsel %vm2818_vm7, %v2186_v12, %v1742_v20  ;;  %v1744_v41 = vrot.slane %v1742_v20, 4  ;;  %v889_v52 = vsel %vm2818_vm7, %v2117_v4, %v888_v56  ;;  %v892_v57 = vsel %vm2818_vm7, %v890_v18, %v891_v58 }
  0x55   : > { %2330 = vmatprep.mubr.msk.bf16.mxu0 %vm536_vm3, %v2963_v16  ;;  %v1604_v32 = vsel %vm2670_vm4, %v1599_v14, %v1603_v6  ;;  %v1609_v44 = vrot.slane %v1608_v22, 4  ;;  %v2126_v56 = vcombine.low %v889_v52, %v892_v57  ;;  %v2101_v58 = vcombine.low %v2786_v35, %v2793_v42  ;;  %v2176_v35 = vld [vmem:[%s3391_s1 + $0x1c] sm:$0xf] }
  0x56   : > { %v3026_v28 = vsel %vm2818_vm7, %v1744_v41, %v1745_v26  ;;  %v1476_v30 = vsel %vm561_vm0, %v2895_v38, 0  ;;  %v2136_v42 = vcombine.low %v2915_v47, %v2932_v19  ;;  %v1624_v38 = vsel %vm561_vm0, %v2176_v35, 0 }
  0x57   : > { %v1614_v29 = vsel %vm2670_vm4, %v1609_v44, %v1613_v53  ;;  %v2188_v45 = vcombine.low %v3010_v39, %v3026_v28 }
  0x58   : > { %2309 = vmatmul.mubr.msk.bf16.gmra.mxu1 %vm536_vm3, %v2099_v27  ;;  %v3033_v4 = vcombine.low %v1604_v32, %v1614_v29 }
  0x59   : > { %2312 = vmatprep.mubr.msk.bf16.mxu1 %vm536_vm3, %v2100_v37 }
  0x5c   : > { %2331 = vmatmul.mubr.msk.bf16.gmra.mxu0 %vm536_vm3, %v2126_v56 }
  0x5d   : > { %2354 = vmatprep.mubr.msk.bf16.mxu0 %vm536_vm3, %v2732_v33  ;;  %v1350_v33 = vsel %vm561_vm0, %v2943_v11, 0 }
  0x60   : > { %2313 = vmatmul.mubr.msk.bf16.gmra.mxu1 %vm536_vm3, %v2101_v58 }
  0x61   : > { %2336 = vmatprep.mubr.msk.bf16.mxu1 %vm536_vm3, %v2885_v36  ;;  %v1756_v36 = vsel %vm561_vm0, %v2187_v24, 0 }
  0x64   : > { %2355 = vmatmul.mubr.msk.bf16.vlgmr.msra.gmra.mxu0 %vm536_vm3, %v2795_v43 }
  0x65   : > { %2389 = vmatpush3.bf16.msra.mxu0 %v1476_v30  ;;  %2358 = vmatprep.mubr.msk.bf16.mxu0 %vm536_vm3, %v2832_v46 }
  0x66   : > { %2453 = vmatprep.subr.msk.bf16.mxu0 %vm561_vm0, %v2187_v24 }
  0x68   : > { %2337 = vmatmul.mubr.msk.bf16.vlgmr.msra.gmra.mxu1 %vm536_vm3, %v2908_v40 }
  0x69   : > { %2371 = vmatpush3.bf16.msra.mxu1 %v1350_v33  ;;  %2340 = vmatprep.mubr.msk.bf16.mxu1 %vm536_vm3, %v2919_v50 }
  0x6a   : > { %2452 = vmatprep.subr.msk.bf16.mxu1 %vm561_vm0, %v2176_v35 }
  0x6c   : > { %2359 = vmatmul.mubr.msk.bf16.gmra.mxu0 %vm536_vm3, %v2709_v7 }
  0x6d   : > { %2362 = vmatprep.mubr.msk.bf16.mxu0 %vm536_vm3, %v2767_v9 }
  0x70   : > { %2341 = vmatmul.mubr.msk.bf16.gmra.mxu1 %vm536_vm3, %v2925_v17 }
  0x71   : > { %2344 = vmatprep.mubr.msk.bf16.mxu1 %vm536_vm3, %v2099_v27 }
  0x74   : > { %2363 = vmatmul.mubr.msk.bf16.gmra.mxu0 %vm536_vm3, %v2813_v2 }
  0x75   : > { %2366 = vmatprep.mubr.msk.bf16.mxu0 %vm536_vm3, %v2859_v0 }
  0x78   : > { %2345 = vmatmul.mubr.msk.bf16.gmra.mxu1 %vm536_vm3, %v2100_v37 }
  0x79   : > { %2348 = vmatprep.mubr.msk.bf16.mxu1 %vm536_vm3, %v2101_v58 }
  0x7c   : > { %2367 = vmatmul.mubr.msk.bf16.gmra.mxu0 %vm536_vm3, %v2998_v10 }
  0x7d   : > { %2390 = vmatprep.mubr.msk.bf16.mxu0 %vm536_vm3, %v2908_v40 }
  0x80   : > { %2349 = vmatmul.mubr.msk.bf16.gmra.mxu1 %vm536_vm3, %v2136_v42 }
  0x81   : > { %2372 = vmatprep.mubr.msk.bf16.mxu1 %vm536_vm3, %v2870_v23  ;;  %v2167_v23 = vcombine.low %v2968_v25, %v2975_v31 }
  0x84   : > { %2391 = vmatmul.mubr.msk.bf16.vlgmr.msra.gmra.mxu0 %vm536_vm3, %v2919_v50 }
  0x85   : > { %2425 = vmatpush3.bf16.msra.mxu0 %v1756_v36  ;;  %2394 = vmatprep.mubr.msk.bf16.mxu0 %vm536_vm3, %v2925_v17 }
  0x88   : > { %2373 = vmatmul.mubr.msk.bf16.vlgmr.msra.gmra.mxu1 %vm536_vm3, %v2877_v21 }
  0x89   : > { %2407 = vmatpush3.bf16.msra.mxu1 %v1624_v38  ;;  %2376 = vmatprep.mubr.msk.bf16.mxu1 %vm536_vm3, %v2921_v51 }
  0x8c   : > { %2395 = vmatmul.mubr.msk.bf16.gmra.mxu0 %vm536_vm3, %v2099_v27 }
  0x8d   : > { %2398 = vmatprep.mubr.msk.bf16.mxu0 %vm536_vm3, %v2100_v37 }
  0x90   : > { %2377 = vmatmul.mubr.msk.bf16.gmra.mxu1 %vm536_vm3, %v2935_v55 }
  0x91   : > { %2380 = vmatprep.mubr.msk.bf16.mxu1 %vm536_vm3, %v2958_v1 }
  0x94   : > { %2399 = vmatmul.mubr.msk.bf16.gmra.mxu0 %vm536_vm3, %v2101_v58 }
  0x95   : > { %2402 = vmatprep.mubr.msk.bf16.mxu0 %vm536_vm3, %v2136_v42 }
  0x98   : > { %2381 = vmatmul.mubr.msk.bf16.gmra.mxu1 %vm536_vm3, %v2963_v16 }
  0x99   : > { %2384 = vmatprep.mubr.msk.bf16.mxu1 %vm536_vm3, %v2126_v56 }
  0x9c   : > { %2403 = vmatmul.mubr.msk.bf16.gmra.mxu0 %vm536_vm3, %v2167_v23 }
  0x9d   : > { %2426 = vmatprep.mubr.msk.bf16.mxu0 %vm536_vm3, %v2877_v21 }
  0xa0   : > { %2385 = vmatmul.mubr.msk.bf16.gmra.mxu1 %vm536_vm3, %v2996_v61 }
  0xa1   : > { %2408 = vmatprep.mubr.msk.bf16.mxu1 %vm536_vm3, %v2795_v43 }
  0xa4   : > { %2427 = vmatmul.mubr.msk.bf16.vlgmr.msra.gmra.mxu0 %vm536_vm3, %v2921_v51 }
  0xa5   : > { %2430 = vmatprep.mubr.msk.bf16.mxu0 %vm536_vm3, %v2935_v55 }
  0xa8   : > { %2409 = vmatmul.mubr.msk.bf16.vlgmr.msra.gmra.mxu1 %vm536_vm3, %v2832_v46 }
  0xa9   : > { %2412 = vmatprep.mubr.msk.bf16.mxu1 %vm536_vm3, %v2709_v7 }
  0xac   : > { %2431 = vmatmul.mubr.msk.bf16.gmra.mxu0 %vm536_vm3, %v2958_v1 }
  0xad   : > { %2434 = vmatprep.mubr.msk.bf16.mxu0 %vm536_vm3, %v2963_v16 }
  0xb0   : > { %2413 = vmatmul.mubr.msk.bf16.gmra.mxu1 %vm536_vm3, %v2767_v9 }
  0xb1   : > { %2416 = vmatprep.mubr.msk.bf16.mxu1 %vm536_vm3, %v2813_v2 }
  0xb4   : > { %2435 = vmatmul.mubr.msk.bf16.gmra.mxu0 %vm536_vm3, %v2126_v56 }
  0xb5   : > { %2438 = vmatprep.mubr.msk.bf16.mxu0 %vm536_vm3, %v2996_v61 }
  0xb8   : > { %2417 = vmatmul.mubr.msk.bf16.gmra.mxu1 %vm536_vm3, %v2859_v0 }
  0xb9   : > { %2420 = vmatprep.mubr.msk.bf16.mxu1 %vm536_vm3, %v2998_v10 }
  0xbc   : > { %2439 = vmatmul.mubr.msk.bf16.gmra.mxu0 %vm536_vm3, %v2188_v45 }
  0xc0   : > { %2421 = vmatmul.mubr.msk.bf16.gmra.mxu1 %vm536_vm3, %v3033_v4 }
  0xeb   : > { %v2284_v7 = vpop.f32.mrf.mxu0 }
  0xed   : > { %v599_v43 = vpop.f32.mrf.mxu0 }
  0xef   : > { %v2285_v46 = vpop.f32.mrf.mxu0 }
  0xf0   : > { %v2292_v9 = vpop.f32.mrf.mxu1 }
  0xf1   : > { %v602_v40 = vpop.f32.mrf.mxu0 }
  0xf2   : > { %v631_v2 = vpop.f32.mrf.mxu1 }
  0xf4   : > { %v2293_v21 = vpop.f32.mrf.mxu1 }
  0xf6   : > { %v634_v47 = vpop.f32.mrf.mxu1 }
  0xfc   : > { %v2288_v0 = vpop.f32.mrf.mxu0 }
  0xfe   : > { %v615_v50 = vpop.f32.mrf.mxu0 }
 0x100   : > { %v2296_v51 = vpop.f32.mrf.mxu1  ;;  %v2289_v17 = vpop.f32.mrf.mxu0 }
 0x102   : > { %v647_v19 = vpop.f32.mrf.mxu1  ;;  %v618_v55 = vpop.f32.mrf.mxu0 }
 0x104   : > { %v2297_v11 = vpop.f32.mrf.mxu1  ;;  %v2320_v1 = vpop.f32.mrf.mxu0 }
 0x106   : > { %v3145_v16 = vpop.f32.mrf.mxu1  ;;  %v980_v18 = vpop.f32.mrf.mxu0 }
 0x108   : > { %v2302_v25 = vpop.f32.mrf.mxu1  ;;  %v2321_v31 = vpop.f32.mrf.mxu0 }
 0x109   : > { %v772_v15 = vadd.f32 %v2302_v25, %v2284_v7 }
 0x10a   : > { %v763_v62 = vpop.f32.mrf.mxu1  ;;  %v983_v48 = vpop.f32.mrf.mxu0 }
 0x10b   : > { %v3147_v49 = vadd.f32 %v2320_v1, %v772_v15  ;;  %v764_v3 = vadd.f32 %v763_v62, %v599_v43 }
 0x10c   : > { %v2303_v54 = vpop.f32.mrf.mxu1  ;;  %v2324_v63 = vpop.f32.mrf.mxu0 }
 0x10d   : > { %v3149_v8 = vadd.f32 %v980_v18, %v764_v3  ;;  %v775_v13 = vadd.f32 %v2303_v54, %v2285_v46 }
 0x10e   : > { %v766_v5 = vpop.f32.mrf.mxu1  ;;  %v996_v59 = vpop.f32.mrf.mxu0 }
 0x10f   : > { %v3151_v60 = vadd.f32 %v2321_v31, %v775_v13  ;;  %v767_v61 = vadd.f32 %v766_v5, %v602_v40 }
 0x110   : > { %v2306_v34 = vpop.f32.mrf.mxu1  ;;  %v2325_v6 = vpop.f32.mrf.mxu0 }
 0x111   : > { %v3153_v10 = vadd.f32 %v983_v48, %v767_v61  ;;  %v788_v12 = vadd.f32 %v2306_v34, %v2288_v0 }
 0x112   : > { %v779_v20 = vpop.f32.mrf.mxu1  ;;  %v999_v14 = vpop.f32.mrf.mxu0 }
 0x113   : > { %v3155_v22 = vadd.f32 %v2324_v63, %v788_v12  ;;  %v780_v53 = vadd.f32 %v779_v20, %v615_v50 }
 0x114   : > { %v2307_v26 = vpop.f32.mrf.mxu1  ;;  %v2328_v27 = vpop.f32.mrf.mxu0 }
 0x115   : > { %v3157_v37 = vadd.f32 %v996_v59, %v780_v53  ;;  %v791_v39 = vadd.f32 %v2307_v26, %v2289_v17 }
 0x116   : > { %v782_v41 = vpop.f32.mrf.mxu1  ;;  %v1012_v52 = vpop.f32.mrf.mxu0 }
 0x117   : > { %v3159_v57 = vadd.f32 %v2325_v6, %v791_v39  ;;  %v783_v32 = vadd.f32 %v782_v41, %v618_v55 }
 0x118   : > { %v2310_v44 = vpop.f32.mrf.mxu1  ;;  %v2329_v28 = vpop.f32.mrf.mxu0 }
 0x119   : > { %v3161_v29 = vadd.f32 %v999_v14, %v783_v32  ;;  %v804_v45 = vadd.f32 %v2310_v44, %v2292_v9 }
 0x11a   : > { %v795_v56 = vpop.f32.mrf.mxu1  ;;  %v1015_v4 = vpop.f32.mrf.mxu0 }
 0x11b   : > { %v3163_v58 = vadd.f32 %v2328_v27, %v804_v45  ;;  %v796_v30 = vadd.f32 %v795_v56, %v631_v2 }
 0x11c   : > { %v2311_v24 = vpop.f32.mrf.mxu1  ;;  %v2332_v33 = vpop.f32.mrf.mxu0 }
 0x11d   : > { %v3165_v35 = vadd.f32 %v1012_v52, %v796_v30  ;;  %v807_v42 = vadd.f32 %v2311_v24, %v2293_v21 }
 0x11e   : > { %v798_v36 = vpop.f32.mrf.mxu1  ;;  %v1028_v38 = vpop.f32.mrf.mxu0 }
 0x11f   : > { %v3167_v23 = vadd.f32 %v2329_v28, %v807_v42  ;;  %v799_v7 = vadd.f32 %v798_v36, %v634_v47 }
 0x120   : > { %v2314_v43 = vpop.f32.mrf.mxu1  ;;  %v2333_v46 = vpop.f32.mrf.mxu0 }
 0x121   : > { %v3169_v40 = vadd.f32 %v1015_v4, %v799_v7  ;;  %v820_v9 = vadd.f32 %v2314_v43, %v2296_v51 }
 0x122   : > { %v811_v0 = vpop.f32.mrf.mxu1  ;;  %v1031_v50 = vpop.f32.mrf.mxu0 }
 0x123   : > { %v3171_v17 = vadd.f32 %v2332_v33, %v820_v9  ;;  %v812_v2 = vadd.f32 %v811_v0, %v647_v19 }
 0x124   : > { %v2315_v55 = vpop.f32.mrf.mxu1  ;;  %v3173_v1 = vpop.f32.mrf.mxu0 }
 0x125   : > { %v3175_v18 = vadd.f32 %v1028_v38, %v812_v2  ;;  %v823_v21 = vadd.f32 %v2315_v55, %v2297_v11 }
 0x126   : > { %v814_v25 = vpop.f32.mrf.mxu1  ;;  %v3177_v31 = vpop.f32.mrf.mxu0 }
 0x127   : > { %3400 = vst [vmem:[#allocation2_spill] sm:$0xff] %v3175_v18  ;;  %v3179_v47 = vadd.f32 %v2333_v46, %v823_v21  ;;  %v815_v15 = vadd.f32 %v814_v25, %v3145_v16 }
 0x128   : > { %v2338_v62 = vpop.f32.mrf.mxu1  ;;  %v3182_v51 = vpop.f32.mrf.mxu0 }
 0x129   : > { %3401 = vst [vmem:[#allocation3_spill] sm:$0xff] %v3179_v47  ;;  %v3184_v48 = vadd.f32 %v1031_v50, %v815_v15 }
 0x12a   : > { %v1106_v3 = vpop.f32.mrf.mxu1  ;;  %v3186_v19 = vpop.f32.mrf.mxu0 }
 0x12b   : > { %3402 = vst [vmem:[#allocation4_spill] sm:$0xff] %v3184_v48 }
 0x12c   : > { %v2339_v54 = vpop.f32.mrf.mxu1  ;;  %v3188_v63 = vpop.f32.mrf.mxu0 }
 0x12e   : > { %v1109_v13 = vpop.f32.mrf.mxu1  ;;  %v3190_v11 = vpop.f32.mrf.mxu0 }
 0x130   : > { %v3192_v5 = vpop.f32.mrf.mxu1  ;;  %v3194_v59 = vpop.f32.mrf.mxu0 }
 0x132   : > { %v3196_v61 = vpop.f32.mrf.mxu1  ;;  %v3198_v16 = vpop.f32.mrf.mxu0 }
 0x134   : > { %v3200_v34 = vpop.f32.mrf.mxu1  ;;  %v3202_v6 = vpop.f32.mrf.mxu0 }
 0x136   : > { %v3204_v12 = vpop.f32.mrf.mxu1  ;;  %v3206_v20 = vpop.f32.mrf.mxu0 }
 0x138   : > { %v3208_v14 = vpop.f32.mrf.mxu1  ;;  %v3210_v53 = vpop.f32.mrf.mxu0 }
 0x13a   : > { %v3212_v26 = vpop.f32.mrf.mxu1  ;;  %v3214_v27 = vpop.f32.mrf.mxu0 }
 0x13c   : > { %v3216_v39 = vpop.f32.mrf.mxu1  ;;  %v3218_v41 = vpop.f32.mrf.mxu0 }
 0x13e   : > { %v3220_v52 = vpop.f32.mrf.mxu1  ;;  %v3222_v32 = vpop.f32.mrf.mxu0 }
 0x13f   : > { %3403 = vst [vmem:[#allocation5_spill] sm:$0xff] %v3222_v32 }
 0x140   : > { %v3224_v44 = vpop.f32.mrf.mxu1  ;;  %v3226_v28 = vpop.f32.mrf.mxu0 }
 0x141   : > { %3404 = vst [vmem:[#allocation6_spill] sm:$0xff] %v3226_v28 }
 0x142   : > { %v3228_v45 = vpop.f32.mrf.mxu1  ;;  %v3230_v56 = vpop.f32.mrf.mxu0 }
 0x143   : > { %3405 = vst [vmem:[#allocation7_spill] sm:$0xff] %v3228_v45  ;;  %3406 = vst [vmem:[#allocation8_spill] sm:$0xff] %v3230_v56 }
 0x144   : > { %v3232_v4 = vpop.f32.mrf.mxu1  ;;  %v2392_v30 = vpop.f32.mrf.mxu0 }
 0x145   : > { %3407 = vst [vmem:[#allocation9_spill] sm:$0xff] %v3232_v4 }
 0x146   : > { %v3234_v24 = vpop.f32.mrf.mxu1  ;;  %v1512_v33 = vpop.f32.mrf.mxu0 }
 0x147   : > { %3408 = vst [vmem:[#allocation10_spill] sm:$0xff] %v3234_v24 }
 0x148   : > { %v2374_v42 = vpop.f32.mrf.mxu1  ;;  %v2393_v36 = vpop.f32.mrf.mxu0 }
 0x14a   : > { %v1386_v38 = vpop.f32.mrf.mxu1  ;;  %v3236_v7 = vpop.f32.mrf.mxu0 }
 0x14c   : > { %v2375_v43 = vpop.f32.mrf.mxu1  ;;  %v3238_v46 = vpop.f32.mrf.mxu0 }
 0x14e   : > { %v1389_v9 = vpop.f32.mrf.mxu1  ;;  %v3240_v0 = vpop.f32.mrf.mxu0 }
 0x150   : > { %v2378_v50 = vpop.f32.mrf.mxu1  ;;  %v3242_v2 = vpop.f32.mrf.mxu0 }
 0x151   : > { %3409 = vst [vmem:[#allocation11_spill] sm:$0xff] %v3242_v2 }
 0x152   : > { %v1402_v55 = vpop.f32.mrf.mxu1  ;;  %v3244_v21 = vpop.f32.mrf.mxu0 }
 0x153   : > { %3410 = vst [vmem:[#allocation12_spill] sm:$0xff] %v3244_v21  ;;  %v1171_v21 = vadd.f32 %v2338_v62, %v3147_v49  ;;  %v1170_v62 = vadd.f32 %v1109_v13, %v3153_v10 }
 0x154   : > { %v3246_v25 = vpop.f32.mrf.mxu1  ;;  %v3248_v15 = vpop.f32.mrf.mxu0 }
 0x155   : > { %3411 = vst [vmem:[#allocation13_spill] sm:$0xff] %v3248_v15 }
 0x156   : > { %v3250_v56 = vpop.f32.mrf.mxu1  ;;  %v3252_v24 = vpop.f32.mrf.mxu0 }
 0x157   : > { %3412 = vst [vmem:[#allocation14_spill] sm:$0xff] %v3252_v24  ;;  %v1169_v24 = vadd.f32 %v1106_v3, %v3149_v8 }
 0x158   : > { %v3254_v48 = vpop.f32.mrf.mxu1  ;;  %v3256_v28 = vpop.f32.mrf.mxu0 }
 0x159   : > { %3413 = vst [vmem:[#allocation15_spill] sm:$0xff] %v3256_v28  ;;  %v1317_v49 = vadd.f32 %v3177_v31, %v1169_v24  ;;  %v1318_v31 = vadd.f32 %v3186_v19, %v1170_v62 }
 0x15a   : > { %v3258_v32 = vpop.f32.mrf.mxu1  ;;  %v3260_v4 = vpop.f32.mrf.mxu0 }
 0x15b   : > { %3414 = vst [vmem:[#allocation16_spill] sm:$0xff] %v3258_v32  ;;  %3415 = vst [vmem:[#allocation17_spill] sm:$0xff] %v3260_v4  ;;  %v1319_v4 = vadd.f32 %v3173_v1, %v1171_v21  ;;  %v1175_v1 = vadd.f32 %v3192_v5, %v3155_v22  ;;  %v1449_v21 = vadd.f32 %v1386_v38, %v1317_v49 }
 0x15c   : > { %v3262_v2 = vpop.f32.mrf.mxu1  ;;  %v3264_v47 = vpop.f32.mrf.mxu0  ;;  %v1174_v5 = vadd.f32 %v3204_v12, %v3161_v29  ;;  %v1180_v29 = vadd.f32 %v3216_v39, %v3167_v23 }
 0x15d   : > { %3416 = vst [vmem:[#allocation18_spill] sm:$0xff] %v3262_v2  ;;  %3417 = vst [vmem:[#allocation19_spill] sm:$0xff] %v3264_v47  ;;  %v1172_v2 = vadd.f32 %v2339_v54, %v3151_v60  ;;  %v1173_v60 = vadd.f32 %v3196_v61, %v3157_v37  ;;  %v1176_v37 = vadd.f32 %v3200_v34, %v3159_v57 }
 0x15e   : > { %v3268_v15 = vpop.f32.mrf.mxu1  ;;  %v3270_v45 = vpop.f32.mrf.mxu0  ;;  %v1177_v57 = vadd.f32 %v3212_v26, %v3165_v35  ;;  %v1183_v35 = vadd.f32 %v3224_v44, %v3171_v17  ;;  %v1328_v17 = vadd.f32 %v3210_v53, %v1180_v29 }
 0x15f   : > { %3418 = vst [vmem:[#allocation20_spill] sm:$0xff] %v3270_v45  ;;  %v1451_v45 = vadd.f32 %v2374_v42, %v1319_v4  ;;  %v1323_v42 = vadd.f32 %v3188_v63, %v1175_v1  ;;  %v1321_v22 = vadd.f32 %v3190_v11, %v1173_v60  ;;  %v1179_v11 = vadd.f32 %v3208_v14, %v3163_v58  ;;  %v3422_v60 = vld [vmem:[#allocation2_spill] sm:$0xff] }
 0x160   : > { %v3273_v18 = vpop.f32.mrf.mxu1  ;;  %v3275_v28 = vpop.f32.mrf.mxu0  ;;  %v1178_v58 = vadd.f32 %v3220_v52, %v3169_v40 }
 0x161   : > { %3419 = vst [vmem:[#allocation21_spill] sm:$0xff] %v3273_v18  ;;  %3420 = vst [vmem:[#allocation22_spill] sm:$0xff] %v3275_v28  ;;  %v1320_v18 = vadd.f32 %v3182_v51, %v1172_v2  ;;  %v1577_v10 = vadd.f32 %v2392_v30, %v1451_v45  ;;  %v1575_v51 = vadd.f32 %v1512_v33, %v1449_v21 }
 0x162   : > { %v3279_v32 = vpop.f32.mrf.mxu1  ;;  %v3281_v47 = vpop.f32.mrf.mxu0  ;;  %v1450_v2 = vadd.f32 %v1389_v9, %v1318_v31  ;;  %v1455_v61 = vadd.f32 %v2378_v50, %v1323_v42  ;;  %v1453_v38 = vadd.f32 %v1402_v55, %v1321_v22  ;;  %v1322_v9 = vadd.f32 %v3198_v16, %v1174_v5 }
 0x163   : > { %3421 = vst [vmem:[#allocation23_spill] sm:$0xff] %v3281_v47  ;;  %v1452_v13 = vadd.f32 %v2375_v43, %v1320_v18  ;;  %v1326_v49 = vadd.f32 %v3214_v27, %v1178_v58  ;;  %v3426_v27 = vld [vmem:[#allocation11_spill] sm:$0xff] }
 0x164   : > { %v3285_v8 = vpop.f32.mrf.mxu1  ;;  %v2428_v3 = vpop.f32.mrf.mxu0  ;;  %v1576_v33 = vadd.f32 %v3236_v7, %v1450_v2  ;;  %v1581_v26 = vadd.f32 %v3238_v46, %v1455_v61  ;;  %v1454_v40 = vadd.f32 %v3250_v56, %v1322_v9  ;;  %v1579_v44 = vadd.f32 %v3240_v0, %v1453_v38  ;;  %v3423_v0 = vld [vmem:[#allocation7_spill] sm:$0xff] }
 0x165   : > { %v1578_v63 = vadd.f32 %v2393_v36, %v1452_v13  ;;  %v1181_v31 = vadd.f32 %v3423_v0, %v3422_v60  ;;  %v3425_v13 = vld [vmem:[#allocation9_spill] sm:$0xff] }
 0x166   : > { %v3292_v54 = vpop.f32.mrf.mxu1  ;;  %v1792_v47 = vpop.f32.mrf.mxu0 }
 0x168   : > { %v2410_v4 = vpop.f32.mrf.mxu1  ;;  %v2429_v24 = vpop.f32.mrf.mxu0 }
 0x169   : > { %v1725_v28 = vadd.f32 %v2410_v4, %v1577_v10  ;;  %v3424_v10 = vld [vmem:[#allocation3_spill] sm:$0xff] }
 0x16a   : > { %v1660_v18 = vpop.f32.mrf.mxu1  ;;  %v1795_v19 = vpop.f32.mrf.mxu0  ;;  %v1184_v4 = vadd.f32 %v3425_v13, %v3424_v10 }
 0x16b   : > { %v1857_v45 = vadd.f32 %v2428_v3, %v1725_v28  ;;  %v1723_v30 = vadd.f32 %v1660_v18, %v1575_v51  ;;  %v1324_v28 = vadd.f32 %v3194_v59, %v1176_v37  ;;  %v1325_v59 = vadd.f32 %v3206_v20, %v1177_v57  ;;  %v3428_v18 = vld [vmem:[#allocation13_spill] sm:$0xff] }
 0x16c   : > { %v2411_v34 = vpop.f32.mrf.mxu1  ;;  %v2432_v12 = vpop.f32.mrf.mxu0 }
 0x16d   : > { %1873 = vst [vmem:[%s3304_s30 + $0x10] sm:$0xff] %v1857_v45  ;;  %v1855_v36 = vadd.f32 %v1792_v47, %v1723_v30  ;;  %v1726_v43 = vadd.f32 %v2411_v34, %v1578_v63  ;;  %v1327_v47 = vadd.f32 %v3202_v6, %v1179_v11  ;;  %v1456_v16 = vadd.f32 %v3246_v25, %v1324_v28  ;;  %v3429_v63 = vld [vmem:[#allocation16_spill] sm:$0xff]  ;;  %v3430_v30 = vld [vmem:[#allocation18_spill] sm:$0xff] }
 0x16e   : > { %v1663_v23 = vpop.f32.mrf.mxu1  ;;  %v1808_v14 = vpop.f32.mrf.mxu0  ;;  %v1331_v6 = vadd.f32 %v3218_v41, %v1183_v35  ;;  %v3427_v41 = vld [vmem:[#allocation12_spill] sm:$0xff]  ;;  %v1910_v2 = vmul.f32 %v1857_v45, %v1857_v45  ;;  %v1457_v61 = vadd.f32 %v3429_v63, %v1325_v59  ;;  %v1460_v11 = vadd.f32 %v3430_v30, %v1328_v17  ;;  %v3432_v59 = vld [vmem:[#allocation6_spill] sm:$0xff] }
 0x16f   : > { %1871 = vst [vmem:[%s3304_s30] sm:$0xff] %v1855_v36  ;;  %v1858_v39 = vadd.f32 %v2429_v24, %v1726_v43  ;;  %v1724_v7 = vadd.f32 %v1663_v23, %v1576_v33  ;;  %v1459_v20 = vadd.f32 %v3254_v48, %v1327_v47  ;;  %v1908_v62 = vmul.f32 %v1855_v36, %v1855_v36  ;;  %v3431_v43 = vld [vmem:[#allocation5_spill] sm:$0xff]  ;;  %v3435_v17 = vld [vmem:[#allocation14_spill] sm:$0xff] }
 0x170   : > { %v2414_v52 = vpop.f32.mrf.mxu1  ;;  %v2433_v50 = vpop.f32.mrf.mxu0  ;;  %v1582_v24 = vadd.f32 %v3426_v27, %v1456_v16  ;;  %v1580_v42 = vadd.f32 %v3427_v41, %v1454_v40  ;;  %v1458_v28 = vadd.f32 %v3268_v15, %v1326_v49  ;;  %v1332_v16 = vadd.f32 %v3432_v59, %v1184_v4  ;;  %v3433_v40 = vld [vmem:[#allocation4_spill] sm:$0xff] }
 0x171   : > { %1874 = vst [vmem:[%s3304_s30 + $0x18] sm:$0xff] %v1858_v39  ;;  %v1856_v46 = vadd.f32 %v1795_v19, %v1724_v7  ;;  %v1729_v55 = vadd.f32 %v2414_v52, %v1581_v26  ;;  %v1585_v19 = vadd.f32 %v3428_v18, %v1459_v20  ;;  %v3434_v52 = vld [vmem:[#allocation10_spill] sm:$0xff]  ;;  %v3440_v18 = vld [vmem:[#allocation19_spill] sm:$0xff] }
 0x172   : > { %v1676_v3 = vpop.f32.mrf.mxu1  ;;  %v1811_v25 = vpop.f32.mrf.mxu0  ;;  %v1464_v41 = vadd.f32 %v3285_v8, %v1332_v16  ;;  %v3443_v16 = vld [vmem:[#allocation23_spill] sm:$0xff] }
 0x173   : > { %1872 = vst [vmem:[%s3304_s30 + $0x8] sm:$0xff] %v1856_v46  ;;  %v1887_v56 = vadd.f32 %v1856_v46, %v1855_v36  ;;  %v1909_v1 = vmul.f32 %v1856_v46, %v1856_v46  ;;  %v1861_v21 = vadd.f32 %v2432_v12, %v1729_v55  ;;  %v1727_v53 = vadd.f32 %v1676_v3, %v1579_v44  ;;  %v3436_v46 = vld [vmem:[#allocation15_spill] sm:$0xff] }
 0x174   : > { %v2415_v48 = vpop.f32.mrf.mxu1  ;;  %v2436_v51 = vpop.f32.mrf.mxu0  ;;  %v1911_v12 = vmul.f32 %v1858_v39, %v1858_v39  ;;  %v1583_v44 = vadd.f32 %v3435_v17, %v1457_v61  ;;  %v1586_v55 = vadd.f32 %v3436_v46, %v1460_v11 }
 0x175   : > { %v1888_v22 = vadd.f32 %v1887_v56, %v1857_v45  ;;  %v1924_v37 = vadd.f32 %v1909_v1, %v1908_v62  ;;  %1877 = vst [vmem:[%s3304_s30 + $0x30] sm:$0xff] %v1861_v21  ;;  %v1859_v5 = vadd.f32 %v1808_v14, %v1727_v53  ;;  %v1730_v57 = vadd.f32 %v2415_v48, %v1582_v24  ;;  %v3438_v1 = vld [vmem:[#allocation21_spill] sm:$0xff] }
 0x176   : > { %v1679_v29 = vpop.f32.mrf.mxu1  ;;  %v1824_v34 = vpop.f32.mrf.mxu0  ;;  %v1329_v45 = vadd.f32 %v3431_v43, %v1181_v31  ;;  %v1463_v53 = vadd.f32 %v3438_v1, %v1331_v6  ;;  %v1914_v10 = vmul.f32 %v1861_v21, %v1861_v21 }
 0x177   : > { %v1925_v33 = vadd.f32 %v1924_v37, %v1910_v2  ;;  %1875 = vst [vmem:[%s3304_s30 + $0x20] sm:$0xff] %v1859_v5  ;;  %v1889_v38 = vadd.f32 %v1888_v22, %v1858_v39  ;;  %v1728_v36 = vadd.f32 %v1679_v29, %v1580_v42  ;;  %v1912_v9 = vmul.f32 %v1859_v5, %v1859_v5 }
 0x178   : > { %v1862_v58 = vadd.f32 %v2433_v50, %v1730_v57  ;;  %v2418_v35 = vpop.f32.mrf.mxu1  ;;  %v2437_v23 = vpop.f32.mrf.mxu0  ;;  %v1182_v39 = vadd.f32 %v3434_v52, %v3433_v40  ;;  %v1461_v60 = vadd.f32 %v3279_v32, %v1329_v45  ;;  %v3439_v32 = vld [vmem:[#allocation8_spill] sm:$0xff] }
 0x179   : > { %v1890_v14 = vadd.f32 %v1889_v38, %v1859_v5  ;;  %v1926_v26 = vadd.f32 %v1925_v33, %v1911_v12  ;;  %v1860_v7 = vadd.f32 %v1811_v25, %v1728_v36  ;;  %v1733_v47 = vadd.f32 %v2418_v35, %v1585_v19  ;;  %v3437_v25 = vld [vmem:[#allocation17_spill] sm:$0xff]  ;;  %v3441_v19 = vld [vmem:[#allocation20_spill] sm:$0xff] }
 0x17a   : > { %1878 = vst [vmem:[%s3304_s30 + $0x38] sm:$0xff] %v1862_v58  ;;  %v1692_v15 = vpop.f32.mrf.mxu1  ;;  %v1827_v49 = vpop.f32.mrf.mxu0  ;;  %v1584_v56 = vadd.f32 %v3437_v25, %v1458_v28  ;;  %v1915_v42 = vmul.f32 %v1862_v58, %v1862_v58  ;;  %v1330_v5 = vadd.f32 %v3439_v32, %v1182_v39  ;;  %v1587_v63 = vadd.f32 %v3441_v19, %v1461_v60 }
 0x17b   : > { %v1927_v50 = vadd.f32 %v1926_v26, %v1912_v9  ;;  %1876 = vst [vmem:[%s3304_s30 + $0x28] sm:$0xff] %v1860_v7  ;;  %v1891_v20 = vadd.f32 %v1890_v14, %v1860_v7  ;;  %v1913_v62 = vmul.f32 %v1860_v7, %v1860_v7  ;;  %v1865_v3 = vadd.f32 %v2436_v51, %v1733_v47 }
 0x17c   : > { %v1731_v0 = vadd.f32 %v1692_v15, %v1583_v44  ;;  %v2419_v31 = vpop.f32.mrf.mxu1  ;;  %v2440_v24 = vpop.f32.mrf.mxu0  ;;  %v1462_v33 = vadd.f32 %v3292_v54, %v1330_v5 }
 0x17d   : > { %v1892_v13 = vadd.f32 %v1891_v20, %v1861_v21  ;;  %v1928_v4 = vadd.f32 %v1927_v50, %v1913_v62  ;;  %1881 = vst [vmem:[%s3304_s30 + $0x50] sm:$0xff] %v1865_v3  ;;  %v1734_v27 = vadd.f32 %v2419_v31, %v1586_v55  ;;  %v1589_v21 = vadd.f32 %v3440_v18, %v1463_v53 }
 0x17e   : > { %v1863_v48 = vadd.f32 %v1824_v34, %v1731_v0  ;;  %v1695_v51 = vpop.f32.mrf.mxu1  ;;  %v1840_v29 = vpop.f32.mrf.mxu0  ;;  %v3442_v34 = vld [vmem:[#allocation22_spill] sm:$0xff]  ;;  %v1588_v54 = vadd.f32 %v3443_v16, %v1462_v33 }
 0x17f   : > { %v1929_v2 = vadd.f32 %v1928_v4, %v1914_v10  ;;  %v1893_v22 = vadd.f32 %v1892_v13, %v1862_v58  ;;  %v1866_v6 = vadd.f32 %v2437_v23, %v1734_v27  ;;  %v1732_v37 = vadd.f32 %v1695_v51, %v1584_v56 }
 0x180   : > { %1879 = vst [vmem:[%s3304_s30 + $0x40] sm:$0xff] %v1863_v48  ;;  %v2422_v61 = vpop.f32.mrf.mxu1  ;;  %v1916_v11 = vmul.f32 %v1863_v48, %v1863_v48  ;;  %v1590_v12 = vadd.f32 %v3442_v34, %v1464_v41  ;;  %v1918_v58 = vmul.f32 %v1865_v3, %v1865_v3  ;;  %v2441_v59 = vpop.f32.mrf.mxu0 }
 0x181   : > { %v1894_v30 = vadd.f32 %v1893_v22, %v1863_v48  ;;  %v1930_v8 = vadd.f32 %v1929_v2, %v1915_v42  ;;  %1882 = vst [vmem:[%s3304_s30 + $0x58] sm:$0xff] %v1866_v6  ;;  %v1864_v57 = vadd.f32 %v1827_v49, %v1732_v37  ;;  %v1737_v38 = vadd.f32 %v2422_v61, %v1589_v21 }
 0x182   : > { %v1708_v36 = vpop.f32.mrf.mxu1  ;;  %v1919_v52 = vmul.f32 %v1866_v6, %v1866_v6  ;;  %v1843_v50 = vpop.f32.mrf.mxu0 }
 0x183   : > { %v1931_v43 = vadd.f32 %v1930_v8, %v1916_v11  ;;  %1880 = vst [vmem:[%s3304_s30 + $0x48] sm:$0xff] %v1864_v57  ;;  %v1895_v45 = vadd.f32 %v1894_v30, %v1864_v57  ;;  %v1917_v28 = vmul.f32 %v1864_v57, %v1864_v57  ;;  %v1735_v9 = vadd.f32 %v1708_v36, %v1587_v63 }
 0x184   : > { %v1869_v35 = vadd.f32 %v2440_v24, %v1737_v38  ;;  %v2423_v23 = vpop.f32.mrf.mxu1 }
 0x185   : > { %v1896_v14 = vadd.f32 %v1895_v45, %v1865_v3  ;;  %v1932_v26 = vadd.f32 %v1931_v43, %v1917_v28  ;;  %v1867_v7 = vadd.f32 %v1840_v29, %v1735_v9  ;;  %v1738_v47 = vadd.f32 %v2423_v23, %v1590_v12 }
 0x186   : > { %1885 = vst [vmem:[%s3304_s30 + $0x70] sm:$0xff] %v1869_v35  ;;  %v1711_v40 = vpop.f32.mrf.mxu1  ;;  %v1922_v56 = vmul.f32 %v1869_v35, %v1869_v35 }
 0x187   : > { %v1933_v39 = vadd.f32 %v1932_v26, %v1918_v58  ;;  %1883 = vst [vmem:[%s3304_s30 + $0x60] sm:$0xff] %v1867_v7  ;;  %v1897_v17 = vadd.f32 %v1896_v14, %v1866_v6  ;;  %v1870_v44 = vadd.f32 %v2441_v59, %v1738_v47  ;;  %v1736_v46 = vadd.f32 %v1711_v40, %v1588_v54 }
 0x188   : > { %v1920_v15 = vmul.f32 %v1867_v7, %v1867_v7 }
 0x189   : > { %v1898_v55 = vadd.f32 %v1897_v17, %v1867_v7  ;;  %v1934_v49 = vadd.f32 %v1933_v39, %v1919_v52  ;;  %1886 = vst [vmem:[%s3304_s30 + $0x78] sm:$0xff] %v1870_v44  ;;  %v1868_v20 = vadd.f32 %v1843_v50, %v1736_v46  ;;  %v1923_v60 = vmul.f32 %v1870_v44, %v1870_v44 }
 0x18b   : > { %v1935_v62 = vadd.f32 %v1934_v49, %v1920_v15  ;;  %1884 = vst [vmem:[%s3304_s30 + $0x68] sm:$0xff] %v1868_v20  ;;  %v1899_v3 = vadd.f32 %v1898_v55, %v1868_v20  ;;  %v1921_v25 = vmul.f32 %v1868_v20, %v1868_v20 }
 0x18d   : > { %v1900_v1 = vadd.f32 %v1899_v3, %v1869_v35  ;;  %v1936_v53 = vadd.f32 %v1935_v62, %v1921_v25 }
 0x18f   : > { %v1901_v0 = vadd.f32 %v1900_v1, %v1870_v44  ;;  %v1937_v31 = vadd.f32 %v1936_v53, %v1922_v56 }
 0x191   : > { %v1902_v10 = vrot.slane %v1901_v0, 4  ;;  %v1938_v13 = vadd.f32 %v1937_v31, %v1923_v60 }
 0x193   : > { %v1903_v4 = vadd.f32 %v1902_v10, %v1901_v0  ;;  %v1939_v27 = vrot.slane %v1938_v13, 4 }
 0x195   : > { %v1904_v24 = vrot.slane %v1903_v4, 2  ;;  %v1940_v41 = vadd.f32 %v1939_v27, %v1938_v13 }
 0x197   : > { %v1905_v42 = vadd.f32 %v1904_v24, %v1903_v4  ;;  %v1941_v48 = vrot.slane %v1940_v41, 2 }
 0x199   : > { %v1906_v51 = vrot.slane %v1905_v42, 1  ;;  %v1942_v2 = vadd.f32 %v1941_v48, %v1940_v41 }
 0x19b   : > { %v1943_v22 = vrot.slane %v1942_v2, 1  ;;  %v1907_v6 = vadd.f32 %v1906_v51, %v1905_v42 }
 0x19d   : > { %v1944_v37 = vadd.f32 %v1943_v22, %v1942_v2 }
 0x19f   : > { %v1946_v32 = vsel %vm1945_vm8, %v1907_v6, %v1944_v37 }
 0x1a0   : > { %1947 = vst [vmem:[%s280_s10] sm:$0x3] %v1946_v32 }
 0x1a1 PF: > { %s16_s22 = sadd.s32 1, %s2543_s22   ;;  %s3444_s18 = smov %s2535_s20 }
 0x1a2   : > { %p13_p7 = scmp.ge.s32.totalorder %s16_s22, 6   ;;  %s3445_s19 = smov %s2539_s21 }
 0x1a3   : > { %s3446_s20 = smov %s3449_s2  ;;  %s3447_s21 = smov %s3453_s3 }
 0x1a4   :  { %15 = sbr.rel (!%p13_p7) target bundleno = 3 (0x3), region = 86 }

// kernel: double_conv.4
= control target key start
LH: loop header
LB: loop body
LE: loop exit
PB: predicated region body
PF: predicated region fallthrough
CT: control target
= control target key end

     0   :  { %s3426_s18 = smov 0   ;;  %s3428_s19 = smov 0   ;;  %s4352_s0 = inlined_call_operand.vmem [shape: f32[4,10,18,128], index: 0, kind: input, shape index: {}]   ;;  %s4353_s1 = inlined_call_operand.vmem [shape: bf16[9,128,128], index: 1, kind: input, shape index: {}]   ;;  %s4354_s2 = inlined_call_operand.vmem [shape: f32[1,128], index: 2, kind: input, shape index: {}]   ;;  %s4355_s3 = inlined_call_operand.vmem [shape: f32[1,128], index: 3, kind: input, shape index: {}]   ;;  %s4356_s4 = inlined_call_operand.vmem [shape: f32[512,128], index: 4, kind: output, shape index: {0}]   ;;  %s4357_s5 = inlined_call_operand.vmem [shape: f32[4,2,128], index: 5, kind: output, shape index: {1}]  }
   0x1   :  { %s3430_s20 = smov 0   ;;  %s3432_s21 = smov 0  }
   0x2   :  { %s3434_s22 = smov 0  }
   0x3 LB: > { %s25_s23 = sadd.s32 1, %s3385_s20  ;;  %s28_s24 = sadd.s32 1, %s3389_s21  ;;  %s3393_s22 = sphi %s3434_s22, %s16_s22   ;;  %s3389_s21 = sphi %s3432_s21, %s4381_s21   ;;  %s3385_s20 = sphi %s3430_s20, %s4380_s20   ;;  %s3381_s19 = sphi %s3428_s19, %s4379_s19   ;;  %s3377_s18 = sphi %s3426_s18, %s4378_s18  }
   0x4   : > { %p26_p0 = scmp.ge.s32.totalorder %s25_s23, 2  ;;  %p2481_p1 = scmp.ge.s32.totalorder %s3393_s22, 1 }
   0x5   : > { %p218_p2 = scmp.lt.s32.totalorder %s3393_s22, 5 }
   0x6   : > { %s4383_s23 = smov (%p26_p0, %s25_s23), 0  ;;  %s4385_s24 = smov (!%p26_p0, %s28_s24), %s3389_s21 }
   0x7   : > { %p219_p3 = pnand %p2481_p1, %p218_p2  ;;  %p30_p4 = scmp.ge.s32.totalorder %s4385_s24, 2 }
   0x9   : > { %s4387_s24 = smov (%p30_p4, %s4385_s24), 0  ;;  %222 = sbr.rel (%p219_p3) target bundleno = 429 (0x1ad), region = 36 }
   0xe   : > { %v3281_v0 = vld [vmem:[%s4353_s1 + $0x78] sm:$0xff]   ;;  %s2482_s27 = sshll.u32 %s3381_s19, 1  ;;  %v3283_v2 = vld [vmem:[%s4353_s1 + $0x70] sm:$0xff]   ;;  %v3285_v4 = vld [vmem:[%s4353_s1 + $0x68] sm:$0xff]   ;;  %v418_v5 = vlaneseq  ;;  %p431_p6 = scmp.eq.s32.totalorder %s3377_s18, 0  ;;  %vm3395_vm10 = vmmov 1  }
   0xf   : > { %v3282_v1 = vld [vmem:[%s4353_s1 + $0x38] sm:$0xff]   ;;  %s3465_s30 = sadd.s32 %s3377_s18, %s2482_s27  ;;  %2935 = vmatprep.subr.bf16.mxu0 %v3281_v0  ;;  %v3284_v3 = vld [vmem:[%s4353_s1 + $0x30] sm:$0xff]   ;;  %v3286_v6 = vld [vmem:[%s4353_s1 + $0x28] sm:$0xff]   ;;  %vm538_vm5 = vsmask.f32 7424  ;;  %vm966_vm12 = vcmask 1046528  }
  0x10   : > { %p258_p5 = scmp.lt.s32.totalorder %s3465_s30, 3  ;;  %2967 = vmatprep.subr.bf16.mxu1 %v3282_v1  ;;  %2936 = vmatpush3.bf16.msra.mxu0 %v3281_v0  ;;  %v3287_v7 = vld [vmem:[%s4353_s1 + $0x60] sm:$0xff]   ;;  %v3486_v8 = vshrl.u32 %v418_v5, 7  ;;  %v3289_v10 = vld [vmem:[%s4353_s1 + $0x58] sm:$0xff]   ;;  %v3291_v13 = vld [vmem:[%s4353_s1 + $0x50] sm:$0xff]   ;;  %p441_p7 = scmp.eq.s32.totalorder %s3377_s18, 1 }
  0x11   : > { %2968 = vmatpush3.bf16.msra.mxu1 %v3282_v1  ;;  %2937 = vmatprep.subr.bf16.mxu0 %v3283_v2  ;;  %v3288_v9 = vld [vmem:[%s4353_s1 + $0x20] sm:$0xff]   ;;  %v3290_v11 = vld [vmem:[%s4353_s1 + $0x18] sm:$0xff]   ;;  %s432_s11 = scalar_select %p431_p6, 1, 0  ;;  %v3292_v17 = vld [vmem:[%s4353_s1 + $0x10] sm:$0xff]  }
  0x12   : > { %2969 = vmatprep.subr.bf16.mxu1 %v3284_v3  ;;  %s3481_s14 = scalar_select %p258_p5, %s3465_s30, 3  ;;  %v3505_v12 = vadd.s32 16, %v3486_v8  ;;  %vm422_vm0 = vcmp.eq.s32.totalorder %v3486_v8, 0  ;;  %v3520_v18 = vld [vmem:[%s4354_s2] ss:$0 sm:$0xff]  ;;  %v3293_v26 = vld [vmem:[%s4353_s1 + $0x48] sm:$0xff]  }
  0x13   : > { %v3525_v19 = vld [vmem:[%s4355_s3] ss:$0 sm:$0xff]  ;;  %v433_v23 = vstv %s432_s11  ;;  %v3294_v35 = vld [vmem:[%s4353_s1 + $0x8] sm:$0xff]   ;;  %v3297_v61 = vld [vmem:[%s4353_s1 + $0xb8] sm:$0xff]   ;;  %s442_s18 = scalar_select %p441_p7, 1, 0 }
  0x14   : > { %2938 = vmatpush3.bf16.msra.mxu0 %v3283_v2  ;;  %s3239_s25 = smul.u32 240, %s3481_s14  ;;  %vm427_vm1 = vcmp.eq.s32.totalorder %v3505_v12, 17  ;;  %vm3536_vm2 = vcmp.eq.s32.totalorder %v433_v23, 1  ;;  %v3295_v40 = vld [vmem:[%s4353_s1 + $0x40] sm:$0xff]   ;;  %vm2528_vm9 = vmneg %vm422_vm0  ;;  %v3300_v36 = vld [vmem:[%s4353_s1 + $0xf0] sm:$0xff]   ;;  %s2485_s12 = sshll.u32 %s3465_s30, 4 }
  0x15   : > { %2970 = vmatpush3.bf16.msra.mxu1 %v3284_v3  ;;  %2939 = vmatprep.subr.bf16.mxu0 %v3285_v4  ;;  %vm3550_vm3 = vmor %vm422_vm0, %vm3536_vm2  ;;  %v3296_v47 = vld [vmem:[%s4353_s1] sm:$0xff]   ;;  %p268_p8 = scmp.lt.s32.totalorder %s2485_s12, 63  ;;  %s2488_s16 = sshll.u32 %s3481_s14, 1 }
  0x16   : > { %2971 = vmatprep.subr.bf16.mxu1 %v3286_v6  ;;  %s3502_s8 = scalar_lea.vmem %s4352_s0, %s3239_s25  ;;  %vm3561_vm4 = vmor %vm427_vm1, %vm3536_vm2  ;;  %s280_s25 = scalar_lea.vmem %s4357_s5, %s2488_s16 }
  0x17   : > { %v284_v14 = vld [vmem:[%s3502_s8] sm:$0xff]  ;;  %v285_v15 = vld [vmem:[%s3502_s8 + $0x8] sm:$0xff]  ;;  %v286_v16 = vld [vmem:[%s3502_s8 + $0x10] sm:$0x3]  ;;  %s4389_s12 = smov (!%p268_p8, %s2485_s12), 63 }
  0x18   : > { %2940 = vmatpush3.bf16.msra.mxu0 %v3285_v4  ;;  %v321_v20 = vmul.f32 %v3520_v18, %v284_v14  ;;  %v322_v21 = vmul.f32 %v3520_v18, %v285_v15  ;;  %v323_v22 = vmul.f32 %v3520_v18, %v286_v16  ;;  %v287_v24 = vld [vmem:[%s3502_s8 + $0x18] sm:$0xff]  ;;  %v288_v25 = vld [vmem:[%s3502_s8 + $0x20] sm:$0xff]  ;;  %v289_v28 = vld [vmem:[%s3502_s8 + $0x28] sm:$0x3]  ;;  %s2486_s30 = sshll.u32 %s4389_s12, 3 }
  0x19   : > { %2972 = vmatpush3.bf16.msra.mxu1 %v3286_v6  ;;  %2941 = vmatprep.subr.bf16.mxu0 %v3287_v7  ;;  %v324_v29 = vmul.f32 %v3520_v18, %v287_v24  ;;  %v325_v30 = vmul.f32 %v3520_v18, %v288_v25  ;;  %v326_v37 = vmul.f32 %v3520_v18, %v289_v28  ;;  %vm2523_vm6 = vmneg %vm3536_vm2  ;;  %v290_v56 = vld [vmem:[%s3502_s8 + $0x30] sm:$0xff]  ;;  %v291_v57 = vld [vmem:[%s3502_s8 + $0x38] sm:$0xff]  ;;  %s4246_s15 = scalar_lea.vmem %s4356_s4, %s2486_s30 }
  0x1a   : > { %2973 = vmatprep.subr.bf16.mxu1 %v3288_v9  ;;  %v358_v31 = vadd.f32 %v3525_v19, %v321_v20  ;;  %v359_v32 = vadd.f32 %v3525_v19, %v322_v21  ;;  %v360_v33 = vadd.f32 %v3525_v19, %v323_v22  ;;  %vm2524_vm7 = vmneg %vm3550_vm3  ;;  %v292_v58 = vld [vmem:[%s3502_s8 + $0x40] sm:$0x3]  ;;  %v327_v62 = vmul.f32 %v3520_v18, %v290_v56  ;;  %v293_v0 = vld [vmem:[%s3502_s8 + $0x48] sm:$0xff] }
  0x1b   : > { %v361_v38 = vadd.f32 %v3525_v19, %v324_v29  ;;  %v362_v39 = vadd.f32 %v3525_v19, %v325_v30  ;;  %v363_v44 = vadd.f32 %v3525_v19, %v326_v37  ;;  %vm2525_vm8 = vmpackc.low %vm2523_vm6, %vm2524_vm7  ;;  %v328_v63 = vmul.f32 %v3520_v18, %v291_v57  ;;  %v294_v1 = vld [vmem:[%s3502_s8 + $0x50] sm:$0xff]  ;;  %v3298_v6 = vld [vmem:[%s4353_s1 + $0xf8] sm:$0xff]  }
  0x1c   : > { %2942 = vmatpush3.bf16.msra.mxu0 %v3287_v7  ;;  %v388_v41 = vmax.f32 %v358_v31, 0.0  ;;  %v389_v42 = vmax.f32 %v359_v32, 0.0  ;;  %v390_v43 = vmax.f32 %v360_v33, 0.0  ;;  %v364_v16 = vadd.f32 %v3525_v19, %v327_v62  ;;  %vm3627_vm11 = vmpackc.low %vm3395_vm10, %vm2528_vm9  ;;  %v296_v33 = vld [vmem:[%s3502_s8 + $0x60] sm:$0xff]  ;;  %v3302_v62 = vld [vmem:[%s4353_s1 + $0xe8] sm:$0xff]  }
  0x1d   : > { %2974 = vmatpush3.bf16.msra.mxu1 %v3288_v9  ;;  %2943 = vmatprep.subr.bf16.mxu0 %v3289_v10  ;;  %v391_v45 = vmax.f32 %v361_v38, 0.0  ;;  %v392_v46 = vmax.f32 %v362_v39, 0.0  ;;  %v393_v54 = vmax.f32 %v363_v44, 0.0  ;;  %v330_v23 = vmul.f32 %v3520_v18, %v293_v0 }
  0x1e   : > { %2975 = vmatprep.subr.bf16.mxu1 %v3290_v11  ;;  %v472_v48 = vsel %vm3550_vm3, 0.0, %v388_v41  ;;  %v473_v49 = vsel %vm3536_vm2, 0.0, %v389_v42  ;;  %v474_v50 = vsel %vm3561_vm4, 0.0, %v390_v43  ;;  %v2526_v51 = vpack.c.bf16 %v389_v42, %v388_v41 }
  0x1f   : > { %v3585_v52 = vpack.c.bf16 %v473_v49, %v472_v48  ;;  %v3587_v53 = vpack.c.bf16 %v474_v50, %v474_v50  ;;  %v475_v55 = vsel %vm422_vm0, 0.0, %v391_v45  ;;  %v3596_v60 = vpack.c.bf16 %v392_v46, %v391_v45  ;;  %v298_v45 = vld [vmem:[%s3502_s8 + $0x70] sm:$0x3] }
  0x20   : > { %2944 = vmatpush3.bf16.msra.mxu0 %v3289_v10  ;;  %2983 = vmatprep.mubr.msk.bf16.mxu1 %vm2525_vm8, %v2526_v51  ;;  %v3594_v59 = vpack.c.bf16 %v392_v46, %v475_v55  ;;  %v477_v5 = vsel %vm427_vm1, 0.0, %v393_v54  ;;  %v394_v25 = vmax.f32 %v364_v16, 0.0  ;;  %v331_v27 = vmul.f32 %v3520_v18, %v294_v1  ;;  %v3301_v55 = vld [vmem:[%s4353_s1 + $0xa8] sm:$0xff]  }
  0x21   : > { %2976 = vmatpush3.bf16.msra.mxu1 %v3290_v11  ;;  %2945 = vmatprep.subr.bf16.mxu0 %v3291_v13  ;;  %v540_v2 = vshrl.u32 %v3585_v52, 16  ;;  %v542_v3 = vshll.u32 %v3585_v52, 16  ;;  %v547_v4 = vshll.u32 %v3587_v53, 16  ;;  %v3613_v7 = vpack.c.bf16 %v477_v5, %v477_v5 }
  0x22   : > { %2977 = vmatprep.subr.bf16.mxu1 %v3292_v17  ;;  %v552_v9 = vshrl.u32 %v3594_v59, 16  ;;  %v554_v10 = vshll.u32 %v3594_v59, 16  ;;  %v329_v11 = vmul.f32 %v3520_v18, %v292_v58  ;;  %v478_v37 = vsel %vm422_vm0, 0.0, %v394_v25 }
  0x23   : > { %v544_v14 = vrot.slane %v542_v3, 1  ;;  %v549_v15 = vrot.slane %v547_v4, 1  ;;  %v559_v21 = vshll.u32 %v3613_v7, 16  ;;  %v367_v39 = vadd.f32 %v3525_v19, %v330_v23  ;;  %v299_v4 = vld [vmem:[%s3502_s8 + $0x78] sm:$0xff] }
  0x24   : > { %2946 = vmatpush3.bf16.msra.mxu0 %v3291_v13  ;;  %v295_v13 = vld [vmem:[%s3502_s8 + $0x58] sm:$0x3]  ;;  %v556_v20 = vrot.slane %v554_v10, 1  ;;  %v366_v22 = vadd.f32 %v3525_v19, %v329_v11  ;;  %v368_v44 = vadd.f32 %v3525_v19, %v331_v27  ;;  %v333_v49 = vmul.f32 %v3520_v18, %v296_v33  ;;  %v300_v11 = vld [vmem:[%s3502_s8 + $0x80] sm:$0xff] }
  0x25   : > { %2978 = vmatpush3.bf16.msra.mxu1 %v3292_v17  ;;  %2947 = vmatprep.subr.bf16.mxu0 %v3293_v26  ;;  %v365_v17 = vadd.f32 %v3525_v19, %v328_v63  ;;  %v545_v24 = vor.u32 %v544_v14, %v540_v2  ;;  %v561_v30 = vrot.slane %v559_v21, 1  ;;  %v332_v32 = vmul.f32 %v3520_v18, %v295_v13  ;;  %v3304_v21 = vld [vmem:[%s4353_s1 + $0xe0] sm:$0xff]  }
  0x26   : > { %2979 = vmatprep.subr.bf16.mxu1 %v3294_v35  ;;  %v557_v29 = vor.u32 %v556_v20, %v552_v9  ;;  %v396_v31 = vmax.f32 %v366_v22, 0.0  ;;  %v397_v48 = vmax.f32 %v367_v39, 0.0  ;;  %v398_v54 = vmax.f32 %v368_v44, 0.0  ;;  %v3303_v20 = vld [vmem:[%s4353_s1 + $0xa0] sm:$0xff]  }
  0x27   : > { %v550_v34 = vsel %vm538_vm5, %v545_v24, %v549_v15  ;;  %v335_v63 = vmul.f32 %v3520_v18, %v298_v45  ;;  %v370_v3 = vadd.f32 %v3525_v19, %v333_v49  ;;  %v303_v45 = vld [vmem:[%s3502_s8 + $0x98] sm:$0xff]  ;;  %vm2357_vm3 = vcmask 1040384  }
  0x28   : > { %2948 = vmatpush3.bf16.msra.mxu0 %v3293_v26  ;;  %v395_v26 = vmax.f32 %v365_v17, 0.0  ;;  %2951 = vmatprep.mubr.bf16.mxu0 %v550_v34  ;;  %v3647_v41 = vsel %vm538_vm5, %v557_v29, %v561_v30  ;;  %v480_v42 = vsel %vm427_vm1, 0.0, %v396_v31  ;;  %v3681_v2 = vpack.c.bf16 %v398_v54, %v397_v48  ;;  %v301_v17 = vld [vmem:[%s3502_s8 + $0x88] sm:$0x3]  ;;  %v302_v31 = vld [vmem:[%s3502_s8 + $0x90] sm:$0xff] }
  0x29   : > { %2980 = vmatpush3.bf16.msra.mxu1 %v3294_v35  ;;  %2949 = vmatprep.subr.bf16.mxu0 %v3295_v40  ;;  %v3299_v35 = vld [vmem:[%s4353_s1 + $0xb0] sm:$0xff]   ;;  %v3659_v46 = vpack.c.bf16 %v480_v42, %v480_v42  ;;  %v372_v10 = vadd.f32 %v3525_v19, %v335_v63  ;;  %v400_v22 = vmax.f32 %v370_v3, 0.0  ;;  %v337_v30 = vmul.f32 %v3520_v18, %v300_v11 }
  0x2a   : > { %2981 = vmatprep.subr.bf16.mxu1 %v3296_v47  ;;  %v3642_v38 = vpack.c.bf16 %v395_v26, %v394_v25  ;;  %v3651_v43 = vpack.c.bf16 %v395_v26, %v478_v37  ;;  %v336_v25 = vmul.f32 %v3520_v18, %v299_v4  ;;  %v3306_v37 = vld [vmem:[%s4353_s1 + $0xd8] sm:$0xff]   ;;  %v3307_v63 = vld [vmem:[%s4353_s1 + $0x90] sm:$0xff]  }
  0x2b   : > { %v571_v57 = vshll.u32 %v3659_v46, 16  ;;  %v402_v24 = vmax.f32 %v372_v10, 0.0  ;;  %v306_v3 = vld [vmem:[%s3502_s8 + $0xb0] sm:$0xff] }
  0x2c   : > { %2950 = vmatpush3.bf16.msra.mxu0 %v3295_v40  ;;  %v297_v40 = vld [vmem:[%s3502_s8 + $0x68] sm:$0xff]  ;;  %v564_v50 = vshrl.u32 %v3651_v43, 16  ;;  %v566_v51 = vshll.u32 %v3651_v43, 16 }
  0x2d   : > { %2982 = vmatpush3.bf16.msra.mxu1 %v3296_v47  ;;  %2999 = vmatprep.subr.bf16.mxu0 %v3297_v61  ;;  %v369_v47 = vadd.f32 %v3525_v19, %v332_v32  ;;  %v334_v56 = vmul.f32 %v3520_v18, %v297_v40  ;;  %v573_v5 = vrot.slane %v571_v57, 1  ;;  %v484_v32 = vsel %vm422_vm0, 0.0, %v400_v22  ;;  %v305_v57 = vld [vmem:[%s3502_s8 + $0xa8] sm:$0xff] }
  0x2e   : > { %3031 = vmatprep.subr.bf16.mxu1 %v3298_v6  ;;  %v568_v0 = vrot.slane %v566_v51, 1  ;;  %v486_v33 = vsel %vm427_vm1, 0.0, %v402_v24 }
  0x2f   : > { %2952 = vmatmul.mubr.bf16.vlgmr.msra.gmra.mxu0 %v3647_v41  ;;  %v399_v58 = vmax.f32 %v369_v47, 0.0  ;;  %v371_v9 = vadd.f32 %v3525_v19, %v334_v56  ;;  %v3727_v44 = vpack.c.bf16 %v486_v33, %v486_v33  ;;  %v373_v47 = vadd.f32 %v3525_v19, %v336_v25 }
  0x30   : > { %2984 = vmatmul.mubr.msk.bf16.vlgmr.msra.gmra.mxu1 %vm3627_vm11, %v3596_v60  ;;  %3000 = vmatpush3.bf16.msra.mxu0 %v3297_v61  ;;  %v481_v61 = vsel %vm422_vm0, 0.0, %v397_v48  ;;  %v569_v13 = vor.u32 %v568_v0, %v564_v50  ;;  %v374_v48 = vadd.f32 %v3525_v19, %v337_v30  ;;  %v304_v50 = vld [vmem:[%s3502_s8 + $0xa0] sm:$0x3]  ;;  %v339_v0 = vmul.f32 %v3520_v18, %v302_v31 }
  0x31   : > { %3032 = vmatpush3.bf16.msra.mxu1 %v3298_v6  ;;  %3001 = vmatprep.subr.bf16.mxu0 %v3299_v35  ;;  %v3679_v1 = vpack.c.bf16 %v398_v54, %v481_v61  ;;  %v483_v6 = vsel %vm427_vm1, 0.0, %v399_v58  ;;  %v401_v23 = vmax.f32 %v371_v9, 0.0  ;;  %v595_v56 = vshll.u32 %v3727_v44, 16 }
  0x32   : > { %3033 = vmatprep.subr.bf16.mxu1 %v3300_v36  ;;  %2987 = vmatprep.mubr.msk.bf16.mxu1 %vm3627_vm11, %v3642_v38  ;;  %v3690_v14 = vpack.c.bf16 %v483_v6, %v483_v6  ;;  %v3703_v26 = vsel %vm538_vm5, %v569_v13, %v573_v5  ;;  %v403_v58 = vmax.f32 %v373_v47, 0.0  ;;  %v404_v61 = vmax.f32 %v374_v48, 0.0  ;;  %v3308_v6 = vld [vmem:[%s4353_s1 + $0xd0] sm:$0xff]   ;;  %v3310_v48 = vld [vmem:[%s4353_s1 + $0xc8] sm:$0xff]  }
  0x33   : > { %v576_v15 = vshrl.u32 %v3679_v1, 16  ;;  %v578_v16 = vshll.u32 %v3679_v1, 16  ;;  %2955 = vmatprep.mubr.bf16.mxu0 %v3703_v26  ;;  %v3716_v34 = vpack.c.bf16 %v401_v23, %v400_v22  ;;  %v3725_v42 = vpack.c.bf16 %v401_v23, %v484_v32  ;;  %v307_v23 = vld [vmem:[%s3502_s8 + $0xb8] sm:$0x3] }
  0x34   : > { %3002 = vmatpush3.bf16.msra.mxu0 %v3299_v35  ;;  %v583_v29 = vshll.u32 %v3690_v14, 16  ;;  %v338_v35 = vmul.f32 %v3520_v18, %v301_v17  ;;  %v597_v5 = vrot.slane %v595_v56, 1  ;;  %v340_v9 = vmul.f32 %v3520_v18, %v303_v45 }
  0x35   : > { %3034 = vmatpush3.bf16.msra.mxu1 %v3300_v36  ;;  %3003 = vmatprep.subr.bf16.mxu0 %v3301_v55  ;;  %v580_v27 = vrot.slane %v578_v16, 1  ;;  %v3305_v36 = vld [vmem:[%s4353_s1 + $0x98] sm:$0xff]   ;;  %v588_v54 = vshrl.u32 %v3725_v42, 16  ;;  %v341_v10 = vmul.f32 %v3520_v18, %v304_v50  ;;  %v487_v11 = vsel %vm422_vm0, 0.0, %v403_v58 }
  0x36   : > { %3035 = vmatprep.subr.bf16.mxu1 %v3302_v62  ;;  %v585_v40 = vrot.slane %v583_v29, 1  ;;  %v375_v49 = vadd.f32 %v3525_v19, %v338_v35  ;;  %v376_v16 = vadd.f32 %v3525_v19, %v339_v0  ;;  %v377_v22 = vadd.f32 %v3525_v19, %v340_v9  ;;  %v3309_v35 = vld [vmem:[%s4353_s1 + $0x88] sm:$0xff]  }
  0x37   : > { %v581_v39 = vor.u32 %v580_v27, %v576_v15  ;;  %v3759_v15 = vpack.c.bf16 %v404_v61, %v403_v58  ;;  %v378_v24 = vadd.f32 %v3525_v19, %v341_v10  ;;  %v342_v27 = vmul.f32 %v3520_v18, %v305_v57 }
  0x38   : > { %2988 = vmatmul.mubr.msk.bf16.gmra.mxu1 %vm3627_vm11, %v3681_v2  ;;  %3004 = vmatpush3.bf16.msra.mxu0 %v3301_v55  ;;  %v590_v55 = vshll.u32 %v3725_v42, 16  ;;  %v406_v25 = vmax.f32 %v376_v16, 0.0  ;;  %v343_v29 = vmul.f32 %v3520_v18, %v306_v3  ;;  %v344_v47 = vmul.f32 %v3520_v18, %v307_v23  ;;  %v3311_v3 = vld [vmem:[%s4353_s1 + $0x80] sm:$0xff]  }
  0x39   : > { %3036 = vmatpush3.bf16.msra.mxu1 %v3302_v62  ;;  %3005 = vmatprep.subr.bf16.mxu0 %v3303_v20  ;;  %v3735_v51 = vsel %vm538_vm5, %v581_v39, %v585_v40  ;;  %v405_v62 = vmax.f32 %v375_v49, 0.0  ;;  %v407_v39 = vmax.f32 %v377_v22, 0.0  ;;  %v408_v40 = vmax.f32 %v378_v24, 0.0 }
  0x3a   : > { %3037 = vmatprep.subr.bf16.mxu1 %v3304_v21  ;;  %2991 = vmatprep.mubr.msk.bf16.mxu1 %vm3627_vm11, %v3716_v34  ;;  %v592_v4 = vrot.slane %v590_v55, 1  ;;  %v490_v45 = vsel %vm422_vm0, 0.0, %v406_v25  ;;  %v379_v49 = vadd.f32 %v3525_v19, %v342_v27  ;;  %v380_v50 = vadd.f32 %v3525_v19, %v343_v29 }
  0x3b   : > { %2956 = vmatmul.mubr.bf16.gmra.mxu0 %v3735_v51  ;;  %v489_v13 = vsel %vm427_vm1, 0.0, %v405_v62  ;;  %v3794_v55 = vpack.c.bf16 %v407_v39, %v490_v45  ;;  %v3796_v56 = vpack.c.bf16 %v407_v39, %v406_v25  ;;  %v381_v57 = vadd.f32 %v3525_v19, %v344_v47 }
  0x3c   : > { %3006 = vmatpush3.bf16.msra.mxu0 %v3303_v20  ;;  %v593_v17 = vor.u32 %v592_v4, %v588_v54  ;;  %v3762_v20 = vpack.c.bf16 %v404_v61, %v487_v11  ;;  %v492_v54 = vsel %vm427_vm1, 0.0, %v408_v40  ;;  %v409_v62 = vmax.f32 %v379_v49, 0.0 }
  0x3d   : > { %3038 = vmatpush3.bf16.msra.mxu1 %v3304_v21  ;;  %3007 = vmatprep.subr.bf16.mxu0 %v3305_v36  ;;  %v3764_v21 = vpack.c.bf16 %v489_v13, %v489_v13  ;;  %v3799_v61 = vpack.c.bf16 %v492_v54, %v492_v54  ;;  %v410_v0 = vmax.f32 %v380_v50, 0.0  ;;  %v612_v4 = vshrl.u32 %v3794_v55, 16 }
  0x3e   : > { %3039 = vmatprep.subr.bf16.mxu1 %v3306_v37  ;;  %v3775_v30 = vsel %vm538_vm5, %v593_v17, %v597_v5  ;;  %v600_v31 = vshrl.u32 %v3762_v20, 16  ;;  %v602_v32 = vshll.u32 %v3762_v20, 16  ;;  %v614_v5 = vshll.u32 %v3794_v55, 16 }
  0x3f   : > { %v607_v33 = vshll.u32 %v3764_v21, 16  ;;  %2959 = vmatprep.mubr.bf16.mxu0 %v3775_v30  ;;  %v411_v9 = vmax.f32 %v381_v57, 0.0  ;;  %v619_v10 = vshll.u32 %v3799_v61, 16  ;;  %v493_v11 = vsel %vm422_vm0, 0.0, %v409_v62  ;;  %v308_v57 = vld [vmem:[%s3502_s8 + $0xc0] sm:$0xff] }
  0x40   : > { %2992 = vmatmul.mubr.msk.bf16.gmra.mxu1 %vm3627_vm11, %v3759_v15  ;;  %3008 = vmatpush3.bf16.msra.mxu0 %v3305_v36  ;;  %v604_v36 = vrot.slane %v602_v32, 1  ;;  %v3818_v13 = vpack.c.bf16 %v410_v0, %v409_v62  ;;  %v616_v16 = vrot.slane %v614_v5, 1  ;;  %v3823_v22 = vpack.c.bf16 %v410_v0, %v493_v11  ;;  %v309_v62 = vld [vmem:[%s3502_s8 + $0xc8] sm:$0xff] }
  0x41   : > { %3040 = vmatpush3.bf16.msra.mxu1 %v3306_v37  ;;  %3009 = vmatprep.subr.bf16.mxu0 %v3307_v63  ;;  %v609_v37 = vrot.slane %v607_v33, 1  ;;  %v495_v17 = vsel %vm427_vm1, 0.0, %v411_v9  ;;  %v621_v23 = vrot.slane %v619_v10, 1  ;;  %v967_v33 = vrot.slane %v3585_v52, 1  ;;  %v3322_v10 = vld [vmem:[%s4353_s1 + $0x158] sm:$0xff]  }
  0x42   : > { %3041 = vmatprep.subr.bf16.mxu1 %v3308_v6  ;;  %v605_v58 = vor.u32 %v604_v36, %v600_v31  ;;  %2995 = vmatprep.mubr.msk.bf16.mxu1 %vm3627_vm11, %v3796_v56  ;;  %v3825_v24 = vpack.c.bf16 %v495_v17, %v495_v17  ;;  %v617_v25 = vor.u32 %v616_v16, %v612_v4  ;;  %v624_v27 = vshrl.u32 %v3823_v22, 16  ;;  %v3313_v31 = vld [vmem:[%s4353_s1 + $0x138] sm:$0xff]   ;;  %v3318_v36 = vld [vmem:[%s4353_s1 + $0x168] sm:$0xff]   ;;  %v3324_v16 = vld [vmem:[%s4353_s1 + $0x150] sm:$0xff]  }
  0x43   : > { %v626_v29 = vshll.u32 %v3823_v22, 16  ;;  %v968_v39 = vrot.slane %v3587_v53, 1  ;;  %v971_v49 = vrot.slane %v3613_v7, 1  ;;  %v973_v50 = vrot.slane %v3651_v43, 1  ;;  %v3320_v43 = vld [vmem:[%s4353_s1 + $0x160] sm:$0xff]   ;;  %v3321_v17 = vld [vmem:[%s4353_s1 + $0x118] sm:$0xff]  }
  0x44   : > { %3010 = vmatpush3.bf16.msra.mxu0 %v3307_v63  ;;  %v3312_v63 = vld [vmem:[%s4353_s1 + $0xc0] sm:$0xff]   ;;  %v631_v32 = vshll.u32 %v3825_v24, 16  ;;  %v3845_v40 = vsel %vm538_vm5, %v617_v25, %v621_v23  ;;  %v974_v54 = vrot.slane %v3659_v46, 1  ;;  %v3317_v46 = vld [vmem:[%s4353_s1 + $0x128] sm:$0xff]   ;;  %v345_v0 = vmul.f32 %v3520_v18, %v308_v57 }
  0x45   : > { %3042 = vmatpush3.bf16.msra.mxu1 %v3308_v6  ;;  %3011 = vmatprep.subr.bf16.mxu0 %v3309_v35  ;;  %v3813_v6 = vsel %vm538_vm5, %v605_v58, %v609_v37  ;;  %v628_v45 = vrot.slane %v626_v29, 1  ;;  %v969_v53 = vsel %vm966_vm12, %v967_v33, %v968_v39  ;;  %v970_v37 = vrot.slane %v3594_v59, 1  ;;  %v3315_v59 = vld [vmem:[%s4353_s1 + $0x130] sm:$0xff]   ;;  %v3326_v33 = vld [vmem:[%s4353_s1 + $0x148] sm:$0xff]   ;;  %v3328_v39 = vld [vmem:[%s4353_s1 + $0x140] sm:$0xff]  }
  0x46   : > { %3043 = vmatprep.subr.bf16.mxu1 %v3310_v48  ;;  %2960 = vmatmul.mubr.bf16.gmra.mxu0 %v3813_v6  ;;  %v633_v47 = vrot.slane %v631_v32, 1  ;;  %v3878_v7 = vsel %vm966_vm12, %v973_v50, %v974_v54  ;;  %v976_v4 = vrot.slane %v3679_v1, 1  ;;  %v977_v5 = vrot.slane %v3690_v14, 1 }
  0x47   : > { %2963 = vmatprep.mubr.bf16.mxu0 %v3845_v40  ;;  %v629_v52 = vor.u32 %v628_v45, %v624_v27  ;;  %v3871_v58 = vsel %vm966_vm12, %v970_v37, %v971_v49  ;;  %v979_v9 = vrot.slane %v3725_v42, 1  ;;  %v3904_v11 = vadd.f32 %v3525_v19, %v345_v0  ;;  %v3319_v42 = vld [vmem:[%s4353_s1 + $0x120] sm:$0xff]   ;;  %v3334_v49 = vld [vmem:[%s4353_s1 + $0x1e8] sm:$0xff]  }
  0x48   : > { %2996 = vmatmul.mubr.msk.bf16.gmra.mxu1 %vm3627_vm11, %v3818_v13  ;;  %3012 = vmatpush3.bf16.msra.mxu0 %v3309_v35  ;;  %v3314_v35 = vld [vmem:[%s4353_s1 + $0x178] sm:$0xff]   ;;  %v3910_v14 = vsel %vm966_vm12, %v976_v4, %v977_v5  ;;  %v982_v27 = vrot.slane %v3762_v20, 1  ;;  %v983_v29 = vrot.slane %v3764_v21, 1  ;;  %v986_v32 = vrot.slane %v3799_v61, 1 }
  0x49   : > { %3044 = vmatpush3.bf16.msra.mxu1 %v3310_v48  ;;  %3013 = vmatprep.subr.bf16.mxu0 %v3311_v3  ;;  %v3853_v48 = vsel %vm538_vm5, %v629_v52, %v633_v47  ;;  %v412_v23 = vmax.f32 %v3904_v11, 0.0  ;;  %v989_v45 = vrot.slane %v3825_v24, 1  ;;  %v3325_v47 = vld [vmem:[%s4353_s1 + $0x108] sm:$0xff]   ;;  %v3330_v52 = vld [vmem:[%s4353_s1 + $0x1f8] sm:$0xff]   ;;  %v310_v24 = vld [vmem:[%s3502_s8 + $0xd0] sm:$0x3] }
  0x4a   : > { %3045 = vmatprep.subr.bf16.mxu1 %v3312_v63  ;;  %3047 = vmatprep.mubr.msk.bf16.mxu1 %vm3627_vm11, %v3596_v60  ;;  %v3316_v60 = vld [vmem:[%s4353_s1 + $0x170] sm:$0xff]   ;;  %v3948_v21 = vsel %vm966_vm12, %v982_v27, %v983_v29  ;;  %v347_v37 = vmul.f32 %v3520_v18, %v310_v24  ;;  %v3337_v4 = vld [vmem:[%s4353_s1 + $0x198] sm:$0xff]   ;;  %v3353_v27 = vld [vmem:[%s4354_s2] ss:$0 sm:$0xff] }
  0x4b   : > { %v496_v54 = vsel %vm422_vm0, 0.0, %v412_v23 }
  0x4c   : > { %3014 = vmatpush3.bf16.msra.mxu0 %v3311_v3  ;;  %v346_v3 = vmul.f32 %v3520_v18, %v309_v62  ;;  %v384_v50 = vadd.f32 %v3525_v19, %v347_v37  ;;  %v3336_v18 = vld [vmem:[%s4353_s1 + $0x1e0] sm:$0xff]   ;;  %v3346_v37 = vld [vmem:[%s4353_s1 + $0x230] sm:$0xff]  }
  0x4d   : > { %3046 = vmatpush3.bf16.msra.mxu1 %v3312_v63  ;;  %3063 = vmatprep.subr.bf16.mxu0 %v3313_v31  ;;  %v980_v63 = vrot.slane %v3727_v44, 1 }
  0x4e   : > { %3095 = vmatprep.subr.bf16.mxu1 %v3314_v35  ;;  %2964 = vmatmul.mubr.bf16.gmra.mxu0 %v3853_v48  ;;  %v3907_v1 = vadd.f32 %v3525_v19, %v346_v3  ;;  %v3333_v19 = vld [vmem:[%s4353_s1 + $0x1a8] sm:$0xff]   ;;  %v414_v57 = vmax.f32 %v384_v50, 0.0 }
  0x4f   : > { %3015 = vmatprep.mubr.bf16.mxu0 %v969_v53  ;;  %v3916_v44 = vsel %vm966_vm12, %v979_v9, %v980_v63  ;;  %v3342_v63 = vld [vmem:[%s4353_s1 + $0x1c8] sm:$0xff]  }
  0x50   : > { %3048 = vmatmul.mubr.msk.bf16.vlgmr.msra.gmra.mxu1 %vm3627_vm11, %v3642_v38  ;;  %v413_v25 = vmax.f32 %v3907_v1, 0.0 }
  0x51   : > { %3096 = vmatpush3.bf16.msra.mxu1 %v3314_v35  ;;  %3051 = vmatprep.mubr.msk.bf16.mxu1 %vm3627_vm11, %v3681_v2  ;;  %v988_v35 = vrot.slane %v3823_v22, 1  ;;  %v3327_v22 = vld [vmem:[%s4353_s1 + $0x100] sm:$0xff]  }
  0x52   : > { %3097 = vmatprep.subr.bf16.mxu1 %v3316_v60  ;;  %v3945_v20 = vpack.c.bf16 %v413_v25, %v412_v23  ;;  %v518_v62 = vpack.c.bf16 %v413_v25, %v496_v54  ;;  %v3344_v25 = vld [vmem:[%s4353_s1 + $0x1c0] sm:$0xff]   ;;  %v3347_v54 = vld [vmem:[%s4353_s1 + $0x228] sm:$0xff]  }
  0x53   : > { %v3974_v53 = vsel %vm966_vm12, %v988_v35, %v989_v45  ;;  %v443_v35 = vstv %s442_s18  ;;  %v3345_v45 = vld [vmem:[%s4353_s1 + $0x238] sm:$0xff]  }
  0x54   : > { %v1358_v3 = vshll.u32 %v518_v62, 16  ;;  %v1548_v5 = vrot.slane %v518_v62, 1  ;;  %vm4072_vm13 = vcmp.eq.s32.totalorder %v443_v35, 1 }
  0x55   : > { %3098 = vmatpush3.bf16.msra.mxu1 %v3316_v60  ;;  %v3332_v60 = vld [vmem:[%s4353_s1 + $0x1f0] sm:$0xff]   ;;  %vm4088_vm14 = vmor %vm422_vm0, %vm4072_vm13 }
  0x56   : > { %3099 = vmatprep.subr.bf16.mxu1 %v3318_v36  ;;  %3016 = vmatmul.mubr.bf16.vlgmr.msra.gmra.mxu0 %v3871_v58  ;;  %v1360_v11 = vrot.slane %v1358_v3, 1  ;;  %vm453_vm15 = vmor %vm427_vm1, %vm4072_vm13 }
  0x57   : > { %3064 = vmatpush3.bf16.msra.mxu0 %v3313_v31  ;;  %3019 = vmatprep.mubr.bf16.mxu0 %v3878_v7  ;;  %v985_v31 = vrot.slane %v3794_v55, 1  ;;  %v3323_v55 = vld [vmem:[%s4353_s1 + $0x110] sm:$0xff]   ;;  %vm2736_vm0 = vmneg %vm4072_vm13 }
  0x58   : > { %3052 = vmatmul.mubr.msk.bf16.gmra.mxu1 %vm3627_vm11, %v3716_v34  ;;  %3065 = vmatprep.subr.bf16.mxu0 %v3315_v59 }
  0x59   : > { %3100 = vmatpush3.bf16.msra.mxu1 %v3318_v36  ;;  %3055 = vmatprep.mubr.msk.bf16.mxu1 %vm3627_vm11, %v3759_v15  ;;  %v3954_v61 = vsel %vm966_vm12, %v985_v31, %v986_v32  ;;  %v3329_v36 = vld [vmem:[%s4353_s1 + $0x1b8] sm:$0xff]  }
  0x5a   : > { %3101 = vmatprep.subr.bf16.mxu1 %v3320_v43 }
  0x5b   : > { %3066 = vmatpush3.bf16.msra.mxu0 %v3315_v59  ;;  %v3335_v59 = vld [vmem:[%s4353_s1 + $0x1a0] sm:$0xff]  }
  0x5c   : > { %3067 = vmatprep.subr.bf16.mxu0 %v3317_v46 }
  0x5d   : > { %3102 = vmatpush3.bf16.msra.mxu1 %v3320_v43  ;;  %v498_v43 = vsel %vm427_vm1, 0.0, %v414_v57  ;;  %vm2737_vm1 = vmneg %vm4088_vm14 }
  0x5e   : > { %3103 = vmatprep.subr.bf16.mxu1 %v3322_v10  ;;  %3020 = vmatmul.mubr.bf16.gmra.mxu0 %v3910_v14  ;;  %v519_v0 = vpack.c.bf16 %v498_v43, %v498_v43  ;;  %vm2738_vm2 = vmpackc.low %vm2736_vm0, %vm2737_vm1 }
  0x5f   : > { %3068 = vmatpush3.bf16.msra.mxu0 %v3317_v46  ;;  %3023 = vmatprep.mubr.bf16.mxu0 %v3916_v44  ;;  %v3340_v46 = vld [vmem:[%s4353_s1 + $0x1d0] sm:$0xff]  }
  0x60   : > { %3056 = vmatmul.mubr.msk.bf16.gmra.mxu1 %vm3627_vm11, %v3796_v56  ;;  %3069 = vmatprep.subr.bf16.mxu0 %v3319_v42  ;;  %v1549_v9 = vrot.slane %v519_v0, 1  ;;  %v1363_v1 = vshll.u32 %v519_v0, 16 }
  0x61   : > { %3104 = vmatpush3.bf16.msra.mxu1 %v3322_v10  ;;  %3059 = vmatprep.mubr.msk.bf16.mxu1 %vm3627_vm11, %v3818_v13  ;;  %v1356_v10 = vshrl.u32 %v518_v62, 16 }
  0x62   : > { %3105 = vmatprep.subr.bf16.mxu1 %v3324_v16  ;;  %v4042_v23 = vsel %vm966_vm12, %v1548_v5, %v1549_v9 }
  0x63   : > { %3070 = vmatpush3.bf16.msra.mxu0 %v3319_v42  ;;  %v311_v42 = vld [vmem:[%s3502_s8 + $0xd8] sm:$0xff]  ;;  %v1361_v32 = vor.u32 %v1360_v11, %v1356_v10 }
  0x64   : > { %3071 = vmatprep.subr.bf16.mxu0 %v3321_v17  ;;  %v348_v29 = vmul.f32 %v3353_v27, %v311_v42 }
  0x65   : > { %3106 = vmatpush3.bf16.msra.mxu1 %v3324_v16  ;;  %v312_v16 = vld [vmem:[%s3502_s8 + $0xe0] sm:$0xff] }
  0x66   : > { %3107 = vmatprep.subr.bf16.mxu1 %v3326_v33  ;;  %3024 = vmatmul.mubr.bf16.gmra.mxu0 %v3948_v21  ;;  %v349_v31 = vmul.f32 %v3353_v27, %v312_v16 }
  0x67   : > { %3072 = vmatpush3.bf16.msra.mxu0 %v3321_v17  ;;  %3027 = vmatprep.mubr.bf16.mxu0 %v3954_v61  ;;  %v3339_v17 = vld [vmem:[%s4353_s1 + $0x190] sm:$0xff]  }
  0x68   : > { %3060 = vmatmul.mubr.msk.bf16.gmra.mxu1 %vm3627_vm11, %v3945_v20  ;;  %3073 = vmatprep.subr.bf16.mxu0 %v3323_v55 }
  0x69   : > { %3108 = vmatpush3.bf16.msra.mxu1 %v3326_v33  ;;  %3111 = vmatprep.mubr.bf16.mxu1 %v3871_v58  ;;  %v3338_v58 = vld [vmem:[%s4353_s1 + $0x1d8] sm:$0xff]   ;;  %v1365_v33 = vrot.slane %v1363_v1, 1 }
  0x6a   : > { %3109 = vmatprep.subr.bf16.mxu1 %v3328_v39 }
  0x6b   : > { %3074 = vmatpush3.bf16.msra.mxu0 %v3323_v55  ;;  %v313_v55 = vld [vmem:[%s3502_s8 + $0xe8] sm:$0x3] }
  0x6c   : > { %3075 = vmatprep.subr.bf16.mxu0 %v3325_v47  ;;  %v350_v24 = vmul.f32 %v3353_v27, %v313_v55 }
  0x6d   : > { %3110 = vmatpush3.bf16.msra.mxu1 %v3328_v39  ;;  %v3341_v39 = vld [vmem:[%s4353_s1 + $0x188] sm:$0xff]  }
  0x6e   : > { %3159 = vmatprep.subr.bf16.mxu1 %v3330_v52  ;;  %3028 = vmatmul.mubr.bf16.gmra.mxu0 %v3974_v53 }
  0x6f   : > { %3076 = vmatpush3.bf16.msra.mxu0 %v3325_v47  ;;  %3079 = vmatprep.mubr.bf16.mxu0 %v3647_v41  ;;  %v3331_v41 = vld [vmem:[%s4353_s1 + $0x1b0] sm:$0xff]   ;;  %v3354_v47 = vld [vmem:[%s4355_s3] ss:$0 sm:$0xff] }
  0x70   : > { %3077 = vmatprep.subr.bf16.mxu0 %v3327_v22  ;;  %3112 = vmatmul.mubr.bf16.vlgmr.msra.gmra.mxu1 %v3878_v7  ;;  %v387_v50 = vadd.f32 %v3354_v47, %v350_v24 }
  0x71   : > { %3160 = vmatpush3.bf16.msra.mxu1 %v3330_v52  ;;  %3115 = vmatprep.mubr.bf16.mxu1 %v3910_v14  ;;  %v4064_v52 = vadd.f32 %v3354_v47, %v348_v29 }
  0x72   : > { %3161 = vmatprep.subr.bf16.mxu1 %v3332_v60 }
  0x73   : > { %3078 = vmatpush3.bf16.msra.mxu0 %v3327_v22  ;;  %v4066_v22 = vadd.f32 %v3354_v47, %v349_v31 }
  0x74   : > { %3127 = vmatprep.subr.bf16.mxu0 %v3329_v36 }
  0x75   : > { %3162 = vmatpush3.bf16.msra.mxu1 %v3332_v60  ;;  %v1366_v60 = vsel %vm538_vm5, %v1361_v32, %v1365_v33 }
  0x76   : > { %3080 = vmatmul.mubr.bf16.vlgmr.msra.gmra.mxu0 %v3703_v26  ;;  %3163 = vmatprep.subr.bf16.mxu1 %v3334_v49 }
  0x77   : > { %3128 = vmatpush3.bf16.msra.mxu0 %v3329_v36  ;;  %3083 = vmatprep.mubr.bf16.mxu0 %v3735_v51 }
  0x78   : > { %3129 = vmatprep.subr.bf16.mxu0 %v3331_v41  ;;  %3116 = vmatmul.mubr.bf16.gmra.mxu1 %v3916_v44 }
  0x79   : > { %3164 = vmatpush3.bf16.msra.mxu1 %v3334_v49  ;;  %3119 = vmatprep.mubr.bf16.mxu1 %v3948_v21  ;;  %v415_v49 = vmax.f32 %v4064_v52, 0.0 }
  0x7a   : > { %3165 = vmatprep.subr.bf16.mxu1 %v3336_v18 }
  0x7b   : > { %3130 = vmatpush3.bf16.msra.mxu0 %v3331_v41  ;;  %v416_v41 = vmax.f32 %v4066_v22, 0.0  ;;  %v499_v8 = vsel %vm4088_vm14, 0.0, %v415_v49 }
  0x7c   : > { %3131 = vmatprep.subr.bf16.mxu0 %v3333_v19 }
  0x7d   : > { %3166 = vmatpush3.bf16.msra.mxu1 %v3336_v18 }
  0x7e   : > { %3084 = vmatmul.mubr.bf16.gmra.mxu0 %v3775_v30  ;;  %3167 = vmatprep.subr.bf16.mxu1 %v3338_v58 }
  0x7f   : > { %3132 = vmatpush3.bf16.msra.mxu0 %v3333_v19  ;;  %3087 = vmatprep.mubr.bf16.mxu0 %v3813_v6  ;;  %v417_v19 = vmax.f32 %v387_v50, 0.0 }
  0x80   : > { %3133 = vmatprep.subr.bf16.mxu0 %v3335_v59  ;;  %3120 = vmatmul.mubr.bf16.gmra.mxu1 %v3954_v61 }
  0x81   : > { %3168 = vmatpush3.bf16.msra.mxu1 %v3338_v58  ;;  %3123 = vmatprep.mubr.bf16.mxu1 %v3974_v53  ;;  %v501_v57 = vsel %vm453_vm15, 0.0, %v417_v19  ;;  %v3349_v58 = vld [vmem:[%s4353_s1 + $0x218] sm:$0xff]  }
  0x82   : > { %3169 = vmatprep.subr.bf16.mxu1 %v3340_v46  ;;  %v521_v12 = vpack.c.bf16 %v501_v57, %v501_v57 }
  0x83   : > { %3134 = vmatpush3.bf16.msra.mxu0 %v3335_v59 }
  0x84   : > { %3135 = vmatprep.subr.bf16.mxu0 %v3337_v4  ;;  %v1916_v59 = vshll.u32 %v521_v12, 16 }
  0x85   : > { %3170 = vmatpush3.bf16.msra.mxu1 %v3340_v46 }
  0x86   : > { %3088 = vmatmul.mubr.bf16.gmra.mxu0 %v3845_v40  ;;  %3171 = vmatprep.subr.bf16.mxu1 %v3342_v63  ;;  %v1918_v43 = vrot.slane %v1916_v59, 1 }
  0x87   : > { %3136 = vmatpush3.bf16.msra.mxu0 %v3337_v4  ;;  %3091 = vmatprep.mubr.bf16.mxu0 %v3853_v48 }
  0x88   : > { %3137 = vmatprep.subr.bf16.mxu0 %v3339_v17  ;;  %3124 = vmatmul.mubr.bf16.gmra.mxu1 %v4042_v23 }
  0x89   : > { %3172 = vmatpush3.bf16.msra.mxu1 %v3342_v63  ;;  %3175 = vmatprep.mubr.bf16.mxu1 %v3703_v26  ;;  %v3343_v26 = vld [vmem:[%s4353_s1 + $0x180] sm:$0xff]  }
  0x8a   : > { %3173 = vmatprep.subr.bf16.mxu1 %v3344_v25 }
  0x8b   : > { %3138 = vmatpush3.bf16.msra.mxu0 %v3339_v17 }
  0x8c   : > { %3139 = vmatprep.subr.bf16.mxu0 %v3341_v39 }
  0x8d   : > { %3174 = vmatpush3.bf16.msra.mxu1 %v3344_v25 }
  0x8e   : > { %3092 = vmatmul.mubr.bf16.gmra.mxu0 %v1366_v60  ;;  %3223 = vmatprep.subr.bf16.mxu1 %v3345_v45 }
  0x8f   : > { %3140 = vmatpush3.bf16.msra.mxu0 %v3341_v39  ;;  %3143 = vmatprep.mubr.msk.bf16.mxu0 %vm3627_vm11, %v3642_v38  ;;  %v500_v38 = vsel %vm4072_vm13, 0.0, %v416_v41 }
  0x90   : > { %3141 = vmatprep.subr.bf16.mxu0 %v3343_v26  ;;  %3176 = vmatmul.mubr.bf16.vlgmr.msra.gmra.mxu1 %v3735_v51  ;;  %v4109_v51 = vpack.c.bf16 %v500_v38, %v499_v8 }
  0x91   : > { %3231 = vmatpush3.bf16.msra.mxu1 %v3345_v45  ;;  %3179 = vmatprep.mubr.bf16.mxu1 %v3775_v30  ;;  %v3348_v30 = vld [vmem:[%s4353_s1 + $0x220] sm:$0xff]  }
  0x92   : > { %3224 = vmatprep.subr.bf16.mxu1 %v3346_v37  ;;  %v1909_v62 = vshrl.u32 %v4109_v51, 16  ;;  %v2101_v28 = vrot.slane %v4109_v51, 1 }
  0x93   : > { %3142 = vmatpush3.bf16.msra.mxu0 %v3343_v26 }
  0x94   : > { %3191 = vmatprep.subr.bf16.mxu0 %v3345_v45 }
  0x95   : > { %3232 = vmatpush3.bf16.msra.mxu1 %v3346_v37 }
  0x96   : > { %3144 = vmatmul.mubr.msk.bf16.vlgmr.msra.gmra.mxu0 %vm3627_vm11, %v3681_v2  ;;  %3225 = vmatprep.subr.bf16.mxu1 %v3347_v54  ;;  %v1911_v2 = vshll.u32 %v4109_v51, 16 }
  0x97   : > { %3192 = vmatpush3.bf16.msra.mxu0 %v3345_v45  ;;  %3147 = vmatprep.mubr.msk.bf16.mxu0 %vm3627_vm11, %v3716_v34 }
  0x98   : > { %3193 = vmatprep.subr.bf16.mxu0 %v3346_v37  ;;  %3180 = vmatmul.mubr.bf16.gmra.mxu1 %v3813_v6  ;;  %v1913_v34 = vrot.slane %v1911_v2, 1  ;;  %v3350_v6 = vld [vmem:[%s4353_s1 + $0x210] sm:$0xff]  }
  0x99   : > { %3233 = vmatpush3.bf16.msra.mxu1 %v3347_v54  ;;  %3183 = vmatprep.mubr.bf16.mxu1 %v3845_v40 }
  0x9a   : > { %3226 = vmatprep.subr.bf16.mxu1 %v3348_v30  ;;  %v1914_v40 = vor.u32 %v1913_v34, %v1909_v62 }
  0x9b   : > { %3194 = vmatpush3.bf16.msra.mxu0 %v3346_v37 }
  0x9c   : > { %3195 = vmatprep.subr.bf16.mxu0 %v3347_v54  ;;  %v1919_v46 = vsel %vm538_vm5, %v1914_v40, %v1918_v43 }
  0x9d   : > { %3234 = vmatpush3.bf16.msra.mxu1 %v3348_v30 }
  0x9e   : > { %3148 = vmatmul.mubr.msk.bf16.gmra.mxu0 %vm3627_vm11, %v3759_v15  ;;  %3227 = vmatprep.subr.bf16.mxu1 %v3349_v58  ;;  %v3351_v15 = vld [vmem:[%s4353_s1 + $0x208] sm:$0xff]  }
  0x9f   : > { %3196 = vmatpush3.bf16.msra.mxu0 %v3347_v54  ;;  %3151 = vmatprep.mubr.msk.bf16.mxu0 %vm3627_vm11, %v3796_v56  ;;  %v3352_v56 = vld [vmem:[%s4353_s1 + $0x200] sm:$0xff]  }
  0xa0   : > { %3197 = vmatprep.subr.bf16.mxu0 %v3348_v30  ;;  %3184 = vmatmul.mubr.bf16.gmra.mxu1 %v3853_v48  ;;  %v2102_v48 = vrot.slane %v521_v12, 1 }
  0xa1   : > { %3235 = vmatpush3.bf16.msra.mxu1 %v3349_v58  ;;  %3187 = vmatprep.mubr.bf16.mxu1 %v1366_v60 }
  0xa2   : > { %3228 = vmatprep.subr.bf16.mxu1 %v3350_v6 }
  0xa3   : > { %3198 = vmatpush3.bf16.msra.mxu0 %v3348_v30 }
  0xa4   : > { %3199 = vmatprep.subr.bf16.mxu0 %v3349_v58 }
  0xa5   : > { %3236 = vmatpush3.bf16.msra.mxu1 %v3350_v6 }
  0xa6   : > { %3152 = vmatmul.mubr.msk.bf16.gmra.mxu0 %vm3627_vm11, %v3818_v13  ;;  %3229 = vmatprep.subr.bf16.mxu1 %v3351_v15  ;;  %v2739_v13 = vpack.c.bf16 %v416_v41, %v415_v49 }
  0xa7   : > { %3200 = vmatpush3.bf16.msra.mxu0 %v3349_v58  ;;  %3155 = vmatprep.mubr.msk.bf16.mxu0 %vm3627_vm11, %v3945_v20  ;;  %v2103_v20 = vsel %vm966_vm12, %v2101_v28, %v2102_v48 }
  0xa8   : > { %3201 = vmatprep.subr.bf16.mxu0 %v3350_v6  ;;  %3188 = vmatmul.mubr.bf16.gmra.mxu1 %v1919_v46 }
  0xa9   : > { %3237 = vmatpush3.bf16.msra.mxu1 %v3351_v15  ;;  %3215 = vmatprep.mubr.bf16.mxu1 %v3954_v61 }
  0xaa   : > { %3230 = vmatprep.subr.bf16.mxu1 %v3352_v56 }
  0xab   : > { %3202 = vmatpush3.bf16.msra.mxu0 %v3350_v6 }
  0xac   : > { %3203 = vmatprep.subr.bf16.mxu0 %v3351_v15 }
  0xad   : > { %3238 = vmatpush3.bf16.msra.mxu1 %v3352_v56 }
  0xae   : > { %3156 = vmatmul.mubr.msk.bf16.gmra.mxu0 %vm2738_vm2, %v2739_v13 }
  0xaf   : > { %3204 = vmatpush3.bf16.msra.mxu0 %v3351_v15  ;;  %3207 = vmatprep.mubr.bf16.mxu0 %v3878_v7 }
  0xb0   : > { %3205 = vmatprep.subr.bf16.mxu0 %v3352_v56  ;;  %3216 = vmatmul.mubr.bf16.vlgmr.msra.gmra.mxu1 %v3974_v53 }
  0xb1   : > { %3219 = vmatprep.mubr.bf16.mxu1 %v4042_v23 }
  0xb3   : > { %3206 = vmatpush3.bf16.msra.mxu0 %v3352_v56 }
  0xb6   : > { %3208 = vmatmul.mubr.bf16.vlgmr.msra.gmra.mxu0 %v3910_v14 }
  0xb7   : > { %3211 = vmatprep.mubr.bf16.mxu0 %v3916_v44 }
  0xb8   : > { %3220 = vmatmul.mubr.bf16.gmra.mxu1 %v2103_v20 }
  0xbe   : > { %3212 = vmatmul.mubr.bf16.gmra.mxu0 %v3948_v21 }
  0xef   : > { %v2953_v61 = vpop.f32.mrf.mxu0 }
  0xf0   : > { %v2985_v7 = vpop.f32.mrf.mxu1 }
  0xf1   : > { %v896_v0 = vadd.f32 %v2985_v7, %v2953_v61  ;;  %v742_v3 = vpop.f32.mrf.mxu0 }
  0xf2   : > { %v887_v53 = vpop.f32.mrf.mxu1 }
  0xf3   : > { %v888_v4 = vadd.f32 %v887_v53, %v742_v3  ;;  %v2954_v5 = vpop.f32.mrf.mxu0 }
  0xf4   : > { %v2986_v9 = vpop.f32.mrf.mxu1 }
  0xf5   : > { %v899_v63 = vadd.f32 %v2986_v9, %v2954_v5  ;;  %v745_v10 = vpop.f32.mrf.mxu0 }
  0xf6   : > { %v890_v11 = vpop.f32.mrf.mxu1 }
  0xf7   : > { %v891_v1 = vadd.f32 %v890_v11, %v745_v10 }
  0xf8   : > { %v2989_v42 = vpop.f32.mrf.mxu1 }
  0xfa   : > { %v903_v16 = vpop.f32.mrf.mxu1 }
  0xfb   : > { %v2957_v14 = vpop.f32.mrf.mxu0 }
  0xfc   : > { %v2990_v17 = vpop.f32.mrf.mxu1  ;;  %v912_v44 = vadd.f32 %v2989_v42, %v2957_v14 }
  0xfd   : > { %v758_v23 = vpop.f32.mrf.mxu0 }
  0xfe   : > { %v906_v25 = vpop.f32.mrf.mxu1  ;;  %v904_v21 = vadd.f32 %v903_v16, %v758_v23 }
  0xff   : > { %v2958_v27 = vpop.f32.mrf.mxu0 }
 0x100   : > { %v2993_v29 = vpop.f32.mrf.mxu1  ;;  %v915_v31 = vadd.f32 %v2990_v17, %v2958_v27 }
 0x101   : > { %v761_v32 = vpop.f32.mrf.mxu0 }
 0x102   : > { %v919_v33 = vpop.f32.mrf.mxu1  ;;  %v907_v55 = vadd.f32 %v906_v25, %v761_v32 }
 0x104   : > { %v2994_v39 = vpop.f32.mrf.mxu1 }
 0x106   : > { %v922_v35 = vpop.f32.mrf.mxu1  ;;  %v2961_v45 = vpop.f32.mrf.mxu0 }
 0x107   : > { %v928_v47 = vadd.f32 %v2993_v29, %v2961_v45 }
 0x108   : > { %v2997_v52 = vpop.f32.mrf.mxu1  ;;  %v774_v22 = vpop.f32.mrf.mxu0 }
 0x109   : > { %v920_v24 = vadd.f32 %v919_v33, %v774_v22 }
 0x10a   : > { %v935_v60 = vpop.f32.mrf.mxu1  ;;  %v2962_v26 = vpop.f32.mrf.mxu0 }
 0x10b   : > { %v931_v36 = vadd.f32 %v2994_v39, %v2962_v26 }
 0x10c   : > { %v2998_v37 = vpop.f32.mrf.mxu1  ;;  %v777_v49 = vpop.f32.mrf.mxu0 }
 0x10d   : > { %v923_v41 = vadd.f32 %v922_v35, %v777_v49 }
 0x10e   : > { %v938_v50 = vpop.f32.mrf.mxu1  ;;  %v2965_v18 = vpop.f32.mrf.mxu0 }
 0x10f   : > { %v944_v8 = vadd.f32 %v2997_v52, %v2965_v18 }
 0x110   : > { %v3049_v54 = vpop.f32.mrf.mxu1  ;;  %v790_v38 = vpop.f32.mrf.mxu0 }
 0x111   : > { %v936_v51 = vadd.f32 %v935_v60, %v790_v38 }
 0x112   : > { %v1276_v19 = vpop.f32.mrf.mxu1  ;;  %v2966_v30 = vpop.f32.mrf.mxu0 }
 0x113   : > { %v947_v12 = vadd.f32 %v2998_v37, %v2966_v30 }
 0x114   : > { %v3050_v57 = vpop.f32.mrf.mxu1  ;;  %v793_v2 = vpop.f32.mrf.mxu0 }
 0x115   : > { %v939_v62 = vadd.f32 %v938_v50, %v793_v2 }
 0x116   : > { %v1279_v58 = vpop.f32.mrf.mxu1  ;;  %v3017_v34 = vpop.f32.mrf.mxu0 }
 0x117   : > { %v1163_v6 = vadd.f32 %v3017_v34, %v896_v0 }
 0x118   : > { %v3053_v59 = vpop.f32.mrf.mxu1  ;;  %v1098_v40 = vpop.f32.mrf.mxu0 }
 0x119   : > { %v1341_v15 = vadd.f32 %v3049_v54, %v1163_v6  ;;  %v1161_v46 = vadd.f32 %v1098_v40, %v888_v4 }
 0x11a   : > { %v1292_v43 = vpop.f32.mrf.mxu1  ;;  %v3018_v56 = vpop.f32.mrf.mxu0 }
 0x11b   : > { %v1339_v28 = vadd.f32 %v1276_v19, %v1161_v46  ;;  %v1164_v48 = vadd.f32 %v3018_v56, %v899_v63 }
 0x11c   : > { %v3054_v13 = vpop.f32.mrf.mxu1  ;;  %v1101_v20 = vpop.f32.mrf.mxu0 }
 0x11d   : > { %v1342_v7 = vadd.f32 %v3050_v57, %v1164_v48  ;;  %v1162_v3 = vadd.f32 %v1101_v20, %v891_v1 }
 0x11e   : > { %v1295_v61 = vpop.f32.mrf.mxu1  ;;  %v3021_v53 = vpop.f32.mrf.mxu0 }
 0x11f   : > { %v1340_v9 = vadd.f32 %v1279_v58, %v1162_v3  ;;  %v1167_v10 = vadd.f32 %v3021_v53, %v912_v44 }
 0x120   : > { %v3057_v5 = vpop.f32.mrf.mxu1  ;;  %v1114_v11 = vpop.f32.mrf.mxu0 }
 0x121   : > { %v1345_v16 = vadd.f32 %v3053_v59, %v1167_v10  ;;  %v1165_v0 = vadd.f32 %v1114_v11, %v904_v21 }
 0x122   : > { %v1308_v42 = vpop.f32.mrf.mxu1  ;;  %v3022_v14 = vpop.f32.mrf.mxu0 }
 0x123   : > { %v1343_v23 = vadd.f32 %v1292_v43, %v1165_v0  ;;  %v1168_v4 = vadd.f32 %v3022_v14, %v915_v31 }
 0x124   : > { %v3058_v17 = vpop.f32.mrf.mxu1  ;;  %v1117_v25 = vpop.f32.mrf.mxu0 }
 0x125   : > { %v1346_v29 = vadd.f32 %v3054_v13, %v1168_v4  ;;  %v1166_v63 = vadd.f32 %v1117_v25, %v907_v55 }
 0x126   : > { %v1311_v27 = vpop.f32.mrf.mxu1  ;;  %v3025_v32 = vpop.f32.mrf.mxu0 }
 0x127   : > { %v1344_v39 = vadd.f32 %v1295_v61, %v1166_v63  ;;  %v1171_v1 = vadd.f32 %v3025_v32, %v928_v47 }
 0x128   : > { %v3061_v33 = vpop.f32.mrf.mxu1  ;;  %v1130_v35 = vpop.f32.mrf.mxu0 }
 0x129   : > { %v4167_v52 = vadd.f32 %v3057_v5, %v1171_v1  ;;  %v1169_v44 = vadd.f32 %v1130_v35, %v920_v24 }
 0x12a   : > { %v1324_v45 = vpop.f32.mrf.mxu1  ;;  %v3026_v22 = vpop.f32.mrf.mxu0 }
 0x12b   : > { %v4169_v21 = vadd.f32 %v1308_v42, %v1169_v44  ;;  %v1172_v26 = vadd.f32 %v3026_v22, %v931_v36 }
 0x12c   : > { %v3062_v60 = vpop.f32.mrf.mxu1  ;;  %v1133_v37 = vpop.f32.mrf.mxu0 }
 0x12d   : > { %v4171_v49 = vadd.f32 %v3058_v17, %v1172_v26  ;;  %v1170_v50 = vadd.f32 %v1133_v37, %v923_v41 }
 0x12e   : > { %v1327_v31 = vpop.f32.mrf.mxu1  ;;  %v3029_v55 = vpop.f32.mrf.mxu0 }
 0x12f   : > { %v4173_v18 = vadd.f32 %v1311_v27, %v1170_v50  ;;  %v1175_v54 = vadd.f32 %v3029_v55, %v944_v8 }
 0x130   : > { %v1146_v47 = vpop.f32.mrf.mxu0  ;;  %v3113_v38 = vpop.f32.mrf.mxu1 }
 0x131   : > { %v4175_v19 = vadd.f32 %v3061_v33, %v1175_v54  ;;  %v1173_v30 = vadd.f32 %v1146_v47, %v936_v51 }
 0x132   : > { %v3030_v24 = vpop.f32.mrf.mxu0  ;;  %v1651_v57 = vpop.f32.mrf.mxu1 }
 0x133   : > { %v4177_v2 = vadd.f32 %v1324_v45, %v1173_v30  ;;  %v1176_v58 = vadd.f32 %v3030_v24, %v947_v12 }
 0x134   : > { %v1149_v36 = vpop.f32.mrf.mxu0  ;;  %v3114_v34 = vpop.f32.mrf.mxu1 }
 0x135   : > { %v4179_v59 = vadd.f32 %v3062_v60, %v1176_v58  ;;  %v1174_v6 = vadd.f32 %v1149_v36, %v939_v62 }
 0x136   : > { %v3081_v41 = vpop.f32.mrf.mxu0  ;;  %v1654_v40 = vpop.f32.mrf.mxu1 }
 0x137   : > { %v4181_v43 = vadd.f32 %v1327_v31, %v1174_v6  ;;  %v1532_v8 = vadd.f32 %v3081_v41, %v1341_v15 }
 0x138   : > { %v1467_v46 = vpop.f32.mrf.mxu0  ;;  %v3117_v56 = vpop.f32.mrf.mxu1 }
 0x139   : > { %v4183_v13 = vadd.f32 %v3113_v38, %v1532_v8  ;;  %v1530_v51 = vadd.f32 %v1467_v46, %v1339_v28 }
 0x13a   : > { %v3082_v48 = vpop.f32.mrf.mxu0  ;;  %v1667_v20 = vpop.f32.mrf.mxu1 }
 0x13b   : > { %v4185_v61 = vadd.f32 %v1651_v57, %v1530_v51  ;;  %v1533_v12 = vadd.f32 %v3082_v48, %v1342_v7 }
 0x13c   : > { %v1470_v3 = vpop.f32.mrf.mxu0  ;;  %v3118_v53 = vpop.f32.mrf.mxu1 }
 0x13d   : > { %v4187_v5 = vadd.f32 %v3114_v34, %v1533_v12  ;;  %v1531_v62 = vadd.f32 %v1470_v3, %v1340_v9 }
 0x13e   : > { %v3085_v10 = vpop.f32.mrf.mxu0  ;;  %v1670_v11 = vpop.f32.mrf.mxu1 }
 0x13f   : > { %v4189_v42 = vadd.f32 %v1654_v40, %v1531_v62  ;;  %v1536_v15 = vadd.f32 %v3085_v10, %v1345_v16 }
 0x140   : > { %v1483_v0 = vpop.f32.mrf.mxu0  ;;  %v3121_v14 = vpop.f32.mrf.mxu1 }
 0x141   : > { %v4191_v17 = vadd.f32 %v3117_v56, %v1536_v15  ;;  %v1534_v28 = vadd.f32 %v1483_v0, %v1343_v23 }
 0x142   : > { %v3086_v4 = vpop.f32.mrf.mxu0  ;;  %v1683_v25 = vpop.f32.mrf.mxu1 }
 0x143   : > { %v4193_v27 = vadd.f32 %v1667_v20, %v1534_v28  ;;  %v1537_v7 = vadd.f32 %v3086_v4, %v1346_v29 }
 0x144   : > { %v1486_v63 = vpop.f32.mrf.mxu0  ;;  %v3122_v32 = vpop.f32.mrf.mxu1 }
 0x145   : > { %v4195_v33 = vadd.f32 %v3118_v53, %v1537_v7  ;;  %v1535_v9 = vadd.f32 %v1486_v63, %v1344_v39 }
 0x146   : > { %v3089_v1 = vpop.f32.mrf.mxu0  ;;  %v1686_v35 = vpop.f32.mrf.mxu1 }
 0x147   : > { %v4197_v45 = vadd.f32 %v1670_v11, %v1535_v9  ;;  %v1540_v12 = vadd.f32 %v3089_v1, %v4167_v52 }
 0x148   : > { %v1499_v16 = vpop.f32.mrf.mxu0  ;;  %v3125_v44 = vpop.f32.mrf.mxu1 }
 0x149   : > { %4370 = vst [vmem:[#allocation2_spill] sm:$0xff] %v4197_v45  ;;  %v1538_v62 = vadd.f32 %v1499_v16, %v4169_v21  ;;  %v1724_v15 = vadd.f32 %v3121_v14, %v1540_v12 }
 0x14a   : > { %v3090_v22 = vpop.f32.mrf.mxu0  ;;  %v4199_v60 = vpop.f32.mrf.mxu1 }
 0x14b   : > { %v1541_v0 = vadd.f32 %v3090_v22, %v4171_v49  ;;  %v1722_v7 = vadd.f32 %v1683_v25, %v1538_v62 }
 0x14c   : > { %v1502_v23 = vpop.f32.mrf.mxu0  ;;  %v4201_v26 = vpop.f32.mrf.mxu1 }
 0x14d   : > { %v1539_v63 = vadd.f32 %v1502_v23, %v4173_v18 }
 0x14e   : > { %v3093_v37 = vpop.f32.mrf.mxu0  ;;  %v4203_v31 = vpop.f32.mrf.mxu1 }
 0x14f   : > { %v1723_v14 = vadd.f32 %v1686_v35, %v1539_v63 }
 0x150   : > { %v1515_v29 = vpop.f32.mrf.mxu0  ;;  %v4205_v50 = vpop.f32.mrf.mxu1 }
 0x151   : > { %v1542_v49 = vadd.f32 %v1515_v29, %v4177_v2 }
 0x152   : > { %v3094_v55 = vpop.f32.mrf.mxu0  ;;  %v4207_v39 = vpop.f32.mrf.mxu1 }
 0x153   : > { %v1545_v25 = vadd.f32 %v3094_v55, %v4179_v59  ;;  %v1726_v59 = vadd.f32 %v4199_v60, %v1542_v49 }
 0x154   : > { %v4209_v54 = vpop.f32.mrf.mxu0  ;;  %v4211_v47 = vpop.f32.mrf.mxu1 }
 0x156   : > { %v3145_v38 = vpop.f32.mrf.mxu0  ;;  %v4213_v30 = vpop.f32.mrf.mxu1 }
 0x158   : > { %v1829_v24 = vpop.f32.mrf.mxu0  ;;  %v4215_v57 = vpop.f32.mrf.mxu1 }
 0x159   : > { %v1892_v2 = vadd.f32 %v1829_v24, %v4185_v61 }
 0x15a   : > { %v3146_v58 = vpop.f32.mrf.mxu0  ;;  %v4217_v36 = vpop.f32.mrf.mxu1 }
 0x15c   : > { %v4219_v34 = vpop.f32.mrf.mxu0  ;;  %v4221_v6 = vpop.f32.mrf.mxu1 }
 0x15d   : > { %4371 = vst [vmem:[#allocation3_spill] sm:$0xff] %v4221_v6  ;;  %v1725_v6 = vadd.f32 %v3122_v32, %v1541_v0  ;;  %v1894_v32 = vadd.f32 %v3145_v38, %v4183_v13  ;;  %v1543_v13 = vadd.f32 %v4209_v54, %v4181_v43  ;;  %v1895_v38 = vadd.f32 %v3146_v58, %v4187_v5 }
 0x15e   : > { %v4223_v41 = vpop.f32.mrf.mxu0  ;;  %v4225_v40 = vpop.f32.mrf.mxu1 }
 0x15f   : > { %4372 = vst [vmem:[#allocation4_spill] sm:$0xff] %v4225_v40  ;;  %v1544_v40 = vadd.f32 %v3093_v37, %v4175_v19  ;;  %v2086_v62 = vadd.f32 %v4211_v47, %v1895_v38 }
 0x160   : > { %v4227_v8 = vpop.f32.mrf.mxu0  ;;  %v3185_v46 = vpop.f32.mrf.mxu1 }
 0x161   : > { %v1728_v45 = vadd.f32 %v3125_v44, %v1544_v40 }
 0x162   : > { %v4229_v56 = vpop.f32.mrf.mxu0  ;;  %v2052_v51 = vpop.f32.mrf.mxu1 }
 0x164   : > { %v4232_v48 = vpop.f32.mrf.mxu0  ;;  %v3186_v20 = vpop.f32.mrf.mxu1 }
 0x165   : > { %4373 = vst [vmem:[#allocation5_spill] sm:$0xff] %v4232_v48 }
 0x166   : > { %v3153_v3 = vpop.f32.mrf.mxu0  ;;  %v2055_v53 = vpop.f32.mrf.mxu1 }
 0x167   : > { %v1902_v9 = vadd.f32 %v3153_v3, %v1724_v15 }
 0x168   : > { %v1861_v10 = vpop.f32.mrf.mxu0  ;;  %v3189_v11 = vpop.f32.mrf.mxu1 }
 0x169   : > { %v1900_v48 = vadd.f32 %v1861_v10, %v1722_v7  ;;  %v2093_v22 = vadd.f32 %v3185_v46, %v1902_v9  ;;  %v1729_v46 = vadd.f32 %v4201_v26, %v1545_v25  ;;  %v1893_v26 = vadd.f32 %v4219_v34, %v4189_v42 }
 0x16a   : > { %v3154_v28 = vpop.f32.mrf.mxu0  ;;  %v2068_v4 = vpop.f32.mrf.mxu1  ;;  %v1898_v42 = vadd.f32 %v4223_v41, %v4191_v17 }
 0x16b   : > { %v1903_v12 = vadd.f32 %v3154_v28, %v1725_v6  ;;  %v2091_v23 = vadd.f32 %v2052_v51, %v1900_v48  ;;  %v2085_v51 = vadd.f32 %v4205_v50, %v1894_v32  ;;  %v2084_v7 = vadd.f32 %v4213_v30, %v1893_v26 }
 0x16c   : > { %v1864_v52 = vpop.f32.mrf.mxu0  ;;  %v3190_v1 = vpop.f32.mrf.mxu1 }
 0x16d   : > { %v1901_v37 = vadd.f32 %v1864_v52, %v1723_v14  ;;  %v2094_v55 = vadd.f32 %v3186_v20, %v1903_v12  ;;  %v2083_v20 = vadd.f32 %v4207_v39, %v1892_v2  ;;  %v4375_v14 = vld [vmem:[#allocation5_spill] sm:$0xff] }
 0x16e   : > { %v3157_v21 = vpop.f32.mrf.mxu0  ;;  %v4239_v16 = vpop.f32.mrf.mxu1 }
 0x16f   : > { %v1906_v6 = vadd.f32 %v3157_v21, %v1728_v45  ;;  %v2092_v48 = vadd.f32 %v2055_v53, %v1901_v37  ;;  %v1727_v53 = vadd.f32 %v4203_v31, %v1543_v13  ;;  %v1896_v31 = vadd.f32 %v4227_v8, %v4193_v27  ;;  %v4374_v21 = vld [vmem:[#allocation2_spill] sm:$0xff] }
 0x170   : > { %v1877_v18 = vpop.f32.mrf.mxu0  ;;  %v3217_v19 = vpop.f32.mrf.mxu1  ;;  %v2089_v27 = vadd.f32 %v4215_v57, %v1898_v42  ;;  %v1897_v49 = vadd.f32 %v4375_v14, %v4374_v21 }
 0x171   : > { %v4249_v35 = vadd.f32 %v3217_v19, %v2093_v22  ;;  %v1904_v60 = vadd.f32 %v1877_v18, %v1726_v59  ;;  %v2097_v5 = vadd.f32 %v3189_v11, %v1906_v6  ;;  %v4376_v19 = vld [vmem:[#allocation3_spill] sm:$0xff] }
 0x172   : > { %v3158_v44 = vpop.f32.mrf.mxu0  ;;  %v2236_v29 = vpop.f32.mrf.mxu1 }
 0x173   : > { %2293 = vst [vmem:[%s4246_s15 + $0x50] sm:$0xff] %v4249_v35  ;;  %v4255_v40 = vadd.f32 %v2236_v29, %v2091_v23  ;;  %v1907_v58 = vadd.f32 %v3158_v44, %v1729_v46  ;;  %v2095_v34 = vadd.f32 %v2068_v4, %v1904_v60  ;;  %v1899_v4 = vadd.f32 %v4229_v56, %v4195_v33  ;;  %v4377_v29 = vld [vmem:[#allocation4_spill] sm:$0xff] }
 0x174   : > { %v1880_v61 = vpop.f32.mrf.mxu0  ;;  %v3218_v24 = vpop.f32.mrf.mxu1  ;;  %v2088_v59 = vadd.f32 %v4377_v29, %v1897_v49 }
 0x175   : > { %2291 = vst [vmem:[%s4246_s15 + $0x40] sm:$0xff] %v4255_v40  ;;  %v4264_v45 = vadd.f32 %v3218_v24, %v2094_v55  ;;  %v1905_v0 = vadd.f32 %v1880_v61, %v1727_v53  ;;  %v2098_v63 = vadd.f32 %v3190_v1, %v1907_v58  ;;  %v2087_v1 = vadd.f32 %v4217_v36, %v1896_v31 }
 0x176   : > { %v3209_v43 = vpop.f32.mrf.mxu0  ;;  %v2239_v54 = vpop.f32.mrf.mxu1  ;;  %v2090_v32 = vadd.f32 %v4376_v19, %v1899_v4 }
 0x177   : > { %v2269_v3 = vadd.f32 %v3209_v43, %v2085_v51  ;;  %2294 = vst [vmem:[%s4246_s15 + $0x58] sm:$0xff] %v4264_v45  ;;  %v4271_v50 = vadd.f32 %v2239_v54, %v2092_v48  ;;  %v2096_v22 = vadd.f32 %v4239_v16, %v1905_v0  ;;  %v2330_v0 = vmul.f32 %v4249_v35, %v4249_v35 }
 0x178   : > { %v2204_v10 = vpop.f32.mrf.mxu0  ;;  %v3221_v39 = vpop.f32.mrf.mxu1 }
 0x179   : > { %2285 = vst [vmem:[%s4246_s15 + $0x10] sm:$0xff] %v2269_v3  ;;  %v2267_v11 = vadd.f32 %v2204_v10, %v2083_v20  ;;  %2292 = vst [vmem:[%s4246_s15 + $0x48] sm:$0xff] %v4271_v50  ;;  %v4280_v15 = vadd.f32 %v3221_v39, %v2097_v5  ;;  %v2322_v37 = vmul.f32 %v2269_v3, %v2269_v3 }
 0x17a   : > { %v3210_v47 = vpop.f32.mrf.mxu0  ;;  %v2252_v28 = vpop.f32.mrf.mxu1  ;;  %v2328_v10 = vmul.f32 %v4255_v40, %v4255_v40 }
 0x17b   : > { %2283 = vst [vmem:[%s4246_s15] sm:$0xff] %v2267_v11  ;;  %v2270_v17 = vadd.f32 %v3210_v47, %v2086_v62  ;;  %2297 = vst [vmem:[%s4246_s15 + $0x70] sm:$0xff] %v4280_v15  ;;  %v4288_v41 = vadd.f32 %v2252_v28, %v2095_v34  ;;  %v2320_v12 = vmul.f32 %v2267_v11, %v2267_v11 }
 0x17c   : > { %v2207_v9 = vpop.f32.mrf.mxu0  ;;  %v3222_v52 = vpop.f32.mrf.mxu1  ;;  %v2329_v34 = vmul.f32 %v4271_v50, %v4271_v50 }
 0x17d   : > { %2286 = vst [vmem:[%s4246_s15 + $0x18] sm:$0xff] %v2270_v17  ;;  %v2268_v8 = vadd.f32 %v2207_v9, %v2084_v7  ;;  %2295 = vst [vmem:[%s4246_s15 + $0x60] sm:$0xff] %v4288_v41  ;;  %v4296_v30 = vadd.f32 %v3222_v52, %v2098_v63  ;;  %v2323_v6 = vmul.f32 %v2270_v17, %v2270_v17 }
 0x17e   : > { %v3213_v33 = vpop.f32.mrf.mxu0  ;;  %v2255_v56 = vpop.f32.mrf.mxu1  ;;  %v2331_v7 = vmul.f32 %v4264_v45, %v4264_v45 }
 0x17f   : > { %2284 = vst [vmem:[%s4246_s15 + $0x8] sm:$0xff] %v2268_v8  ;;  %v2299_v57 = vadd.f32 %v2268_v8, %v2267_v11  ;;  %v2321_v25 = vmul.f32 %v2268_v8, %v2268_v8  ;;  %v2273_v18 = vadd.f32 %v3213_v33, %v2089_v27  ;;  %2298 = vst [vmem:[%s4246_s15 + $0x78] sm:$0xff] %v4296_v30 }
 0x180   : > { %v2220_v36 = vpop.f32.mrf.mxu0  ;;  %v2280_v23 = vadd.f32 %v2255_v56, %v2096_v22  ;;  %v2334_v8 = vmul.f32 %v4280_v15, %v4280_v15 }
 0x181   : > { %v2300_v2 = vadd.f32 %v2299_v57, %v2269_v3  ;;  %v2336_v44 = vadd.f32 %v2321_v25, %v2320_v12  ;;  %2289 = vst [vmem:[%s4246_s15 + $0x30] sm:$0xff] %v2273_v18  ;;  %v2271_v16 = vadd.f32 %v2220_v36, %v2087_v1  ;;  %v2326_v54 = vmul.f32 %v2273_v18, %v2273_v18 }
 0x182   : > { %v3214_v55 = vpop.f32.mrf.mxu0  ;;  %2296 = vst [vmem:[%s4246_s15 + $0x68] sm:$0xff] %v2280_v23 }
 0x183   : > { %v2337_v46 = vadd.f32 %v2336_v44, %v2322_v37  ;;  %2287 = vst [vmem:[%s4246_s15 + $0x20] sm:$0xff] %v2271_v16  ;;  %v2301_v13 = vadd.f32 %v2300_v2, %v2270_v17  ;;  %v2274_v38 = vadd.f32 %v3214_v55, %v2090_v32  ;;  %v2324_v51 = vmul.f32 %v2271_v16, %v2271_v16 }
 0x184   : > { %v2223_v61 = vpop.f32.mrf.mxu0 }
 0x185   : > { %v2302_v24 = vadd.f32 %v2301_v13, %v2271_v16  ;;  %v2338_v48 = vadd.f32 %v2337_v46, %v2323_v6  ;;  %2290 = vst [vmem:[%s4246_s15 + $0x38] sm:$0xff] %v2274_v38  ;;  %v2272_v60 = vadd.f32 %v2223_v61, %v2088_v59  ;;  %v2327_v3 = vmul.f32 %v2274_v38, %v2274_v38 }
 0x187   : > { %v2339_v20 = vadd.f32 %v2338_v48, %v2324_v51  ;;  %2288 = vst [vmem:[%s4246_s15 + $0x28] sm:$0xff] %v2272_v60  ;;  %v2303_v26 = vadd.f32 %v2302_v24, %v2272_v60  ;;  %v2325_v43 = vmul.f32 %v2272_v60, %v2272_v60 }
 0x189   : > { %v2304_v5 = vadd.f32 %v2303_v26, %v2273_v18  ;;  %v2340_v58 = vadd.f32 %v2339_v20, %v2325_v43 }
 0x18b   : > { %v2305_v53 = vadd.f32 %v2304_v5, %v2274_v38  ;;  %v2341_v62 = vadd.f32 %v2340_v58, %v2326_v54 }
 0x18d   : > { %v2306_v39 = vadd.f32 %v2305_v53, %v4255_v40  ;;  %v2342_v42 = vadd.f32 %v2341_v62, %v2327_v3  ;;  %v2332_v40 = vmul.f32 %v4288_v41, %v4288_v41 }
 0x18f   : > { %v2343_v11 = vadd.f32 %v2342_v42, %v2328_v10  ;;  %v2307_v31 = vadd.f32 %v2306_v39, %v4271_v50  ;;  %v2333_v50 = vmul.f32 %v2280_v23, %v2280_v23 }
 0x191   : > { %v2308_v47 = vadd.f32 %v2307_v31, %v4249_v35  ;;  %v2344_v28 = vadd.f32 %v2343_v11, %v2329_v34 }
 0x193   : > { %v2309_v63 = vadd.f32 %v2308_v47, %v4264_v45  ;;  %v2345_v17 = vadd.f32 %v2344_v28, %v2330_v0  ;;  %v2335_v45 = vmul.f32 %v4296_v30, %v4296_v30 }
 0x195   : > { %v2310_v4 = vadd.f32 %v2309_v63, %v4288_v41  ;;  %v2346_v9 = vadd.f32 %v2345_v17, %v2331_v7 }
 0x197   : > { %v2311_v52 = vadd.f32 %v2310_v4, %v2280_v23  ;;  %v2347_v27 = vadd.f32 %v2346_v9, %v2332_v40 }
 0x199   : > { %v2312_v35 = vadd.f32 %v2311_v52, %v4280_v15  ;;  %v2348_v1 = vadd.f32 %v2347_v27, %v2333_v50 }
 0x19b   : > { %v2313_v21 = vadd.f32 %v2312_v35, %v4296_v30  ;;  %v2349_v14 = vadd.f32 %v2348_v1, %v2334_v8 }
 0x19d   : > { %v2314_v49 = vrot.slane %v2313_v21, 4  ;;  %v2350_v22 = vadd.f32 %v2349_v14, %v2335_v45 }
 0x19f   : > { %v2315_v41 = vadd.f32 %v2314_v49, %v2313_v21  ;;  %v2351_v33 = vrot.slane %v2350_v22, 4 }
 0x1a1   : > { %v2316_v56 = vrot.slane %v2315_v41, 2  ;;  %v2352_v12 = vadd.f32 %v2351_v33, %v2350_v22 }
 0x1a3   : > { %v2317_v57 = vadd.f32 %v2316_v56, %v2315_v41  ;;  %v2353_v25 = vrot.slane %v2352_v12, 2 }
 0x1a5   : > { %v2318_v18 = vrot.slane %v2317_v57, 1  ;;  %v2354_v19 = vadd.f32 %v2353_v25, %v2352_v12 }
 0x1a7   : > { %v2355_v32 = vrot.slane %v2354_v19, 1  ;;  %v2319_v15 = vadd.f32 %v2318_v18, %v2317_v57 }
 0x1a9   : > { %v2356_v30 = vadd.f32 %v2355_v32, %v2354_v19 }
 0x1ab   : > { %v2358_v36 = vsel %vm2357_vm3, %v2319_v15, %v2356_v30 }
 0x1ac   : > { %2359 = vst [vmem:[%s280_s25] sm:$0x3] %v2358_v36 }
 0x1ad PF: > { %s16_s22 = sadd.s32 1, %s3393_s22   ;;  %s4378_s18 = smov %s3385_s20 }
 0x1ae   : > { %p13_p9 = scmp.ge.s32.totalorder %s16_s22, 6   ;;  %s4379_s19 = smov %s3389_s21 }
 0x1af   : > { %s4380_s20 = smov %s4383_s23  ;;  %s4381_s21 = smov %s4387_s24 }
 0x1b0   :  { %15 = sbr.rel (!%p13_p9) target bundleno = 3 (0x3), region = 86 }

</bundles_post_ra>
